<compile_context>
chip_gen: v7x
topology: tpu7x:2x2x1
jax: 0.10.0
libtpu: 0.0.40
codegen_flags: <defaults>
</compile_context>

<pallas_src>
import jax
import jax.numpy as jnp
from jax.experimental import pallas as pl
from jax.experimental.pallas import tpu as pltpu


# ----------------------------------------------------------------------------
# Fused encoder kernel.
#
# a1 scratch (100, 128): a1[10*i + j, 32*(2*rh+rw) + c] = relu(conv1) at spatial
#   (2*i + rh, 2*j + rw), channel c   (stride-2 phase packed along lanes).
# a2 scratch (89, 64):   row t = 10*oh2 + ow2 (rows with t%10 == 9 are harmless
#   junk that conv3 never reads for valid outputs).
# ----------------------------------------------------------------------------
def _encoder_kernel(p_ref, w1_ref, b1_ref, w2_ref, b2_ref, w3_ref, b3_ref,
                    out_ref, a1_ref, a2_ref):
    # ---- conv1: single block-diagonal MXU matmul -> (100, 128), lane-dense ----
    z1 = jnp.dot(p_ref[0], w1_ref[...], preferred_element_type=jnp.float32)
    a1_ref[...] = jnp.maximum(z1 + b1_ref[...], 0.0)

    # ---- conv2: kernel 4x4, stride 2, 32 -> 64 ch, out 9x9 (4 fused matmuls) ----
    # Kernel offsets (kh, kw) = (2*qh + rh, 2*qw + rw); the 4 phases (rh, rw) share
    # the same row-start 10*qh + qw and are already stacked along K (lanes of a1).
    acc2 = jnp.zeros((89, 64), jnp.float32)
    for qh in range(2):
        for qw in range(2):
            acc2 = acc2 + jnp.dot(a1_ref[pl.ds(10 * qh + qw, 89), :],
                                  w2_ref[2 * qh + qw],
                                  preferred_element_type=jnp.float32)
    a2_ref[...] = jnp.maximum(acc2 + b2_ref[...], 0.0)

    # ---- conv3: kernel 3x3, stride 1, 64 -> 64 ch, out 7x7 ----
    acc3 = jnp.zeros((67, 64), jnp.float32)
    for kh in range(3):
        for kw in range(3):
            acc3 = acc3 + jnp.dot(a2_ref[pl.ds(10 * kh + kw, 67), :],
                                  w3_ref[kh * 3 + kw],
                                  preferred_element_type=jnp.float32)
    a3 = jnp.maximum(acc3 + b3_ref[...], 0.0)            # rows t = 10*oh3 + ow3

    # Compact padded rows: out row 7*oh + ow <- a3 row 10*oh + ow.
    for oh in range(7):
        out_ref[0, oh * 7:(oh + 1) * 7, :] = a3[oh * 10:oh * 10 + 7, :]


# ----------------------------------------------------------------------------
# Wrapper-side conv1 im2col (cheap: 4 slices + reshape/transpose on the small raw
# input).  Rows ordered (i2, j2); columns ordered (rh, rw, qh, ri, qw, rj, c) so
# the phase blocks line up with the block-diagonal conv1 weight.
# ----------------------------------------------------------------------------
def _conv1_patches_phase_in_cols(x_nchw):
    N, C, H, W = x_nchw.shape
    assert H == 84 and W == 84, "CNNEncoder expects 84x84 input (feature_size=3136)"
    x = jnp.transpose(x_nchw, (0, 2, 3, 1))                  # (N, 84, 84, C)
    xb = x.reshape(N, 21, 4, 21, 4, C)                       # n, bi, ri, bj, rj, c
    parts = [xb[:, qh:qh + 20, :, qw:qw + 20, :, :]          # (N, 20, 4, 20, 4, C)
             for qh in (0, 1) for qw in (0, 1)]
    p = jnp.stack(parts, axis=1)                             # (N, 4, 20, 4, 20, 4, C)
    # split: 4 -> (qh, qw); 20 -> (i2, rh); 20 -> (j2, rw)
    p = p.reshape(N, 2, 2, 10, 2, 4, 10, 2, 4, C)            # n qh qw i2 rh ri j2 rw rj c
    p = jnp.transpose(p, (0, 3, 6, 4, 7, 1, 5, 2, 8, 9))     # n i2 j2 rh rw qh ri qw rj c
    return p.reshape(N, 100, 4 * 64 * C)


def _prepare_weights(params, C):
    K1 = 64 * C
    # PyTorch (OC, Cin, KH, KW) -> (KH, KW, Cin, OC), flattened per kernel position.
    w1m = jnp.transpose(params["w1"], (2, 3, 1, 0)).reshape(K1, 32).astype(jnp.float32)
    # Block-diagonal conv1 weight: phase p uses lanes [32p, 32p+32).
    w1_bd = jnp.zeros((4 * K1, 128), jnp.float32)
    for p in range(4):
        w1_bd = w1_bd.at[p * K1:(p + 1) * K1, p * 32:(p + 1) * 32].set(w1m)
    b1 = jnp.tile(params["b1"].reshape(1, 32).astype(jnp.float32), (1, 4))   # (1, 128)

    # conv2 weight, grouped by (qh, qw) with the 4 phases stacked along K.
    w2k = jnp.transpose(params["w2"], (2, 3, 1, 0)).astype(jnp.float32)      # (4,4,32,64)
    w2k = w2k.reshape(2, 2, 2, 2, 32, 64)                                    # qh rh qw rw cin co
    w2m = jnp.transpose(w2k, (0, 2, 1, 3, 4, 5)).reshape(4, 128, 64)         # g, 32p+cin, co
    b2 = params["b2"].reshape(1, 64).astype(jnp.float32)

    w3m = jnp.transpose(params["w3"], (2, 3, 1, 0)).reshape(9, 64, 64).astype(jnp.float32)
    b3 = params["b3"].reshape(1, 64).astype(jnp.float32)
    return w1_bd, b1, w2m, b2, w3m, b3


# ----------------------------------------------------------------------------
# CNNEncoder.forward
# ----------------------------------------------------------------------------
def cnn_encoder_forward(x_nchw, params):
    N, C = x_nchw.shape[0], x_nchw.shape[1]
    K1 = 64 * C
    patches = _conv1_patches_phase_in_cols(x_nchw).astype(jnp.float32)   # (N, 100, 4*K1)
    w1_bd, b1, w2m, b2, w3m, b3 = _prepare_weights(params, C)

    out = pl.pallas_call(
        _encoder_kernel,
        out_shape=jax.ShapeDtypeStruct((N, 49, 64), jnp.float32),
        grid_spec=pltpu.PrefetchScalarGridSpec(
            num_scalar_prefetch=0,
            grid=(N,),
            in_specs=[
                pl.BlockSpec((1, 100, 4 * K1), lambda n: (n, 0, 0)),   # conv1 patches
                pl.BlockSpec((4 * K1, 128), lambda n: (0, 0)),         # w1 (block-diag)
                pl.BlockSpec((1, 128), lambda n: (0, 0)),              # b1 (phase-tiled)
                pl.BlockSpec((4, 128, 64), lambda n: (0, 0, 0)),       # w2 per (qh,qw)
                pl.BlockSpec((1, 64), lambda n: (0, 0)),               # b2
                pl.BlockSpec((9, 64, 64), lambda n: (0, 0, 0)),        # w3 per (kh,kw)
                pl.BlockSpec((1, 64), lambda n: (0, 0)),               # b3
            ],
            out_specs=pl.BlockSpec((1, 49, 64), lambda n: (n, 0, 0)),
            scratch_shapes=[
                pltpu.VMEM((100, 128), jnp.float32),   # a1 (phase packed along lanes)
                pltpu.VMEM((89, 64), jnp.float32),     # a2 (row-padded)
            ],
        ),
        compiler_params=pltpu.CompilerParams(
            dimension_semantics=("parallel",),         # batch split across TCs (v7x)
            vmem_limit_bytes=32 * 1024 * 1024,
        ),
    )(patches, w1_bd, b1, w2m, b2, w3m, b3)

    # (N, 49, 64) spatial-major -> channel-major == nn.Flatten on NCHW output.
    return jnp.transpose(out, (0, 2, 1)).reshape(N, 64 * 49)


# ----------------------------------------------------------------------------
# Pure-JAX reference (lax.conv) for correctness checking.
# ----------------------------------------------------------------------------
def cnn_encoder_reference(x_nchw, params):
    def conv(x, w, b, stride):
        y = jax.lax.conv_general_dilated(
            x, w, (stride, stride), "VALID",
            dimension_numbers=("NCHW", "OIHW", "NCHW"))
        return jax.nn.relu(y + b.reshape(1, -1, 1, 1))

    x = conv(x_nchw, params["w1"], params["b1"], 4)
    x = conv(x, params["w2"], params["b2"], 2)
    x = conv(x, params["w3"], params["b3"], 1)
    return x.reshape(x.shape[0], -1)


def init_params(key, n_input):
    ks = jax.random.split(key, 6)

    def w(k, shape):
        fan_in = shape[1] * shape[2] * shape[3]
        return jax.random.normal(k, shape, jnp.float32) / jnp.sqrt(fan_in)

    return {
        "w1": w(ks[0], (32, n_input, 8, 8)),
        "b1": 0.01 * jax.random.normal(ks[1], (32,), jnp.float32),
        "w2": w(ks[2], (64, 32, 4, 4)),
        "b2": 0.01 * jax.random.normal(ks[3], (64,), jnp.float32),
        "w3": w(ks[4], (64, 64, 3, 3)),
        "b3": 0.01 * jax.random.normal(ks[5], (64,), jnp.float32),
    }


if __name__ == "__main__":
    key = jax.random.PRNGKey(0)
    k_x, k_p = jax.random.split(key)

    # 84x84 is implied by the module (feature_size == 3136 == 64 * 7 * 7).
    batch, n_input, spatial = 2, 4, 84
    x = jax.random.normal(k_x, (batch, n_input, spatial, spatial), jnp.float32)
    params = init_params(k_p, n_input)

    fwd = jax.jit(cnn_encoder_forward)
    out = jax.block_until_ready(fwd(x, params))
    assert out.shape == (batch, 3136), out.shape

    ref = jax.block_until_ready(cnn_encoder_reference(x, params))
    err = float(jnp.max(jnp.abs(out - ref)))
    assert jnp.allclose(out, ref, atol=2e-4, rtol=2e-4), err

    print("KERNEL_OK")
</pallas_src>

<mosaic_0001>
module attributes {stable_mosaic.version = 11 : i64} {
  func.func @_encoder_kernel(%arg0: i32, %arg1: memref<1x100x1024xf32, #tpu.memory_space<vmem>>, %arg2: memref<1024x128xf32, #tpu.memory_space<vmem>>, %arg3: memref<1x128xf32, #tpu.memory_space<vmem>>, %arg4: memref<4x128x64xf32, #tpu.memory_space<vmem>>, %arg5: memref<1x64xf32, #tpu.memory_space<vmem>>, %arg6: memref<9x64x64xf32, #tpu.memory_space<vmem>>, %arg7: memref<1x64xf32, #tpu.memory_space<vmem>>, %arg8: memref<1x49x64xf32, #tpu.memory_space<vmem>>, %arg9: memref<100x128xf32, #tpu.memory_space<vmem>>, %arg10: memref<89x64xf32, #tpu.memory_space<vmem>>) attributes {dimension_semantics = [#tpu.dimension_semantics<parallel>], iteration_bounds = array<i64: 2>, scalar_prefetch = 0 : i64, scratch_operands = 2 : i64, tpu.core_type = #tpu.core_type<tc>, window_params = [{transform_indices = @transform_0, window_bounds = array<i64: 1, 100, 1024>}, {pipeline_mode = #tpu.pipeline_mode<synchronous>, transform_indices = @transform_1, window_bounds = array<i64: 1024, 128>}, {pipeline_mode = #tpu.pipeline_mode<synchronous>, transform_indices = @transform_2, window_bounds = array<i64: 1, 128>}, {pipeline_mode = #tpu.pipeline_mode<synchronous>, transform_indices = @transform_3, window_bounds = array<i64: 4, 128, 64>}, {pipeline_mode = #tpu.pipeline_mode<synchronous>, transform_indices = @transform_4, window_bounds = array<i64: 1, 64>}, {pipeline_mode = #tpu.pipeline_mode<synchronous>, transform_indices = @transform_5, window_bounds = array<i64: 9, 64, 64>}, {pipeline_mode = #tpu.pipeline_mode<synchronous>, transform_indices = @transform_6, window_bounds = array<i64: 1, 64>}, {transform_indices = @transform_7, window_bounds = array<i64: 1, 49, 64>}]} {
    %c0 = arith.constant 0 : index
    %c0_0 = arith.constant 0 : index
    %c0_1 = arith.constant 0 : index
    %0 = vector.load %arg1[%c0, %c0_0, %c0_1] : memref<1x100x1024xf32, #tpu.memory_space<vmem>>, vector<1x100x1024xf32>
    %1 = vector.shape_cast %0 : vector<1x100x1024xf32> to vector<100x1024xf32>
    %c0_2 = arith.constant 0 : index
    %c0_3 = arith.constant 0 : index
    %2 = vector.load %arg2[%c0_2, %c0_3] : memref<1024x128xf32, #tpu.memory_space<vmem>>, vector<1024x128xf32>
    %cst = arith.constant dense<0.000000e+00> : vector<100x128xf32>
    %3 = tpu.matmul %1, %2, %cst {dimension_numbers = #tpu.dot_dimension_numbers<[1], [0], [0], [1], [0, 0, 1, 1], [], []>} : vector<100x1024xf32>, vector<1024x128xf32>, vector<100x128xf32> -> vector<100x128xf32>
    %c0_4 = arith.constant 0 : index
    %c0_5 = arith.constant 0 : index
    %4 = vector.load %arg3[%c0_4, %c0_5] : memref<1x128xf32, #tpu.memory_space<vmem>>, vector<1x128xf32>
    %5 = vector.broadcast %4 : vector<1x128xf32> to vector<100x128xf32>
    %6 = arith.addf %3, %5 : vector<100x128xf32>
    %cst_6 = arith.constant 0.000000e+00 : f32
    %7 = vector.broadcast %cst_6 : f32 to vector<100x128xf32>
    %8 = arith.maximumf %6, %7 : vector<100x128xf32>
    %c0_7 = arith.constant 0 : index
    %c0_8 = arith.constant 0 : index
    %9 = vector.load %arg9[%c0_7, %c0_8] : memref<100x128xf32, #tpu.memory_space<vmem>>, vector<100x128xf32>
    tpu.vector_store %arg9[%c0_7, %c0_8], %8 {strides = array<i32>} : memref<100x128xf32, #tpu.memory_space<vmem>>, vector<100x128xf32>,
    %cst_9 = arith.constant 0.000000e+00 : f32
    %10 = vector.broadcast %cst_9 : f32 to vector<89x64xf32>
    %c0_10 = arith.constant 0 : index
    %c0_11 = arith.constant 0 : index
    %11 = vector.load %arg9[%c0_10, %c0_11] : memref<100x128xf32, #tpu.memory_space<vmem>>, vector<89x128xf32>
    %c0_12 = arith.constant 0 : index
    %c0_13 = arith.constant 0 : index
    %c0_14 = arith.constant 0 : index
    %12 = vector.load %arg4[%c0_12, %c0_13, %c0_14] : memref<4x128x64xf32, #tpu.memory_space<vmem>>, vector<1x128x64xf32>
    %13 = vector.shape_cast %12 : vector<1x128x64xf32> to vector<128x64xf32>
    %cst_15 = arith.constant dense<0.000000e+00> : vector<89x64xf32>
    %14 = tpu.matmul %11, %13, %cst_15 {dimension_numbers = #tpu.dot_dimension_numbers<[1], [0], [0], [1], [0, 0, 1, 1], [], []>} : vector<89x128xf32>, vector<128x64xf32>, vector<89x64xf32> -> vector<89x64xf32>
    %15 = arith.addf %10, %14 : vector<89x64xf32>
    %c1 = arith.constant 1 : index
    %c0_16 = arith.constant 0 : index
    %16 = vector.load %arg9[%c1, %c0_16] : memref<100x128xf32, #tpu.memory_space<vmem>>, vector<89x128xf32>
    %c1_17 = arith.constant 1 : index
    %c0_18 = arith.constant 0 : index
    %c0_19 = arith.constant 0 : index
    %17 = vector.load %arg4[%c1_17, %c0_18, %c0_19] : memref<4x128x64xf32, #tpu.memory_space<vmem>>, vector<1x128x64xf32>
    %18 = vector.shape_cast %17 : vector<1x128x64xf32> to vector<128x64xf32>
    %cst_20 = arith.constant dense<0.000000e+00> : vector<89x64xf32>
    %19 = tpu.matmul %16, %18, %cst_20 {dimension_numbers = #tpu.dot_dimension_numbers<[1], [0], [0], [1], [0, 0, 1, 1], [], []>} : vector<89x128xf32>, vector<128x64xf32>, vector<89x64xf32> -> vector<89x64xf32>
    %20 = arith.addf %15, %19 : vector<89x64xf32>
    %c10 = arith.constant 10 : index
    %c0_21 = arith.constant 0 : index
    %21 = vector.load %arg9[%c10, %c0_21] : memref<100x128xf32, #tpu.memory_space<vmem>>, vector<89x128xf32>
    %c2 = arith.constant 2 : index
    %c0_22 = arith.constant 0 : index
    %c0_23 = arith.constant 0 : index
    %22 = vector.load %arg4[%c2, %c0_22, %c0_23] : memref<4x128x64xf32, #tpu.memory_space<vmem>>, vector<1x128x64xf32>
    %23 = vector.shape_cast %22 : vector<1x128x64xf32> to vector<128x64xf32>
    %cst_24 = arith.constant dense<0.000000e+00> : vector<89x64xf32>
    %24 = tpu.matmul %21, %23, %cst_24 {dimension_numbers = #tpu.dot_dimension_numbers<[1], [0], [0], [1], [0, 0, 1, 1], [], []>} : vector<89x128xf32>, vector<128x64xf32>, vector<89x64xf32> -> vector<89x64xf32>
    %25 = arith.addf %20, %24 : vector<89x64xf32>
    %c11 = arith.constant 11 : index
    %c0_25 = arith.constant 0 : index
    %26 = vector.load %arg9[%c11, %c0_25] : memref<100x128xf32, #tpu.memory_space<vmem>>, vector<89x128xf32>
    %c3 = arith.constant 3 : index
    %c0_26 = arith.constant 0 : index
    %c0_27 = arith.constant 0 : index
    %27 = vector.load %arg4[%c3, %c0_26, %c0_27] : memref<4x128x64xf32, #tpu.memory_space<vmem>>, vector<1x128x64xf32>
    %28 = vector.shape_cast %27 : vector<1x128x64xf32> to vector<128x64xf32>
    %cst_28 = arith.constant dense<0.000000e+00> : vector<89x64xf32>
    %29 = tpu.matmul %26, %28, %cst_28 {dimension_numbers = #tpu.dot_dimension_numbers<[1], [0], [0], [1], [0, 0, 1, 1], [], []>} : vector<89x128xf32>, vector<128x64xf32>, vector<89x64xf32> -> vector<89x64xf32>
    %30 = arith.addf %25, %29 : vector<89x64xf32>
    %c0_29 = arith.constant 0 : index
    %c0_30 = arith.constant 0 : index
    %31 = vector.load %arg5[%c0_29, %c0_30] : memref<1x64xf32, #tpu.memory_space<vmem>>, vector<1x64xf32>
    %32 = vector.broadcast %31 : vector<1x64xf32> to vector<89x64xf32>
    %33 = arith.addf %30, %32 : vector<89x64xf32>
    %cst_31 = arith.constant 0.000000e+00 : f32
    %34 = vector.broadcast %cst_31 : f32 to vector<89x64xf32>
    %35 = arith.maximumf %33, %34 : vector<89x64xf32>
    %c0_32 = arith.constant 0 : index
    %c0_33 = arith.constant 0 : index
    %36 = vector.load %arg10[%c0_32, %c0_33] : memref<89x64xf32, #tpu.memory_space<vmem>>, vector<89x64xf32>
    tpu.vector_store %arg10[%c0_32, %c0_33], %35 {strides = array<i32>} : memref<89x64xf32, #tpu.memory_space<vmem>>, vector<89x64xf32>,
    %cst_34 = arith.constant 0.000000e+00 : f32
    %37 = vector.broadcast %cst_34 : f32 to vector<67x64xf32>
    %c0_35 = arith.constant 0 : index
    %c0_36 = arith.constant 0 : index
    %38 = vector.load %arg10[%c0_35, %c0_36] : memref<89x64xf32, #tpu.memory_space<vmem>>, vector<67x64xf32>
    %c0_37 = arith.constant 0 : index
    %c0_38 = arith.constant 0 : index
    %c0_39 = arith.constant 0 : index
    %39 = vector.load %arg6[%c0_37, %c0_38, %c0_39] : memref<9x64x64xf32, #tpu.memory_space<vmem>>, vector<1x64x64xf32>
    %40 = vector.shape_cast %39 : vector<1x64x64xf32> to vector<64x64xf32>
    %cst_40 = arith.constant dense<0.000000e+00> : vector<67x64xf32>
    %41 = tpu.matmul %38, %40, %cst_40 {dimension_numbers = #tpu.dot_dimension_numbers<[1], [0], [0], [1], [0, 0, 1, 1], [], []>} : vector<67x64xf32>, vector<64x64xf32>, vector<67x64xf32> -> vector<67x64xf32>
    %42 = arith.addf %37, %41 : vector<67x64xf32>
    %c1_41 = arith.constant 1 : index
    %c0_42 = arith.constant 0 : index
    %43 = vector.load %arg10[%c1_41, %c0_42] : memref<89x64xf32, #tpu.memory_space<vmem>>, vector<67x64xf32>
    %c1_43 = arith.constant 1 : index
    %c0_44 = arith.constant 0 : index
    %c0_45 = arith.constant 0 : index
    %44 = vector.load %arg6[%c1_43, %c0_44, %c0_45] : memref<9x64x64xf32, #tpu.memory_space<vmem>>, vector<1x64x64xf32>
    %45 = vector.shape_cast %44 : vector<1x64x64xf32> to vector<64x64xf32>
    %cst_46 = arith.constant dense<0.000000e+00> : vector<67x64xf32>
    %46 = tpu.matmul %43, %45, %cst_46 {dimension_numbers = #tpu.dot_dimension_numbers<[1], [0], [0], [1], [0, 0, 1, 1], [], []>} : vector<67x64xf32>, vector<64x64xf32>, vector<67x64xf32> -> vector<67x64xf32>
    %47 = arith.addf %42, %46 : vector<67x64xf32>
    %c2_47 = arith.constant 2 : index
    %c0_48 = arith.constant 0 : index
    %48 = vector.load %arg10[%c2_47, %c0_48] : memref<89x64xf32, #tpu.memory_space<vmem>>, vector<67x64xf32>
    %c2_49 = arith.constant 2 : index
    %c0_50 = arith.constant 0 : index
    %c0_51 = arith.constant 0 : index
    %49 = vector.load %arg6[%c2_49, %c0_50, %c0_51] : memref<9x64x64xf32, #tpu.memory_space<vmem>>, vector<1x64x64xf32>
    %50 = vector.shape_cast %49 : vector<1x64x64xf32> to vector<64x64xf32>
    %cst_52 = arith.constant dense<0.000000e+00> : vector<67x64xf32>
    %51 = tpu.matmul %48, %50, %cst_52 {dimension_numbers = #tpu.dot_dimension_numbers<[1], [0], [0], [1], [0, 0, 1, 1], [], []>} : vector<67x64xf32>, vector<64x64xf32>, vector<67x64xf32> -> vector<67x64xf32>
    %52 = arith.addf %47, %51 : vector<67x64xf32>
    %c10_53 = arith.constant 10 : index
    %c0_54 = arith.constant 0 : index
    %53 = vector.load %arg10[%c10_53, %c0_54] : memref<89x64xf32, #tpu.memory_space<vmem>>, vector<67x64xf32>
    %c3_55 = arith.constant 3 : index
    %c0_56 = arith.constant 0 : index
    %c0_57 = arith.constant 0 : index
    %54 = vector.load %arg6[%c3_55, %c0_56, %c0_57] : memref<9x64x64xf32, #tpu.memory_space<vmem>>, vector<1x64x64xf32>
    %55 = vector.shape_cast %54 : vector<1x64x64xf32> to vector<64x64xf32>
    %cst_58 = arith.constant dense<0.000000e+00> : vector<67x64xf32>
    %56 = tpu.matmul %53, %55, %cst_58 {dimension_numbers = #tpu.dot_dimension_numbers<[1], [0], [0], [1], [0, 0, 1, 1], [], []>} : vector<67x64xf32>, vector<64x64xf32>, vector<67x64xf32> -> vector<67x64xf32>
    %57 = arith.addf %52, %56 : vector<67x64xf32>
    %c11_59 = arith.constant 11 : index
    %c0_60 = arith.constant 0 : index
    %58 = vector.load %arg10[%c11_59, %c0_60] : memref<89x64xf32, #tpu.memory_space<vmem>>, vector<67x64xf32>
    %c4 = arith.constant 4 : index
    %c0_61 = arith.constant 0 : index
    %c0_62 = arith.constant 0 : index
    %59 = vector.load %arg6[%c4, %c0_61, %c0_62] : memref<9x64x64xf32, #tpu.memory_space<vmem>>, vector<1x64x64xf32>
    %60 = vector.shape_cast %59 : vector<1x64x64xf32> to vector<64x64xf32>
    %cst_63 = arith.constant dense<0.000000e+00> : vector<67x64xf32>
    %61 = tpu.matmul %58, %60, %cst_63 {dimension_numbers = #tpu.dot_dimension_numbers<[1], [0], [0], [1], [0, 0, 1, 1], [], []>} : vector<67x64xf32>, vector<64x64xf32>, vector<67x64xf32> -> vector<67x64xf32>
    %62 = arith.addf %57, %61 : vector<67x64xf32>
    %c12 = arith.constant 12 : index
    %c0_64 = arith.constant 0 : index
    %63 = vector.load %arg10[%c12, %c0_64] : memref<89x64xf32, #tpu.memory_space<vmem>>, vector<67x64xf32>
    %c5 = arith.constant 5 : index
    %c0_65 = arith.constant 0 : index
    %c0_66 = arith.constant 0 : index
    %64 = vector.load %arg6[%c5, %c0_65, %c0_66] : memref<9x64x64xf32, #tpu.memory_space<vmem>>, vector<1x64x64xf32>
    %65 = vector.shape_cast %64 : vector<1x64x64xf32> to vector<64x64xf32>
    %cst_67 = arith.constant dense<0.000000e+00> : vector<67x64xf32>
    %66 = tpu.matmul %63, %65, %cst_67 {dimension_numbers = #tpu.dot_dimension_numbers<[1], [0], [0], [1], [0, 0, 1, 1], [], []>} : vector<67x64xf32>, vector<64x64xf32>, vector<67x64xf32> -> vector<67x64xf32>
    %67 = arith.addf %62, %66 : vector<67x64xf32>
    %c20 = arith.constant 20 : index
    %c0_68 = arith.constant 0 : index
    %68 = vector.load %arg10[%c20, %c0_68] : memref<89x64xf32, #tpu.memory_space<vmem>>, vector<67x64xf32>
    %c6 = arith.constant 6 : index
    %c0_69 = arith.constant 0 : index
    %c0_70 = arith.constant 0 : index
    %69 = vector.load %arg6[%c6, %c0_69, %c0_70] : memref<9x64x64xf32, #tpu.memory_space<vmem>>, vector<1x64x64xf32>
    %70 = vector.shape_cast %69 : vector<1x64x64xf32> to vector<64x64xf32>
    %cst_71 = arith.constant dense<0.000000e+00> : vector<67x64xf32>
    %71 = tpu.matmul %68, %70, %cst_71 {dimension_numbers = #tpu.dot_dimension_numbers<[1], [0], [0], [1], [0, 0, 1, 1], [], []>} : vector<67x64xf32>, vector<64x64xf32>, vector<67x64xf32> -> vector<67x64xf32>
    %72 = arith.addf %67, %71 : vector<67x64xf32>
    %c21 = arith.constant 21 : index
    %c0_72 = arith.constant 0 : index
    %73 = vector.load %arg10[%c21, %c0_72] : memref<89x64xf32, #tpu.memory_space<vmem>>, vector<67x64xf32>
    %c7 = arith.constant 7 : index
    %c0_73 = arith.constant 0 : index
    %c0_74 = arith.constant 0 : index
    %74 = vector.load %arg6[%c7, %c0_73, %c0_74] : memref<9x64x64xf32, #tpu.memory_space<vmem>>, vector<1x64x64xf32>
    %75 = vector.shape_cast %74 : vector<1x64x64xf32> to vector<64x64xf32>
    %cst_75 = arith.constant dense<0.000000e+00> : vector<67x64xf32>
    %76 = tpu.matmul %73, %75, %cst_75 {dimension_numbers = #tpu.dot_dimension_numbers<[1], [0], [0], [1], [0, 0, 1, 1], [], []>} : vector<67x64xf32>, vector<64x64xf32>, vector<67x64xf32> -> vector<67x64xf32>
    %77 = arith.addf %72, %76 : vector<67x64xf32>
    %c22 = arith.constant 22 : index
    %c0_76 = arith.constant 0 : index
    %78 = vector.load %arg10[%c22, %c0_76] : memref<89x64xf32, #tpu.memory_space<vmem>>, vector<67x64xf32>
    %c8 = arith.constant 8 : index
    %c0_77 = arith.constant 0 : index
    %c0_78 = arith.constant 0 : index
    %79 = vector.load %arg6[%c8, %c0_77, %c0_78] : memref<9x64x64xf32, #tpu.memory_space<vmem>>, vector<1x64x64xf32>
    %80 = vector.shape_cast %79 : vector<1x64x64xf32> to vector<64x64xf32>
    %cst_79 = arith.constant dense<0.000000e+00> : vector<67x64xf32>
    %81 = tpu.matmul %78, %80, %cst_79 {dimension_numbers = #tpu.dot_dimension_numbers<[1], [0], [0], [1], [0, 0, 1, 1], [], []>} : vector<67x64xf32>, vector<64x64xf32>, vector<67x64xf32> -> vector<67x64xf32>
    %82 = arith.addf %77, %81 : vector<67x64xf32>
    %c0_80 = arith.constant 0 : index
    %c0_81 = arith.constant 0 : index
    %83 = vector.load %arg7[%c0_80, %c0_81] : memref<1x64xf32, #tpu.memory_space<vmem>>, vector<1x64xf32>
    %84 = vector.broadcast %83 : vector<1x64xf32> to vector<67x64xf32>
    %85 = arith.addf %82, %84 : vector<67x64xf32>
    %cst_82 = arith.constant 0.000000e+00 : f32
    %86 = vector.broadcast %cst_82 : f32 to vector<67x64xf32>
    %87 = arith.maximumf %85, %86 : vector<67x64xf32>
    %88 = vector.extract_strided_slice %87 {offsets = [0, 0], sizes = [7, 64], strides = [1, 1]} : vector<67x64xf32> to vector<7x64xf32>
    %c0_83 = arith.constant 0 : index
    %c0_84 = arith.constant 0 : index
    %c0_85 = arith.constant 0 : index
    %89 = vector.load %arg8[%c0_83, %c0_84, %c0_85] : memref<1x49x64xf32, #tpu.memory_space<vmem>>, vector<1x7x64xf32>
    %90 = vector.shape_cast %89 : vector<1x7x64xf32> to vector<7x64xf32>
    %91 = vector.shape_cast %88 : vector<7x64xf32> to vector<1x7x64xf32>
    tpu.vector_store %arg8[%c0_83, %c0_84, %c0_85], %91 {strides = array<i32>} : memref<1x49x64xf32, #tpu.memory_space<vmem>>, vector<1x7x64xf32>,
    %92 = vector.extract_strided_slice %87 {offsets = [10, 0], sizes = [7, 64], strides = [1, 1]} : vector<67x64xf32> to vector<7x64xf32>
    %c0_86 = arith.constant 0 : index
    %c7_87 = arith.constant 7 : index
    %c0_88 = arith.constant 0 : index
    %93 = vector.load %arg8[%c0_86, %c7_87, %c0_88] : memref<1x49x64xf32, #tpu.memory_space<vmem>>, vector<1x7x64xf32>
    %94 = vector.shape_cast %93 : vector<1x7x64xf32> to vector<7x64xf32>
    %95 = vector.shape_cast %92 : vector<7x64xf32> to vector<1x7x64xf32>
    tpu.vector_store %arg8[%c0_86, %c7_87, %c0_88], %95 {strides = array<i32>} : memref<1x49x64xf32, #tpu.memory_space<vmem>>, vector<1x7x64xf32>,
    %96 = vector.extract_strided_slice %87 {offsets = [20, 0], sizes = [7, 64], strides = [1, 1]} : vector<67x64xf32> to vector<7x64xf32>
    %c0_89 = arith.constant 0 : index
    %c14 = arith.constant 14 : index
    %c0_90 = arith.constant 0 : index
    %97 = vector.load %arg8[%c0_89, %c14, %c0_90] : memref<1x49x64xf32, #tpu.memory_space<vmem>>, vector<1x7x64xf32>
    %98 = vector.shape_cast %97 : vector<1x7x64xf32> to vector<7x64xf32>
    %99 = vector.shape_cast %96 : vector<7x64xf32> to vector<1x7x64xf32>
    tpu.vector_store %arg8[%c0_89, %c14, %c0_90], %99 {strides = array<i32>} : memref<1x49x64xf32, #tpu.memory_space<vmem>>, vector<1x7x64xf32>,
    %100 = vector.extract_strided_slice %87 {offsets = [30, 0], sizes = [7, 64], strides = [1, 1]} : vector<67x64xf32> to vector<7x64xf32>
    %c0_91 = arith.constant 0 : index
    %c21_92 = arith.constant 21 : index
    %c0_93 = arith.constant 0 : index
    %101 = vector.load %arg8[%c0_91, %c21_92, %c0_93] : memref<1x49x64xf32, #tpu.memory_space<vmem>>, vector<1x7x64xf32>
    %102 = vector.shape_cast %101 : vector<1x7x64xf32> to vector<7x64xf32>
    %103 = vector.shape_cast %100 : vector<7x64xf32> to vector<1x7x64xf32>
    tpu.vector_store %arg8[%c0_91, %c21_92, %c0_93], %103 {strides = array<i32>} : memref<1x49x64xf32, #tpu.memory_space<vmem>>, vector<1x7x64xf32>,
    %104 = vector.extract_strided_slice %87 {offsets = [40, 0], sizes = [7, 64], strides = [1, 1]} : vector<67x64xf32> to vector<7x64xf32>
    %c0_94 = arith.constant 0 : index
    %c28 = arith.constant 28 : index
    %c0_95 = arith.constant 0 : index
    %105 = vector.load %arg8[%c0_94, %c28, %c0_95] : memref<1x49x64xf32, #tpu.memory_space<vmem>>, vector<1x7x64xf32>
    %106 = vector.shape_cast %105 : vector<1x7x64xf32> to vector<7x64xf32>
    %107 = vector.shape_cast %104 : vector<7x64xf32> to vector<1x7x64xf32>
    tpu.vector_store %arg8[%c0_94, %c28, %c0_95], %107 {strides = array<i32>} : memref<1x49x64xf32, #tpu.memory_space<vmem>>, vector<1x7x64xf32>,
    %108 = vector.extract_strided_slice %87 {offsets = [50, 0], sizes = [7, 64], strides = [1, 1]} : vector<67x64xf32> to vector<7x64xf32>
    %c0_96 = arith.constant 0 : index
    %c35 = arith.constant 35 : index
    %c0_97 = arith.constant 0 : index
    %109 = vector.load %arg8[%c0_96, %c35, %c0_97] : memref<1x49x64xf32, #tpu.memory_space<vmem>>, vector<1x7x64xf32>
    %110 = vector.shape_cast %109 : vector<1x7x64xf32> to vector<7x64xf32>
    %111 = vector.shape_cast %108 : vector<7x64xf32> to vector<1x7x64xf32>
    tpu.vector_store %arg8[%c0_96, %c35, %c0_97], %111 {strides = array<i32>} : memref<1x49x64xf32, #tpu.memory_space<vmem>>, vector<1x7x64xf32>,
    %112 = vector.extract_strided_slice %87 {offsets = [60, 0], sizes = [7, 64], strides = [1, 1]} : vector<67x64xf32> to vector<7x64xf32>
    %c0_98 = arith.constant 0 : index
    %c42 = arith.constant 42 : index
    %c0_99 = arith.constant 0 : index
    %113 = vector.load %arg8[%c0_98, %c42, %c0_99] : memref<1x49x64xf32, #tpu.memory_space<vmem>>, vector<1x7x64xf32>
    %114 = vector.shape_cast %113 : vector<1x7x64xf32> to vector<7x64xf32>
    %115 = vector.shape_cast %112 : vector<7x64xf32> to vector<1x7x64xf32>
    tpu.vector_store %arg8[%c0_98, %c42, %c0_99], %115 {strides = array<i32>} : memref<1x49x64xf32, #tpu.memory_space<vmem>>, vector<1x7x64xf32>,
    return
  }
  func.func @transform_0(%arg0: i32) -> (i32, i32, i32) {
    %c0_i32 = arith.constant 0 : i32
    %c0_i32_0 = arith.constant 0 : i32
    %c0_i32_1 = arith.constant 0 : i32
    return %arg0, %c0_i32, %c0_i32_0 : i32, i32, i32
  }
  func.func @transform_1(%arg0: i32) -> (i32, i32) {
    %c0_i32 = arith.constant 0 : i32
    %c0_i32_0 = arith.constant 0 : i32
    %c0_i32_1 = arith.constant 0 : i32
    return %c0_i32, %c0_i32_0 : i32, i32
  }
  func.func @transform_2(%arg0: i32) -> (i32, i32) {
    %c0_i32 = arith.constant 0 : i32
    %c0_i32_0 = arith.constant 0 : i32
    %c0_i32_1 = arith.constant 0 : i32
    return %c0_i32, %c0_i32_0 : i32, i32
  }
  func.func @transform_3(%arg0: i32) -> (i32, i32, i32) {
    %c0_i32 = arith.constant 0 : i32
    %c0_i32_0 = arith.constant 0 : i32
    %c0_i32_1 = arith.constant 0 : i32
    %c0_i32_2 = arith.constant 0 : i32
    return %c0_i32, %c0_i32_0, %c0_i32_1 : i32, i32, i32
  }
  func.func @transform_4(%arg0: i32) -> (i32, i32) {
    %c0_i32 = arith.constant 0 : i32
    %c0_i32_0 = arith.constant 0 : i32
    %c0_i32_1 = arith.constant 0 : i32
    return %c0_i32, %c0_i32_0 : i32, i32
  }
  func.func @transform_5(%arg0: i32) -> (i32, i32, i32) {
    %c0_i32 = arith.constant 0 : i32
    %c0_i32_0 = arith.constant 0 : i32
    %c0_i32_1 = arith.constant 0 : i32
    %c0_i32_2 = arith.constant 0 : i32
    return %c0_i32, %c0_i32_0, %c0_i32_1 : i32, i32, i32
  }
  func.func @transform_6(%arg0: i32) -> (i32, i32) {
    %c0_i32 = arith.constant 0 : i32
    %c0_i32_0 = arith.constant 0 : i32
    %c0_i32_1 = arith.constant 0 : i32
    return %c0_i32, %c0_i32_0 : i32, i32
  }
  func.func @transform_7(%arg0: i32) -> (i32, i32, i32) {
    %c0_i32 = arith.constant 0 : i32
    %c0_i32_0 = arith.constant 0 : i32
    %c0_i32_1 = arith.constant 0 : i32
    return %arg0, %c0_i32, %c0_i32_0 : i32, i32, i32
  }
}

</mosaic_0001>

<bundles_post_ra>
// kernel: cnn_encoder_forward.1
= control target key start
LH: loop header
LB: loop body
LE: loop exit
PB: predicated region body
PF: predicated region fallthrough
CT: control target
= control target key end

     0   :  { %s5116_s24 = smov 0   ;;  %s6665_s0 = inlined_call_operand.vmem [shape: f32[2,100,1024], index: 0, kind: input, shape index: {}]   ;;  %s6666_s1 = inlined_call_operand.vmem [shape: f32[1024,128], index: 1, kind: input, shape index: {}]   ;;  %s6667_s2 = inlined_call_operand.vmem [shape: f32[1,128], index: 2, kind: input, shape index: {}]   ;;  %s6668_s3 = inlined_call_operand.vmem [shape: f32[4,128,64], index: 3, kind: input, shape index: {}]   ;;  %s6669_s4 = inlined_call_operand.vmem [shape: f32[1,64], index: 4, kind: input, shape index: {}]   ;;  %s6670_s5 = inlined_call_operand.vmem [shape: f32[9,64,64], index: 5, kind: input, shape index: {}]   ;;  %s6671_s6 = inlined_call_operand.vmem [shape: f32[1,64], index: 6, kind: input, shape index: {}]   ;;  %s6672_s7 = inlined_call_operand.vmem [shape: f32[2,49,64], index: 7, kind: output, shape index: {}]  }
   0x1 LB: > { %s3303_s25 = sadd.s32 4294967295, %s5071_s24   ;;  %p3307_p0 = scmp.ge.s32.totalorder %s5071_s24, 1  ;;  %s5071_s24 = sphi %s5116_s24, %s17_s24  }
   0x2   : > { %p237_p1 = scmp.lt.s32.totalorder %s5071_s24, 3 }
   0x4   : > { %p238_p2 = pnand %p3307_p0, %p237_p1 }
   0x5   : > { %v399_v0 = vld [vmem:[%s6666_s1 + $0x80] sm:$0xff] (!%p238_p2)  ;;  %v400_v1 = vld [vmem:[%s6666_s1 + $0x88] sm:$0xff] (!%p238_p2)  ;;  %v401_v11 = vld [vmem:[%s6666_s1 + $0x90] sm:$0xff] (!%p238_p2)  ;;  %p5180_p3 = scmp.lt.s32.totalorder (!%p238_p2), %s3303_s25, 1  ;;  %vm5074_vm0 = vmmov (!%p238_p2), 0   ;;  %vm1734_vm1 = vcmask (!%p238_p2), 523264  }
   0x6   : > { %241 = sbr.rel (%p238_p2) target bundleno = 1094 (0x446), region = 48  ;;  %v383_v2 = vld [vmem:[%s6666_s1] sm:$0xff] (!%p238_p2)  ;;  %v4644_v3 = vpack.c.bf16 (!%p238_p2), %v400_v1, %v399_v0  ;;  %v384_v4 = vld [vmem:[%s6666_s1 + $0x8] sm:$0xff] (!%p238_p2)  ;;  %v402_v13 = vld [vmem:[%s6666_s1 + $0x98] sm:$0xff] (!%p238_p2)  ;;  %vm1746_vm2 = vcmask (!%p238_p2), 516096   ;;  %vm3230_vm3 = vcmask (!%p238_p2), 522240  }
   0x7   : > { %v431_v5 = vld [vmem:[%s6666_s1 + $0x180] sm:$0xff] (!%p238_p2)  ;;  %v432_v6 = vld [vmem:[%s6666_s1 + $0x188] sm:$0xff] (!%p238_p2)  ;;  %v4646_v7 = vpack.c.bf16 (!%p238_p2), %v384_v4, %v383_v2  ;;  %v385_v14 = vld [vmem:[%s6666_s1 + $0x10] sm:$0xff] (!%p238_p2)  ;;  %v4648_v16 = vpack.c.bf16 (!%p238_p2), %v402_v13, %v401_v11  ;;  %vm3232_vm4 = vcmask (!%p238_p2), 523266   ;;  %vm3235_vm5 = vcmask (!%p238_p2), 523268  }
   0x8   : > { %v4676_v8 = vpack.c.bf16 (!%p238_p2), %v432_v6, %v431_v5  ;;  %v415_v9 = vld [vmem:[%s6666_s1 + $0x100] sm:$0xff] (!%p238_p2)  ;;  %v416_v10 = vld [vmem:[%s6666_s1 + $0x108] sm:$0xff] (!%p238_p2)  ;;  %4645 = vmatprep.subr.bf16.mxu0 (!%p238_p2), %v4644_v3  ;;  %v386_v15 = vld [vmem:[%s6666_s1 + $0x18] sm:$0xff] (!%p238_p2)  ;;  %vm3237_vm6 = vcmask (!%p238_p2), 518144   ;;  %vm3239_vm7 = vcmask (!%p238_p2), 523270   ;;  %vm3241_vm8 = vcmask (!%p238_p2), 520192  }
   0x9   : > { %v4678_v12 = vpack.c.bf16 (!%p238_p2), %v416_v10, %v415_v9  ;;  %4647 = vmatpush3.bf16.msra.mxu0 (!%p238_p2), %v4646_v7  ;;  %v4650_v17 = vpack.c.bf16 (!%p238_p2), %v386_v15, %v385_v14  ;;  %v433_v18 = vld [vmem:[%s6666_s1 + $0x190] sm:$0xff] (!%p238_p2)  ;;  %v434_v19 = vld [vmem:[%s6666_s1 + $0x198] sm:$0xff] (!%p238_p2)  ;;  %v403_v23 = vld [vmem:[%s6666_s1 + $0xa0] sm:$0xff] (!%p238_p2) }
   0xa   : > { %4677 = vmatprep.subr.bf16.mxu1 (!%p238_p2), %v4676_v8  ;;  %v417_v20 = vld [vmem:[%s6666_s1 + $0x110] sm:$0xff] (!%p238_p2)  ;;  %v4680_v21 = vpack.c.bf16 (!%p238_p2), %v434_v19, %v433_v18  ;;  %v418_v22 = vld [vmem:[%s6666_s1 + $0x118] sm:$0xff] (!%p238_p2)  ;;  %v404_v24 = vld [vmem:[%s6666_s1 + $0xa8] sm:$0xff] (!%p238_p2)  ;;  %4649 = vmatprep.subr.bf16.mxu0 (!%p238_p2), %v4648_v16 }
   0xb   : > { %4679 = vmatpush3.bf16.msra.mxu1 (!%p238_p2), %v4678_v12  ;;  %v4682_v25 = vpack.c.bf16 (!%p238_p2), %v418_v22, %v417_v20  ;;  %v4652_v26 = vpack.c.bf16 (!%p238_p2), %v404_v24, %v403_v23  ;;  %v387_v27 = vld [vmem:[%s6666_s1 + $0x20] sm:$0xff] (!%p238_p2)  ;;  %v388_v28 = vld [vmem:[%s6666_s1 + $0x28] sm:$0xff] (!%p238_p2)  ;;  %v405_v35 = vld [vmem:[%s6666_s1 + $0xb0] sm:$0xff] (!%p238_p2) }
   0xc   : > { %v435_v29 = vld [vmem:[%s6666_s1 + $0x1a0] sm:$0xff] (!%p238_p2)  ;;  %4681 = vmatprep.subr.bf16.mxu1 (!%p238_p2), %v4680_v21  ;;  %v436_v30 = vld [vmem:[%s6666_s1 + $0x1a8] sm:$0xff] (!%p238_p2)  ;;  %v4654_v33 = vpack.c.bf16 (!%p238_p2), %v388_v28, %v387_v27  ;;  %v406_v36 = vld [vmem:[%s6666_s1 + $0xb8] sm:$0xff] (!%p238_p2) }
   0xd   : > { %v419_v31 = vld [vmem:[%s6666_s1 + $0x120] sm:$0xff]  ;;  %v420_v32 = vld [vmem:[%s6666_s1 + $0x128] sm:$0xff]  ;;  %4651 = vmatpush3.bf16.msra.mxu0 %v4650_v17  ;;  %v4684_v34 = vpack.c.bf16 %v436_v30, %v435_v29  ;;  %v389_v37 = vld [vmem:[%s6666_s1 + $0x30] sm:$0xff]  ;;  %v4656_v39 = vpack.c.bf16 %v406_v36, %v405_v35  ;;  %s6675_s25 = smov (!%p5180_p3, %s3303_s25), 1 }
   0xe   : > { %4653 = vmatprep.subr.bf16.mxu0 %v4652_v26  ;;  %v4686_v38 = vpack.c.bf16 %v420_v32, %v419_v31  ;;  %v390_v40 = vld [vmem:[%s6666_s1 + $0x38] sm:$0xff]  ;;  %v437_v41 = vld [vmem:[%s6666_s1 + $0x1b0] sm:$0xff]  ;;  %v407_v46 = vld [vmem:[%s6666_s1 + $0xc0] sm:$0xff]  ;;  %s5052_s20 = smul.u32 832, %s6675_s25 }
   0xf   : > { %4683 = vmatpush3.bf16.msra.mxu1 %v4682_v25  ;;  %v438_v42 = vld [vmem:[%s6666_s1 + $0x1b8] sm:$0xff]  ;;  %v421_v44 = vld [vmem:[%s6666_s1 + $0x130] sm:$0xff]  ;;  %v408_v47 = vld [vmem:[%s6666_s1 + $0xc8] sm:$0xff]  ;;  %v4658_v48 = vpack.c.bf16 %v390_v40, %v389_v37  ;;  %s5053_s27 = smul.u32 56, %s6675_s25 }
  0x10   : > { %4685 = vmatprep.subr.bf16.mxu1 %v4684_v34  ;;  %v4688_v43 = vpack.c.bf16 %v438_v42, %v437_v41  ;;  %v422_v45 = vld [vmem:[%s6666_s1 + $0x138] sm:$0xff]  ;;  %v439_v49 = vld [vmem:[%s6666_s1 + $0x1c0] sm:$0xff]  ;;  %v440_v50 = vld [vmem:[%s6666_s1 + $0x1c8] sm:$0xff]  ;;  %v4660_v52 = vpack.c.bf16 %v408_v47, %v407_v46  ;;  %s5281_s17 = scalar_lea.vmem %s6665_s0, %s5052_s20 }
  0x11   : > { %4655 = vmatpush3.bf16.msra.mxu0 %v4654_v33  ;;  %v4690_v51 = vpack.c.bf16 %v422_v45, %v421_v44  ;;  %v391_v53 = vld [vmem:[%s6666_s1 + $0x40] sm:$0xff]  ;;  %v392_v54 = vld [vmem:[%s6666_s1 + $0x48] sm:$0xff]  ;;  %v4692_v56 = vpack.c.bf16 %v440_v50, %v439_v49  ;;  %v409_v58 = vld [vmem:[%s6666_s1 + $0xd0] sm:$0xff] }
  0x12   : > { %4657 = vmatprep.subr.bf16.mxu0 %v4656_v39  ;;  %v423_v55 = vld [vmem:[%s6666_s1 + $0x140] sm:$0xff]  ;;  %v424_v57 = vld [vmem:[%s6666_s1 + $0x148] sm:$0xff]  ;;  %v410_v59 = vld [vmem:[%s6666_s1 + $0xd8] sm:$0xff]  ;;  %v4662_v62 = vpack.c.bf16 %v392_v54, %v391_v53 }
  0x13   : > { %4687 = vmatpush3.bf16.msra.mxu1 %v4686_v38  ;;  %v441_v60 = vld [vmem:[%s6666_s1 + $0x1d0] sm:$0xff]  ;;  %v442_v61 = vld [vmem:[%s6666_s1 + $0x1d8] sm:$0xff]  ;;  %v4694_v63 = vpack.c.bf16 %v424_v57, %v423_v55  ;;  %v4664_v0 = vpack.c.bf16 %v410_v59, %v409_v58  ;;  %v411_v6 = vld [vmem:[%s6666_s1 + $0xe0] sm:$0xff] }
  0x14   : > { %4689 = vmatprep.subr.bf16.mxu1 %v4688_v43  ;;  %v393_v1 = vld [vmem:[%s6666_s1 + $0x50] sm:$0xff]  ;;  %v394_v2 = vld [vmem:[%s6666_s1 + $0x58] sm:$0xff]  ;;  %v4696_v4 = vpack.c.bf16 %v442_v61, %v441_v60  ;;  %v412_v7 = vld [vmem:[%s6666_s1 + $0xe8] sm:$0xff] }
  0x15   : > { %4659 = vmatpush3.bf16.msra.mxu0 %v4658_v48  ;;  %v425_v3 = vld [vmem:[%s6666_s1 + $0x150] sm:$0xff]  ;;  %v426_v5 = vld [vmem:[%s6666_s1 + $0x158] sm:$0xff]  ;;  %v443_v8 = vld [vmem:[%s6666_s1 + $0x1e0] sm:$0xff]  ;;  %v4666_v10 = vpack.c.bf16 %v394_v2, %v393_v1  ;;  %v4668_v14 = vpack.c.bf16 %v412_v7, %v411_v6 }
  0x16   : > { %4661 = vmatprep.subr.bf16.mxu0 %v4660_v52  ;;  %v444_v9 = vld [vmem:[%s6666_s1 + $0x1e8] sm:$0xff]  ;;  %v395_v11 = vld [vmem:[%s6666_s1 + $0x60] sm:$0xff]  ;;  %v4698_v13 = vpack.c.bf16 %v426_v5, %v425_v3  ;;  %v413_v19 = vld [vmem:[%s6666_s1 + $0xf0] sm:$0xff] }
  0x17   : > { %4691 = vmatpush3.bf16.msra.mxu1 %v4690_v51  ;;  %v280_v12 = vld [vmem:[%s5281_s17 + $0x8] sm:$0xff]  ;;  %v427_v16 = vld [vmem:[%s6666_s1 + $0x160] sm:$0xff]  ;;  %v4700_v18 = vpack.c.bf16 %v444_v9, %v443_v8  ;;  %v414_v20 = vld [vmem:[%s6666_s1 + $0xf8] sm:$0xff] }
  0x18   : > { %4693 = vmatprep.subr.bf16.mxu1 %v4692_v56  ;;  %v396_v15 = vld [vmem:[%s6666_s1 + $0x68] sm:$0xff]  ;;  %582 = vmatprep.mubr.f32.mxu0 %v280_v12  ;;  %v282_v21 = vld [vmem:[%s5281_s17 + $0x18] sm:$0xff]  ;;  %v445_v22 = vld [vmem:[%s6666_s1 + $0x1f0] sm:$0xff]  ;;  %v4672_v26 = vpack.c.bf16 %v414_v20, %v413_v19 }
  0x19   : > { %4663 = vmatpush3.bf16.msra.mxu0 %v4662_v62  ;;  %v428_v17 = vld [vmem:[%s6666_s1 + $0x168] sm:$0xff]  ;;  %v446_v23 = vld [vmem:[%s6666_s1 + $0x1f8] sm:$0xff]  ;;  %712 = vmatprep.mubr.f32.mxu1 %v282_v21  ;;  %v4670_v24 = vpack.c.bf16 %v396_v15, %v395_v11  ;;  %v397_v27 = vld [vmem:[%s6666_s1 + $0x70] sm:$0xff] }
  0x1a   : > { %4665 = vmatprep.subr.bf16.mxu0 %v4664_v0  ;;  %v4702_v25 = vpack.c.bf16 %v428_v17, %v427_v16  ;;  %v398_v28 = vld [vmem:[%s6666_s1 + $0x78] sm:$0xff]  ;;  %v429_v29 = vld [vmem:[%s6666_s1 + $0x170] sm:$0xff]  ;;  %v4704_v30 = vpack.c.bf16 %v446_v23, %v445_v22  ;;  %v463_v32 = vld [vmem:[%s6666_s1 + $0x280] sm:$0xff] }
  0x1b   : > { %4695 = vmatpush3.bf16.msra.mxu1 %v4694_v63  ;;  %v430_v31 = vld [vmem:[%s6666_s1 + $0x178] sm:$0xff]  ;;  %v464_v33 = vld [vmem:[%s6666_s1 + $0x288] sm:$0xff]  ;;  %v495_v34 = vld [vmem:[%s6666_s1 + $0x380] sm:$0xff]  ;;  %v4674_v36 = vpack.c.bf16 %v398_v28, %v397_v27 }
  0x1c   : > { %4697 = vmatprep.subr.bf16.mxu1 %v4696_v4  ;;  %v496_v35 = vld [vmem:[%s6666_s1 + $0x388] sm:$0xff]  ;;  %v4706_v37 = vpack.c.bf16 %v430_v31, %v429_v29  ;;  %v4708_v38 = vpack.c.bf16 %v464_v33, %v463_v32  ;;  %v447_v39 = vld [vmem:[%s6666_s1 + $0x200] sm:$0xff]  ;;  %v465_v44 = vld [vmem:[%s6666_s1 + $0x290] sm:$0xff] }
  0x1d   : > { %4667 = vmatpush3.bf16.msra.mxu0 %v4666_v10  ;;  %v448_v40 = vld [vmem:[%s6666_s1 + $0x208] sm:$0xff]  ;;  %v4740_v41 = vpack.c.bf16 %v496_v35, %v495_v34  ;;  %v479_v42 = vld [vmem:[%s6666_s1 + $0x300] sm:$0xff]  ;;  %v466_v45 = vld [vmem:[%s6666_s1 + $0x298] sm:$0xff] }
  0x1e   : > { %4669 = vmatprep.subr.bf16.mxu0 %v4668_v14  ;;  %v480_v43 = vld [vmem:[%s6666_s1 + $0x308] sm:$0xff]  ;;  %v279_v46 = vld [vmem:[%s5281_s17] sm:$0xff]  ;;  %v4710_v47 = vpack.c.bf16 %v448_v40, %v447_v39  ;;  %v497_v48 = vld [vmem:[%s6666_s1 + $0x390] sm:$0xff]  ;;  %v4712_v54 = vpack.c.bf16 %v466_v45, %v465_v44 }
  0x1f   : > { %4699 = vmatpush3.bf16.msra.mxu1 %v4698_v13  ;;  %v498_v49 = vld [vmem:[%s6666_s1 + $0x398] sm:$0xff]  ;;  %v281_v50 = vld [vmem:[%s5281_s17 + $0x10] sm:$0xff]  ;;  %v288_v51 = vld [vmem:[%s5281_s17 + $0x48] sm:$0xff]  ;;  %v4742_v52 = vpack.c.bf16 %v480_v43, %v479_v42 }
  0x20   : > { %4701 = vmatprep.subr.bf16.mxu1 %v4700_v18  ;;  %v290_v53 = vld [vmem:[%s5281_s17 + $0x58] sm:$0xff]  ;;  %v449_v55 = vld [vmem:[%s6666_s1 + $0x210] sm:$0xff]  ;;  %v4744_v58 = vpack.c.bf16 %v498_v49, %v497_v48  ;;  %v467_v60 = vld [vmem:[%s6666_s1 + $0x2a0] sm:$0xff] }
  0x21   : > { %4671 = vmatpush3.bf16.msra.mxu0 %v4670_v24  ;;  %v450_v56 = vld [vmem:[%s6666_s1 + $0x218] sm:$0xff]  ;;  %v481_v57 = vld [vmem:[%s6666_s1 + $0x310] sm:$0xff]  ;;  %v468_v61 = vld [vmem:[%s6666_s1 + $0x2a8] sm:$0xff] }
  0x22   : > { %4673 = vmatprep.subr.bf16.mxu0 %v4672_v26  ;;  %v482_v59 = vld [vmem:[%s6666_s1 + $0x318] sm:$0xff]  ;;  %v287_v62 = vld [vmem:[%s5281_s17 + $0x40] sm:$0xff]  ;;  %v500_v0 = vld [vmem:[%s6666_s1 + $0x3a8] sm:$0xff]  ;;  %v4714_v3 = vpack.c.bf16 %v450_v56, %v449_v55  ;;  %v4716_v6 = vpack.c.bf16 %v468_v61, %v467_v60 }
  0x23   : > { %4703 = vmatpush3.bf16.msra.mxu1 %v4702_v25  ;;  %v499_v63 = vld [vmem:[%s6666_s1 + $0x3a0] sm:$0xff]  ;;  %v289_v1 = vld [vmem:[%s5281_s17 + $0x50] sm:$0xff]  ;;  %v296_v2 = vld [vmem:[%s5281_s17 + $0x88] sm:$0xff]  ;;  %v4746_v5 = vpack.c.bf16 %v482_v59, %v481_v57 }
  0x24   : > { %4705 = vmatprep.subr.bf16.mxu1 %v4704_v30  ;;  %v298_v4 = vld [vmem:[%s5281_s17 + $0x98] sm:$0xff]  ;;  %v451_v7 = vld [vmem:[%s6666_s1 + $0x220] sm:$0xff]  ;;  %v452_v8 = vld [vmem:[%s6666_s1 + $0x228] sm:$0xff]  ;;  %v4748_v10 = vpack.c.bf16 %v500_v0, %v499_v63 }
  0x25   : > { %4675 = vmatpush3.bf16.msra.mxu0 %v4674_v36  ;;  %v483_v9 = vld [vmem:[%s6666_s1 + $0x320] sm:$0xff]  ;;  %v484_v11 = vld [vmem:[%s6666_s1 + $0x328] sm:$0xff]  ;;  %v469_v12 = vld [vmem:[%s6666_s1 + $0x2b0] sm:$0xff]  ;;  %v4718_v20 = vpack.c.bf16 %v452_v8, %v451_v7 }
  0x26   : > { %4709 = vmatprep.subr.bf16.mxu0 %v4708_v38  ;;  %v470_v13 = vld [vmem:[%s6666_s1 + $0x2b8] sm:$0xff]  ;;  %v295_v14 = vld [vmem:[%s5281_s17 + $0x80] sm:$0xff]  ;;  %v501_v15 = vld [vmem:[%s6666_s1 + $0x3b0] sm:$0xff]  ;;  %v4750_v21 = vpack.c.bf16 %v484_v11, %v483_v9 }
  0x27   : > { %4707 = vmatpush3.bf16.msra.mxu1 %v4706_v37  ;;  %v502_v16 = vld [vmem:[%s6666_s1 + $0x3b8] sm:$0xff]  ;;  %v297_v17 = vld [vmem:[%s5281_s17 + $0x90] sm:$0xff]  ;;  %v304_v18 = vld [vmem:[%s5281_s17 + $0xc8] sm:$0xff]  ;;  %v4720_v22 = vpack.c.bf16 %v470_v13, %v469_v12 }
  0x28   : > { %4741 = vmatprep.subr.bf16.mxu1 %v4740_v41  ;;  %583 = vmatmul.mubr.f32.vlgmr.msra.gmra.mrb[0].mxu0 %v279_v46  ;;  %v306_v19 = vld [vmem:[%s5281_s17 + $0xd8] sm:$0xff]  ;;  %v453_v23 = vld [vmem:[%s6666_s1 + $0x230] sm:$0xff]  ;;  %v4752_v26 = vpack.c.bf16 %v502_v16, %v501_v15  ;;  %v471_v28 = vld [vmem:[%s6666_s1 + $0x2c0] sm:$0xff] }
  0x29   : > { %4711 = vmatpush3.bf16.msra.mxu0 %v4710_v47  ;;  %587 = vmatprep.mubr.f32.mxu0 %v288_v51  ;;  %v454_v24 = vld [vmem:[%s6666_s1 + $0x238] sm:$0xff]  ;;  %v485_v25 = vld [vmem:[%s6666_s1 + $0x330] sm:$0xff]  ;;  %v472_v29 = vld [vmem:[%s6666_s1 + $0x2c8] sm:$0xff] }
  0x2a   : > { %713 = vmatmul.mubr.f32.vlgmr.msra.gmra.mrb[0].mxu1 %v281_v50  ;;  %4713 = vmatprep.subr.bf16.mxu0 %v4712_v54  ;;  %v486_v27 = vld [vmem:[%s6666_s1 + $0x338] sm:$0xff]  ;;  %v303_v30 = vld [vmem:[%s5281_s17 + $0xc0] sm:$0xff]  ;;  %v504_v32 = vld [vmem:[%s6666_s1 + $0x3c8] sm:$0xff]  ;;  %v4722_v36 = vpack.c.bf16 %v454_v24, %v453_v23  ;;  %v4724_v38 = vpack.c.bf16 %v472_v29, %v471_v28 }
  0x2b   : > { %4743 = vmatpush3.bf16.msra.mxu1 %v4742_v52  ;;  %717 = vmatprep.mubr.f32.mxu1 %v290_v53  ;;  %v503_v31 = vld [vmem:[%s6666_s1 + $0x3c0] sm:$0xff]  ;;  %v305_v33 = vld [vmem:[%s5281_s17 + $0xd0] sm:$0xff]  ;;  %v312_v34 = vld [vmem:[%s5281_s17 + $0x108] sm:$0xff]  ;;  %v4754_v37 = vpack.c.bf16 %v486_v27, %v485_v25 }
  0x2c   : > { %588 = vmatmul.mubr.f32.gmra.mrb[2].mxu0 %v287_v62  ;;  %4745 = vmatprep.subr.bf16.mxu1 %v4744_v58  ;;  %v314_v35 = vld [vmem:[%s5281_s17 + $0x118] sm:$0xff]  ;;  %v455_v39 = vld [vmem:[%s6666_s1 + $0x240] sm:$0xff]  ;;  %v456_v40 = vld [vmem:[%s6666_s1 + $0x248] sm:$0xff]  ;;  %v4756_v42 = vpack.c.bf16 %v504_v32, %v503_v31 }
  0x2d   : > { %592 = vmatprep.mubr.f32.mxu0 %v296_v2  ;;  %4715 = vmatpush3.bf16.msra.mxu0 %v4714_v3  ;;  %v487_v41 = vld [vmem:[%s6666_s1 + $0x340] sm:$0xff]  ;;  %v488_v43 = vld [vmem:[%s6666_s1 + $0x348] sm:$0xff]  ;;  %v473_v44 = vld [vmem:[%s6666_s1 + $0x2d0] sm:$0xff]  ;;  %v4726_v52 = vpack.c.bf16 %v456_v40, %v455_v39 }
  0x2e   : > { %718 = vmatmul.mubr.f32.gmra.mrb[2].mxu1 %v289_v1  ;;  %4717 = vmatprep.subr.bf16.mxu0 %v4716_v6  ;;  %v474_v45 = vld [vmem:[%s6666_s1 + $0x2d8] sm:$0xff]  ;;  %v311_v46 = vld [vmem:[%s5281_s17 + $0x100] sm:$0xff]  ;;  %v505_v47 = vld [vmem:[%s6666_s1 + $0x3d0] sm:$0xff]  ;;  %v4758_v53 = vpack.c.bf16 %v488_v43, %v487_v41 }
  0x2f   : > { %722 = vmatprep.mubr.f32.mxu1 %v298_v4  ;;  %4747 = vmatpush3.bf16.msra.mxu1 %v4746_v5  ;;  %v506_v48 = vld [vmem:[%s6666_s1 + $0x3d8] sm:$0xff]  ;;  %v313_v49 = vld [vmem:[%s5281_s17 + $0x110] sm:$0xff]  ;;  %v320_v50 = vld [vmem:[%s5281_s17 + $0x148] sm:$0xff]  ;;  %v4728_v54 = vpack.c.bf16 %v474_v45, %v473_v44 }
  0x30   : > { %593 = vmatmul.mubr.f32.gmra.mrb[4].mxu0 %v295_v14  ;;  %4749 = vmatprep.subr.bf16.mxu1 %v4748_v10  ;;  %v322_v51 = vld [vmem:[%s5281_s17 + $0x158] sm:$0xff]  ;;  %v457_v55 = vld [vmem:[%s6666_s1 + $0x250] sm:$0xff]  ;;  %v4760_v58 = vpack.c.bf16 %v506_v48, %v505_v47  ;;  %v475_v60 = vld [vmem:[%s6666_s1 + $0x2e0] sm:$0xff] }
  0x31   : > { %597 = vmatprep.mubr.f32.mxu0 %v304_v18  ;;  %4719 = vmatpush3.bf16.msra.mxu0 %v4718_v20  ;;  %v458_v56 = vld [vmem:[%s6666_s1 + $0x258] sm:$0xff]  ;;  %v489_v57 = vld [vmem:[%s6666_s1 + $0x350] sm:$0xff]  ;;  %v476_v61 = vld [vmem:[%s6666_s1 + $0x2e8] sm:$0xff] }
  0x32   : > { %723 = vmatmul.mubr.f32.gmra.mrb[4].mxu1 %v297_v17  ;;  %4721 = vmatprep.subr.bf16.mxu0 %v4720_v22  ;;  %v490_v59 = vld [vmem:[%s6666_s1 + $0x358] sm:$0xff]  ;;  %v319_v62 = vld [vmem:[%s5281_s17 + $0x140] sm:$0xff]  ;;  %v321_v63 = vld [vmem:[%s5281_s17 + $0x150] sm:$0xff]  ;;  %v4730_v1 = vpack.c.bf16 %v458_v56, %v457_v55  ;;  %v4732_v6 = vpack.c.bf16 %v476_v61, %v475_v60 }
  0x33   : > { %727 = vmatprep.mubr.f32.mxu1 %v306_v19  ;;  %4751 = vmatpush3.bf16.msra.mxu1 %v4750_v21  ;;  %v328_v0 = vld [vmem:[%s5281_s17 + $0x188] sm:$0xff]  ;;  %v507_v2 = vld [vmem:[%s6666_s1 + $0x3e0] sm:$0xff]  ;;  %v330_v4 = vld [vmem:[%s5281_s17 + $0x198] sm:$0xff]  ;;  %v4762_v5 = vpack.c.bf16 %v490_v59, %v489_v57 }
  0x34   : > { %598 = vmatmul.mubr.f32.gmra.mrb[6].mxu0 %v303_v30  ;;  %4753 = vmatprep.subr.bf16.mxu1 %v4752_v26  ;;  %v508_v3 = vld [vmem:[%s6666_s1 + $0x3e8] sm:$0xff]  ;;  %v459_v7 = vld [vmem:[%s6666_s1 + $0x260] sm:$0xff]  ;;  %v329_v13 = vld [vmem:[%s5281_s17 + $0x190] sm:$0xff] }
  0x35   : > { %602 = vmatprep.mubr.f32.mxu0 %v312_v34  ;;  %4723 = vmatpush3.bf16.msra.mxu0 %v4722_v36  ;;  %v460_v8 = vld [vmem:[%s6666_s1 + $0x268] sm:$0xff]  ;;  %v327_v9 = vld [vmem:[%s5281_s17 + $0x180] sm:$0xff]  ;;  %v4764_v10 = vpack.c.bf16 %v508_v3, %v507_v2  ;;  %v477_v14 = vld [vmem:[%s6666_s1 + $0x2f0] sm:$0xff] }
  0x36   : > { %728 = vmatmul.mubr.f32.gmra.mrb[6].mxu1 %v305_v33  ;;  %4725 = vmatprep.subr.bf16.mxu0 %v4724_v38  ;;  %v491_v11 = vld [vmem:[%s6666_s1 + $0x360] sm:$0xff]  ;;  %v492_v12 = vld [vmem:[%s6666_s1 + $0x368] sm:$0xff]  ;;  %v478_v15 = vld [vmem:[%s6666_s1 + $0x2f8] sm:$0xff]  ;;  %v4734_v18 = vpack.c.bf16 %v460_v8, %v459_v7 }
  0x37   : > { %732 = vmatprep.mubr.f32.mxu1 %v314_v35  ;;  %4755 = vmatpush3.bf16.msra.mxu1 %v4754_v37  ;;  %v336_v16 = vld [vmem:[%s5281_s17 + $0x1c8] sm:$0xff]  ;;  %v338_v17 = vld [vmem:[%s5281_s17 + $0x1d8] sm:$0xff]  ;;  %v461_v19 = vld [vmem:[%s6666_s1 + $0x270] sm:$0xff]  ;;  %v4766_v20 = vpack.c.bf16 %v492_v12, %v491_v11  ;;  %v4736_v21 = vpack.c.bf16 %v478_v15, %v477_v14 }
  0x38   : > { %603 = vmatmul.mubr.f32.gmra.mrb[8].mxu0 %v311_v46  ;;  %4757 = vmatprep.subr.bf16.mxu1 %v4756_v42  ;;  %v462_v22 = vld [vmem:[%s6666_s1 + $0x278] sm:$0xff]  ;;  %v509_v23 = vld [vmem:[%s6666_s1 + $0x3f0] sm:$0xff]  ;;  %v335_v28 = vld [vmem:[%s5281_s17 + $0x1c0] sm:$0xff] }
  0x39   : > { %607 = vmatprep.mubr.f32.mxu0 %v320_v50  ;;  %4727 = vmatpush3.bf16.msra.mxu0 %v4726_v52  ;;  %v510_v24 = vld [vmem:[%s6666_s1 + $0x3f8] sm:$0xff]  ;;  %v493_v26 = vld [vmem:[%s6666_s1 + $0x370] sm:$0xff]  ;;  %v344_v30 = vld [vmem:[%s5281_s17 + $0x208] sm:$0xff]  ;;  %v4738_v31 = vpack.c.bf16 %v462_v22, %v461_v19 }
  0x3a   : > { %733 = vmatmul.mubr.f32.gmra.mrb[8].mxu1 %v313_v49  ;;  %4729 = vmatprep.subr.bf16.mxu0 %v4728_v54  ;;  %v4768_v25 = vpack.c.bf16 %v510_v24, %v509_v23  ;;  %v494_v27 = vld [vmem:[%s6666_s1 + $0x378] sm:$0xff]  ;;  %v337_v29 = vld [vmem:[%s5281_s17 + $0x1d0] sm:$0xff]  ;;  %v343_v34 = vld [vmem:[%s5281_s17 + $0x200] sm:$0xff] }
  0x3b   : > { %737 = vmatprep.mubr.f32.mxu1 %v322_v51  ;;  %4759 = vmatpush3.bf16.msra.mxu1 %v4758_v53  ;;  %v346_v32 = vld [vmem:[%s5281_s17 + $0x218] sm:$0xff]  ;;  %v4770_v33 = vpack.c.bf16 %v494_v27, %v493_v26  ;;  %v345_v35 = vld [vmem:[%s5281_s17 + $0x210] sm:$0xff]  ;;  %v352_v36 = vld [vmem:[%s5281_s17 + $0x248] sm:$0xff] }
  0x3c   : > { %608 = vmatmul.mubr.f32.gmra.mrb[10].mxu0 %v319_v62  ;;  %4761 = vmatprep.subr.bf16.mxu1 %v4760_v58  ;;  %v354_v37 = vld [vmem:[%s5281_s17 + $0x258] sm:$0xff]  ;;  %v351_v38 = vld [vmem:[%s5281_s17 + $0x240] sm:$0xff]  ;;  %v353_v39 = vld [vmem:[%s5281_s17 + $0x250] sm:$0xff] }
  0x3d   : > { %612 = vmatprep.mubr.f32.mxu0 %v328_v0  ;;  %4731 = vmatpush3.bf16.msra.mxu0 %v4730_v1  ;;  %v360_v40 = vld [vmem:[%s5281_s17 + $0x288] sm:$0xff]  ;;  %v362_v41 = vld [vmem:[%s5281_s17 + $0x298] sm:$0xff]  ;;  %v359_v42 = vld [vmem:[%s5281_s17 + $0x280] sm:$0xff] }
  0x3e   : > { %738 = vmatmul.mubr.f32.gmra.mrb[10].mxu1 %v321_v63  ;;  %4733 = vmatprep.subr.bf16.mxu0 %v4732_v6  ;;  %v361_v43 = vld [vmem:[%s5281_s17 + $0x290] sm:$0xff]  ;;  %v368_v44 = vld [vmem:[%s5281_s17 + $0x2c8] sm:$0xff]  ;;  %v370_v45 = vld [vmem:[%s5281_s17 + $0x2d8] sm:$0xff] }
  0x3f   : > { %742 = vmatprep.mubr.f32.mxu1 %v330_v4  ;;  %4763 = vmatpush3.bf16.msra.mxu1 %v4762_v5  ;;  %v367_v46 = vld [vmem:[%s5281_s17 + $0x2c0] sm:$0xff]  ;;  %v369_v47 = vld [vmem:[%s5281_s17 + $0x2d0] sm:$0xff]  ;;  %v376_v48 = vld [vmem:[%s5281_s17 + $0x308] sm:$0xf] }
  0x40   : > { %613 = vmatmul.mubr.f32.gmra.mrb[12].mxu0 %v327_v9  ;;  %4765 = vmatprep.subr.bf16.mxu1 %v4764_v10  ;;  %v378_v49 = vld [vmem:[%s5281_s17 + $0x318] sm:$0xf]  ;;  %v375_v50 = vld [vmem:[%s5281_s17 + $0x300] sm:$0xf]  ;;  %v377_v51 = vld [vmem:[%s5281_s17 + $0x310] sm:$0xf] }
  0x41   : > { %617 = vmatprep.mubr.f32.mxu0 %v336_v16  ;;  %4735 = vmatpush3.bf16.msra.mxu0 %v4734_v18  ;;  %v284_v52 = vld [vmem:[%s5281_s17 + $0x28] sm:$0xff]  ;;  %v286_v53 = vld [vmem:[%s5281_s17 + $0x38] sm:$0xff]  ;;  %v283_v54 = vld [vmem:[%s5281_s17 + $0x20] sm:$0xff] }
  0x42   : > { %743 = vmatmul.mubr.f32.gmra.mrb[12].mxu1 %v329_v13  ;;  %4737 = vmatprep.subr.bf16.mxu0 %v4736_v21  ;;  %v285_v55 = vld [vmem:[%s5281_s17 + $0x30] sm:$0xff]  ;;  %v292_v56 = vld [vmem:[%s5281_s17 + $0x68] sm:$0xff]  ;;  %v294_v57 = vld [vmem:[%s5281_s17 + $0x78] sm:$0xff] }
  0x43   : > { %747 = vmatprep.mubr.f32.mxu1 %v338_v17  ;;  %4767 = vmatpush3.bf16.msra.mxu1 %v4766_v20  ;;  %v291_v58 = vld [vmem:[%s5281_s17 + $0x60] sm:$0xff]  ;;  %v293_v59 = vld [vmem:[%s5281_s17 + $0x70] sm:$0xff]  ;;  %v300_v60 = vld [vmem:[%s5281_s17 + $0xa8] sm:$0xff] }
  0x44   : > { %618 = vmatmul.mubr.f32.gmra.mrb[14].mxu0 %v335_v28  ;;  %4769 = vmatprep.subr.bf16.mxu1 %v4768_v25  ;;  %v302_v61 = vld [vmem:[%s5281_s17 + $0xb8] sm:$0xff]  ;;  %v299_v62 = vld [vmem:[%s5281_s17 + $0xa0] sm:$0xff]  ;;  %v301_v63 = vld [vmem:[%s5281_s17 + $0xb0] sm:$0xff] }
  0x45   : > { %622 = vmatprep.mubr.f32.mxu0 %v344_v30  ;;  %4739 = vmatpush3.bf16.msra.mxu0 %v4738_v31  ;;  %v308_v0 = vld [vmem:[%s5281_s17 + $0xe8] sm:$0xff]  ;;  %v310_v1 = vld [vmem:[%s5281_s17 + $0xf8] sm:$0xff]  ;;  %v307_v2 = vld [vmem:[%s5281_s17 + $0xe0] sm:$0xff] }
  0x46   : > { %748 = vmatmul.mubr.f32.gmra.mrb[14].mxu1 %v337_v29  ;;  %v309_v3 = vld [vmem:[%s5281_s17 + $0xf0] sm:$0xff]  ;;  %v316_v4 = vld [vmem:[%s5281_s17 + $0x128] sm:$0xff]  ;;  %v318_v5 = vld [vmem:[%s5281_s17 + $0x138] sm:$0xff] }
  0x47   : > { %752 = vmatprep.mubr.f32.mxu1 %v346_v32  ;;  %4771 = vmatpush3.bf16.msra.mxu1 %v4770_v33  ;;  %v315_v6 = vld [vmem:[%s5281_s17 + $0x120] sm:$0xff]  ;;  %v317_v7 = vld [vmem:[%s5281_s17 + $0x130] sm:$0xff]  ;;  %v324_v8 = vld [vmem:[%s5281_s17 + $0x168] sm:$0xff] }
  0x48   : > { %623 = vmatmul.mubr.f32.gmra.mrb[16].mxu0 %v343_v34  ;;  %v326_v9 = vld [vmem:[%s5281_s17 + $0x178] sm:$0xff]  ;;  %v323_v10 = vld [vmem:[%s5281_s17 + $0x160] sm:$0xff]  ;;  %v325_v11 = vld [vmem:[%s5281_s17 + $0x170] sm:$0xff] }
  0x49   : > { %627 = vmatprep.mubr.f32.mxu0 %v352_v36  ;;  %v332_v12 = vld [vmem:[%s5281_s17 + $0x1a8] sm:$0xff]  ;;  %v334_v13 = vld [vmem:[%s5281_s17 + $0x1b8] sm:$0xff]  ;;  %v331_v14 = vld [vmem:[%s5281_s17 + $0x1a0] sm:$0xff] }
  0x4a   : > { %753 = vmatmul.mubr.f32.gmra.mrb[16].mxu1 %v345_v35  ;;  %v333_v15 = vld [vmem:[%s5281_s17 + $0x1b0] sm:$0xff]  ;;  %v340_v16 = vld [vmem:[%s5281_s17 + $0x1e8] sm:$0xff]  ;;  %v342_v17 = vld [vmem:[%s5281_s17 + $0x1f8] sm:$0xff] }
  0x4b   : > { %757 = vmatprep.mubr.f32.mxu1 %v354_v37  ;;  %v339_v18 = vld [vmem:[%s5281_s17 + $0x1e0] sm:$0xff]  ;;  %v341_v19 = vld [vmem:[%s5281_s17 + $0x1f0] sm:$0xff]  ;;  %v348_v20 = vld [vmem:[%s5281_s17 + $0x228] sm:$0xff] }
  0x4c   : > { %628 = vmatmul.mubr.f32.gmra.mrb[18].mxu0 %v351_v38  ;;  %v350_v21 = vld [vmem:[%s5281_s17 + $0x238] sm:$0xff]  ;;  %v347_v22 = vld [vmem:[%s5281_s17 + $0x220] sm:$0xff]  ;;  %v349_v23 = vld [vmem:[%s5281_s17 + $0x230] sm:$0xff] }
  0x4d   : > { %632 = vmatprep.mubr.f32.mxu0 %v360_v40  ;;  %v356_v24 = vld [vmem:[%s5281_s17 + $0x268] sm:$0xff]  ;;  %v358_v25 = vld [vmem:[%s5281_s17 + $0x278] sm:$0xff]  ;;  %v355_v26 = vld [vmem:[%s5281_s17 + $0x260] sm:$0xff] }
  0x4e   : > { %758 = vmatmul.mubr.f32.gmra.mrb[18].mxu1 %v353_v39  ;;  %v357_v27 = vld [vmem:[%s5281_s17 + $0x270] sm:$0xff]  ;;  %v364_v28 = vld [vmem:[%s5281_s17 + $0x2a8] sm:$0xff]  ;;  %v366_v29 = vld [vmem:[%s5281_s17 + $0x2b8] sm:$0xff] }
  0x4f   : > { %762 = vmatprep.mubr.f32.mxu1 %v362_v41  ;;  %v363_v30 = vld [vmem:[%s5281_s17 + $0x2a0] sm:$0xff]  ;;  %v365_v31 = vld [vmem:[%s5281_s17 + $0x2b0] sm:$0xff]  ;;  %v372_v32 = vld [vmem:[%s5281_s17 + $0x2e8] sm:$0xff] }
  0x50   : > { %633 = vmatmul.mubr.f32.gmra.mrb[20].mxu0 %v359_v42  ;;  %v374_v33 = vld [vmem:[%s5281_s17 + $0x2f8] sm:$0xff]  ;;  %v371_v34 = vld [vmem:[%s5281_s17 + $0x2e0] sm:$0xff]  ;;  %v373_v35 = vld [vmem:[%s5281_s17 + $0x2f0] sm:$0xff] }
  0x51   : > { %637 = vmatprep.mubr.f32.mxu0 %v368_v44  ;;  %v380_v36 = vld [vmem:[%s5281_s17 + $0x328] sm:$0xf]  ;;  %v382_v37 = vld [vmem:[%s5281_s17 + $0x338] sm:$0xf]  ;;  %v379_v38 = vld [vmem:[%s5281_s17 + $0x320] sm:$0xf] }
  0x52   : > { %763 = vmatmul.mubr.f32.gmra.mrb[20].mxu1 %v361_v43  ;;  %v381_v39 = vld [vmem:[%s5281_s17 + $0x330] sm:$0xf]  ;;  %v3311_v40 = vld [vmem:[%s6668_s3 + $0x80] sm:$0xff]  ;;  %v3312_v41 = vld [vmem:[%s6668_s3 + $0x88] sm:$0xff]  ;;  %s6621_s17 = scalar_lea.vmem %s6672_s7, %s5053_s27 }
  0x53   : > { %767 = vmatprep.mubr.f32.mxu1 %v370_v45  ;;  %v4772_v42 = vpack.c.bf16 %v3312_v41, %v3311_v40  ;;  %v3313_v43 = vld [vmem:[%s6668_s3 + $0x90] sm:$0xff]  ;;  %v3314_v44 = vld [vmem:[%s6668_s3 + $0x98] sm:$0xff] }
  0x54   : > { %638 = vmatmul.mubr.f32.gmra.mrb[22].mxu0 %v367_v46  ;;  %v4776_v45 = vpack.c.bf16 %v3314_v44, %v3313_v43  ;;  %v3315_v46 = vld [vmem:[%s6668_s3 + $0xa0] sm:$0xff] }
  0x55   : > { %642 = vmatprep.mubr.f32.mxu0 %v376_v48  ;;  %4773 = vmatprep.subr.bf16.mxu0 %v4772_v42 }
  0x56   : > { %768 = vmatmul.mubr.f32.gmra.mrb[22].mxu1 %v369_v47  ;;  %v3316_v47 = vld [vmem:[%s6668_s3 + $0xa8] sm:$0xff] }
  0x57   : > { %772 = vmatprep.mubr.f32.mxu1 %v378_v49  ;;  %v4780_v48 = vpack.c.bf16 %v3316_v47, %v3315_v46  ;;  %v3317_v49 = vld [vmem:[%s6668_s3 + $0xb0] sm:$0xff] }
  0x58   : > { %643 = vmatmul.mubr.f32.gmra.mrb[24].mxu0 %v375_v50  ;;  %v3318_v50 = vld [vmem:[%s6668_s3 + $0xb8] sm:$0xff] }
  0x59   : > { %842 = vmatprep.mubr.f32.mxu0 %v284_v52  ;;  %v3319_v52 = vld [vmem:[%s6668_s3 + $0xc0] sm:$0xff] }
  0x5a   : > { %773 = vmatmul.mubr.f32.gmra.mrb[24].mxu1 %v377_v51  ;;  %v4784_v51 = vpack.c.bf16 %v3318_v50, %v3317_v49 }
  0x5b   : > { %972 = vmatprep.mubr.f32.mxu1 %v286_v53  ;;  %v3320_v53 = vld [vmem:[%s6668_s3 + $0xc8] sm:$0xff] }
  0x5c   : > { %843 = vmatmul.mubr.f32.vlgmr.msra.gmra.mrb[26].mxu0 %v283_v54  ;;  %v4788_v54 = vpack.c.bf16 %v3320_v53, %v3319_v52 }
  0x5d   : > { %847 = vmatprep.mubr.f32.mxu0 %v292_v56  ;;  %4775 = vmatpush3.bf16.msra.mxu0 %v4772_v42  ;;  %v3322_v56 = vld [vmem:[%s6668_s3 + $0xd8] sm:$0xff] }
  0x5e   : > { %973 = vmatmul.mubr.f32.vlgmr.msra.gmra.mrb[26].mxu1 %v285_v55  ;;  %4777 = vmatprep.subr.bf16.mxu0 %v4776_v45  ;;  %v3321_v55 = vld [vmem:[%s6668_s3 + $0xd0] sm:$0xff] }
  0x5f   : > { %977 = vmatprep.mubr.f32.mxu1 %v294_v57  ;;  %v4792_v57 = vpack.c.bf16 %v3322_v56, %v3321_v55 }
  0x60   : > { %848 = vmatmul.mubr.f32.gmra.mrb[28].mxu0 %v291_v58  ;;  %v3323_v58 = vld [vmem:[%s6668_s3 + $0xe0] sm:$0xff] }
  0x61   : > { %852 = vmatprep.mubr.f32.mxu0 %v300_v60  ;;  %4779 = vmatpush3.bf16.msra.mxu0 %v4776_v45 }
  0x62   : > { %978 = vmatmul.mubr.f32.gmra.mrb[28].mxu1 %v293_v59  ;;  %4781 = vmatprep.subr.bf16.mxu0 %v4780_v48  ;;  %v3324_v59 = vld [vmem:[%s6668_s3 + $0xe8] sm:$0xff] }
  0x63   : > { %982 = vmatprep.mubr.f32.mxu1 %v302_v61  ;;  %v4796_v60 = vpack.c.bf16 %v3324_v59, %v3323_v58  ;;  %v3325_v61 = vld [vmem:[%s6668_s3 + $0xf0] sm:$0xff] }
  0x64   : > { %853 = vmatmul.mubr.f32.gmra.mrb[30].mxu0 %v299_v62  ;;  %v3326_v62 = vld [vmem:[%s6668_s3 + $0xf8] sm:$0xff] }
  0x65   : > { %857 = vmatprep.mubr.f32.mxu0 %v308_v0  ;;  %4783 = vmatpush3.bf16.msra.mxu0 %v4780_v48  ;;  %v1076_v0 = vld [vmem:[%s6668_s3] sm:$0xff] }
  0x66   : > { %983 = vmatmul.mubr.f32.gmra.mrb[30].mxu1 %v301_v63  ;;  %4785 = vmatprep.subr.bf16.mxu0 %v4784_v51  ;;  %v4800_v63 = vpack.c.bf16 %v3326_v62, %v3325_v61 }
  0x67   : > { %987 = vmatprep.mubr.f32.mxu1 %v310_v1  ;;  %v1077_v1 = vld [vmem:[%s6668_s3 + $0x8] sm:$0xff] }
  0x68   : > { %858 = vmatmul.mubr.f32.gmra.mrb[32].mxu0 %v307_v2  ;;  %v5684_v2 = vpack.c.bf16 %v1077_v1, %v1076_v0 }
  0x69   : > { %862 = vmatprep.mubr.f32.mxu0 %v316_v4  ;;  %4787 = vmatpush3.bf16.msra.mxu0 %v4784_v51  ;;  %v5690_v4 = vld [vmem:[%s6667_s2] ss:$0 sm:$0xff] }
  0x6a   : > { %988 = vmatmul.mubr.f32.gmra.mrb[32].mxu1 %v309_v3  ;;  %4789 = vmatprep.subr.bf16.mxu0 %v4788_v54 }
  0x6b   : > { %992 = vmatprep.mubr.f32.mxu1 %v318_v5 }
  0x6c   : > { %863 = vmatmul.mubr.f32.gmra.mrb[34].mxu0 %v315_v6 }
  0x6d   : > { %867 = vmatprep.mubr.f32.mxu0 %v324_v8  ;;  %4791 = vmatpush3.bf16.msra.mxu0 %v4788_v54 }
  0x6e   : > { %993 = vmatmul.mubr.f32.gmra.mrb[34].mxu1 %v317_v7  ;;  %4793 = vmatprep.subr.bf16.mxu0 %v4792_v57 }
  0x6f   : > { %997 = vmatprep.mubr.f32.mxu1 %v326_v9 }
  0x70   : > { %868 = vmatmul.mubr.f32.gmra.mrb[36].mxu0 %v323_v10 }
  0x71   : > { %872 = vmatprep.mubr.f32.mxu0 %v332_v12  ;;  %4795 = vmatpush3.bf16.msra.mxu0 %v4792_v57 }
  0x72   : > { %998 = vmatmul.mubr.f32.gmra.mrb[36].mxu1 %v325_v11  ;;  %4797 = vmatprep.subr.bf16.mxu0 %v4796_v60 }
  0x73   : > { %1002 = vmatprep.mubr.f32.mxu1 %v334_v13 }
  0x74   : > { %873 = vmatmul.mubr.f32.gmra.mrb[38].mxu0 %v331_v14 }
  0x75   : > { %877 = vmatprep.mubr.f32.mxu0 %v340_v16  ;;  %4799 = vmatpush3.bf16.msra.mxu0 %v4796_v60 }
  0x76   : > { %1003 = vmatmul.mubr.f32.gmra.mrb[38].mxu1 %v333_v15  ;;  %4801 = vmatprep.subr.bf16.mxu0 %v4800_v63 }
  0x77   : > { %1007 = vmatprep.mubr.f32.mxu1 %v342_v17 }
  0x78   : > { %878 = vmatmul.mubr.f32.gmra.mrb[40].mxu0 %v339_v18 }
  0x79   : > { %882 = vmatprep.mubr.f32.mxu0 %v348_v20  ;;  %4803 = vmatpush3.bf16.msra.mxu0 %v4800_v63 }
  0x7a   : > { %1008 = vmatmul.mubr.f32.gmra.mrb[40].mxu1 %v341_v19  ;;  %4805 = vmatprep.subr.bf16.mxu0 %v5684_v2 }
  0x7b   : > { %1012 = vmatprep.mubr.f32.mxu1 %v350_v21 }
  0x7c   : > { %883 = vmatmul.mubr.f32.gmra.mrb[42].mxu0 %v347_v22 }
  0x7d   : > { %887 = vmatprep.mubr.f32.mxu0 %v356_v24 }
  0x7e   : > { %1013 = vmatmul.mubr.f32.gmra.mrb[42].mxu1 %v349_v23 }
  0x7f   : > { %1017 = vmatprep.mubr.f32.mxu1 %v358_v25 }
  0x80   : > { %888 = vmatmul.mubr.f32.gmra.mrb[44].mxu0 %v355_v26 }
  0x81   : > { %892 = vmatprep.mubr.f32.mxu0 %v364_v28 }
  0x82   : > { %1018 = vmatmul.mubr.f32.gmra.mrb[44].mxu1 %v357_v27 }
  0x83   : > { %1022 = vmatprep.mubr.f32.mxu1 %v366_v29 }
  0x84   : > { %893 = vmatmul.mubr.f32.gmra.mrb[46].mxu0 %v363_v30 }
  0x85   : > { %897 = vmatprep.mubr.f32.mxu0 %v372_v32 }
  0x86   : > { %1023 = vmatmul.mubr.f32.gmra.mrb[46].mxu1 %v365_v31 }
  0x87   : > { %1027 = vmatprep.mubr.f32.mxu1 %v374_v33 }
  0x88   : > { %898 = vmatmul.mubr.f32.gmra.mrb[48].mxu0 %v371_v34 }
  0x89   : > { %902 = vmatprep.mubr.f32.mxu0 %v380_v36 }
  0x8a   : > { %1028 = vmatmul.mubr.f32.gmra.mrb[48].mxu1 %v373_v35 }
  0x8b   : > { %1032 = vmatprep.mubr.f32.mxu1 %v382_v37 }
  0x8c   : > { %903 = vmatmul.mubr.f32.gmra.mrb[50].mxu0 %v379_v38 }
  0x8e   : > { %1033 = vmatmul.mubr.f32.gmra.mrb[50].mxu1 %v381_v39 }
  0xfb   : > { %v3540_v3 = vpop.f32.mrb[0].mxu0 }
  0xfc   : > { %v3541_v5 = vpop.f32.mrb[1].mxu0 }
  0xfd   : > { %v3611_v6 = vpop.f32.mrb[0].mxu1  ;;  %v3542_v7 = vadd.f32 %v3541_v5, %v3540_v3 }
  0xfe   : > { %v3612_v8 = vpop.f32.mrb[1].mxu1 }
  0xff   : > { %v3613_v9 = vadd.f32 %v3612_v8, %v3611_v6  ;;  %v585_v10 = vadd.f32 %v3542_v7, %v5690_v4  ;;  %v3543_v11 = vpop.f32.mrb[2].mxu0 }
 0x100   : > { %v3544_v12 = vpop.f32.mrb[3].mxu0 }
 0x101   : > { %v3614_v13 = vpop.f32.mrb[2].mxu1  ;;  %v5693_v14 = vadd.f32 %v3613_v9, %v585_v10  ;;  %v3545_v15 = vadd.f32 %v3544_v12, %v3543_v11 }
 0x102   : > { %v3615_v16 = vpop.f32.mrb[3].mxu1 }
 0x103   : > { %v3616_v17 = vadd.f32 %v3615_v16, %v3614_v13  ;;  %v590_v18 = vadd.f32 %v3545_v15, %v5690_v4  ;;  %v3546_v19 = vpop.f32.mrb[4].mxu0 }
 0x104   : > { %v3547_v20 = vpop.f32.mrb[5].mxu0 }
 0x105   : > { %v3617_v21 = vpop.f32.mrb[4].mxu1  ;;  %v5696_v22 = vadd.f32 %v3616_v17, %v590_v18  ;;  %v3548_v23 = vadd.f32 %v3547_v20, %v3546_v19 }
 0x106   : > { %v3618_v24 = vpop.f32.mrb[5].mxu1 }
 0x107   : > { %v3619_v25 = vadd.f32 %v3618_v24, %v3617_v21  ;;  %v595_v26 = vadd.f32 %v3548_v23, %v5690_v4  ;;  %v3549_v27 = vpop.f32.mrb[6].mxu0 }
 0x108   : > { %v3550_v28 = vpop.f32.mrb[7].mxu0 }
 0x109   : > { %v3620_v29 = vpop.f32.mrb[6].mxu1  ;;  %v5699_v30 = vadd.f32 %v3619_v25, %v595_v26  ;;  %v3551_v31 = vadd.f32 %v3550_v28, %v3549_v27 }
 0x10a   : > { %v3621_v32 = vpop.f32.mrb[7].mxu1 }
 0x10b   : > { %v3622_v33 = vadd.f32 %v3621_v32, %v3620_v29  ;;  %v600_v34 = vadd.f32 %v3551_v31, %v5690_v4  ;;  %v3552_v35 = vpop.f32.mrb[8].mxu0 }
 0x10c   : > { %v3553_v36 = vpop.f32.mrb[9].mxu0 }
 0x10d   : > { %v3623_v37 = vpop.f32.mrb[8].mxu1  ;;  %v5702_v38 = vadd.f32 %v3622_v33, %v600_v34  ;;  %v3554_v39 = vadd.f32 %v3553_v36, %v3552_v35 }
 0x10e   : > { %v3624_v40 = vpop.f32.mrb[9].mxu1 }
 0x10f   : > { %v3625_v41 = vadd.f32 %v3624_v40, %v3623_v37  ;;  %v605_v42 = vadd.f32 %v3554_v39, %v5690_v4  ;;  %v3555_v43 = vpop.f32.mrb[10].mxu0 }
 0x110   : > { %v3556_v44 = vpop.f32.mrb[11].mxu0 }
 0x111   : > { %v3626_v45 = vpop.f32.mrb[10].mxu1  ;;  %v5705_v46 = vadd.f32 %v3625_v41, %v605_v42  ;;  %v3557_v47 = vadd.f32 %v3556_v44, %v3555_v43 }
 0x112   : > { %v3627_v48 = vpop.f32.mrb[11].mxu1 }
 0x113   : > { %v3628_v49 = vadd.f32 %v3627_v48, %v3626_v45  ;;  %v610_v50 = vadd.f32 %v3557_v47, %v5690_v4  ;;  %v3558_v51 = vpop.f32.mrb[12].mxu0 }
 0x114   : > { %v3559_v52 = vpop.f32.mrb[13].mxu0 }
 0x115   : > { %v3629_v53 = vpop.f32.mrb[12].mxu1  ;;  %v5708_v54 = vadd.f32 %v3628_v49, %v610_v50  ;;  %v3560_v55 = vadd.f32 %v3559_v52, %v3558_v51 }
 0x116   : > { %v3630_v56 = vpop.f32.mrb[13].mxu1 }
 0x117   : > { %v3631_v57 = vadd.f32 %v3630_v56, %v3629_v53  ;;  %v615_v58 = vadd.f32 %v3560_v55, %v5690_v4  ;;  %v3561_v59 = vpop.f32.mrb[14].mxu0 }
 0x118   : > { %v3562_v60 = vpop.f32.mrb[15].mxu0 }
 0x119   : > { %v3632_v61 = vpop.f32.mrb[14].mxu1  ;;  %v5711_v62 = vadd.f32 %v3631_v57, %v615_v58  ;;  %v3563_v63 = vadd.f32 %v3562_v60, %v3561_v59 }
 0x11a   : > { %v3633_v0 = vpop.f32.mrb[15].mxu1 }
 0x11b   : > { %v3634_v1 = vadd.f32 %v3633_v0, %v3632_v61  ;;  %v620_v3 = vadd.f32 %v3563_v63, %v5690_v4  ;;  %v3564_v5 = vpop.f32.mrb[16].mxu0 }
 0x11c   : > { %v3565_v6 = vpop.f32.mrb[17].mxu0 }
 0x11d   : > { %v3635_v7 = vpop.f32.mrb[16].mxu1  ;;  %v5714_v8 = vadd.f32 %v3634_v1, %v620_v3  ;;  %v3566_v9 = vadd.f32 %v3565_v6, %v3564_v5 }
 0x11e   : > { %v3636_v10 = vpop.f32.mrb[17].mxu1 }
 0x11f   : > { %v3637_v11 = vadd.f32 %v3636_v10, %v3635_v7  ;;  %v625_v12 = vadd.f32 %v3566_v9, %v5690_v4  ;;  %v3567_v13 = vpop.f32.mrb[18].mxu0 }
 0x120   : > { %v3568_v15 = vpop.f32.mrb[19].mxu0 }
 0x121   : > { %v3638_v16 = vpop.f32.mrb[18].mxu1  ;;  %v5717_v17 = vadd.f32 %v3637_v11, %v625_v12  ;;  %v3569_v18 = vadd.f32 %v3568_v15, %v3567_v13 }
 0x122   : > { %v3639_v19 = vpop.f32.mrb[19].mxu1 }
 0x123   : > { %v3640_v20 = vadd.f32 %v3639_v19, %v3638_v16  ;;  %v630_v21 = vadd.f32 %v3569_v18, %v5690_v4  ;;  %v3570_v23 = vpop.f32.mrb[20].mxu0 }
 0x124   : > { %v3571_v24 = vpop.f32.mrb[21].mxu0 }
 0x125   : > { %v3641_v25 = vpop.f32.mrb[20].mxu1  ;;  %v5720_v26 = vadd.f32 %v3640_v20, %v630_v21  ;;  %v3572_v27 = vadd.f32 %v3571_v24, %v3570_v23 }
 0x126   : > { %v3642_v28 = vpop.f32.mrb[21].mxu1 }
 0x127   : > { %v3643_v29 = vadd.f32 %v3642_v28, %v3641_v25  ;;  %v635_v31 = vadd.f32 %v3572_v27, %v5690_v4  ;;  %v3573_v32 = vpop.f32.mrb[22].mxu0 }
 0x128   : > { %v3574_v33 = vpop.f32.mrb[23].mxu0 }
 0x129   : > { %v3644_v34 = vpop.f32.mrb[22].mxu1  ;;  %v5723_v35 = vadd.f32 %v3643_v29, %v635_v31  ;;  %v3575_v36 = vadd.f32 %v3574_v33, %v3573_v32 }
 0x12a   : > { %v3645_v37 = vpop.f32.mrb[23].mxu1 }
 0x12b   : > { %v3646_v39 = vadd.f32 %v3645_v37, %v3644_v34  ;;  %v640_v40 = vadd.f32 %v3575_v36, %v5690_v4  ;;  %v3576_v41 = vpop.f32.mrb[24].mxu0 }
 0x12c   : > { %v3577_v42 = vpop.f32.mrb[25].mxu0 }
 0x12d   : > { %v3647_v43 = vpop.f32.mrb[24].mxu1  ;;  %v5726_v44 = vadd.f32 %v3646_v39, %v640_v40  ;;  %v3578_v45 = vadd.f32 %v3577_v42, %v3576_v41  ;;  %v1079_v42 = vld [vmem:[%s6668_s3 + $0x18] sm:$0xff] }
 0x12e   : > { %v3648_v47 = vpop.f32.mrb[25].mxu1 }
 0x12f   : > { %v3649_v48 = vadd.f32 %v3648_v47, %v3647_v43  ;;  %v645_v49 = vadd.f32 %v3578_v45, %v5690_v4  ;;  %v3682_v50 = vpop.f32.mrb[26].mxu0 }
 0x130   : > { %v3683_v51 = vpop.f32.mrb[27].mxu0 }
 0x131   : > { %v3753_v52 = vpop.f32.mrb[26].mxu1  ;;  %v5729_v53 = vadd.f32 %v3649_v48, %v645_v49  ;;  %v3684_v55 = vadd.f32 %v3683_v51, %v3682_v50  ;;  %v3360_v48 = vld [vmem:[%s6670_s5 + $0x40] sm:$0xff]  ;;  %v3361_v49 = vld [vmem:[%s6670_s5 + $0x48] sm:$0xff]  ;;  %v3362_v50 = vld [vmem:[%s6670_s5 + $0x50] sm:$0xff] }
 0x132   : > { %v3754_v56 = vpop.f32.mrb[27].mxu1 }
 0x133   : > { %v3755_v57 = vadd.f32 %v3754_v56, %v3753_v52  ;;  %v845_v58 = vadd.f32 %v3684_v55, %v5693_v14  ;;  %v3685_v59 = vpop.f32.mrb[28].mxu0 }
 0x134   : > { %v3686_v60 = vpop.f32.mrb[29].mxu0 }
 0x135   : > { %v3756_v61 = vpop.f32.mrb[28].mxu1  ;;  %v5732_v63 = vadd.f32 %v3755_v57, %v845_v58  ;;  %v3687_v0 = vadd.f32 %v3686_v60, %v3685_v59  ;;  %v5073_v57 = vmov 0.0|0.0   ;;  %v4901_v58 = vpack.c.bf16 %v3361_v49, %v3360_v48  ;;  %v3363_v59 = vld [vmem:[%s6670_s5 + $0x58] sm:$0xff] }
 0x136   : > { %v3757_v1 = vpop.f32.mrb[29].mxu1  ;;  %4900 = vmatprep.subr.bf16.mxu1 %v5073_v57 }
 0x137   : > { %v3758_v3 = vadd.f32 %v3757_v1, %v3756_v61  ;;  %v1038_v4 = vmax.f32 %v5732_v63, 0.0  ;;  %v850_v5 = vadd.f32 %v3687_v0, %v5696_v22  ;;  %v3688_v6 = vpop.f32.mrb[30].mxu0  ;;  %v1080_v1 = vld [vmem:[%s6668_s3 + $0x20] sm:$0xff]  ;;  %4902 = vmatpush3.bf16.msra.mxu1 %v4901_v58  ;;  %v1086_v58 = vld [vmem:[%s6668_s3 + $0x50] sm:$0xff] }
 0x138   : > { %v3689_v7 = vpop.f32.mrb[31].mxu0  ;;  %4903 = vmatprep.subr.bf16.mxu1 %v5073_v57  ;;  %v3333_v63 = vld [vmem:[%s6668_s3 + $0x130] sm:$0xff] }
 0x139   : > { %v3759_v9 = vpop.f32.mrb[30].mxu1  ;;  %1051 = vst [vmem:[#allocation2] sm:$0xff] %v1038_v4  ;;  %v5738_v10 = vadd.f32 %v3758_v3, %v850_v5  ;;  %v3690_v14 = vadd.f32 %v3689_v7, %v3688_v6  ;;  %v4904_v7 = vpack.c.bf16 %v3363_v59, %v3362_v50  ;;  %v1087_v59 = vld [vmem:[%s6668_s3 + $0x58] sm:$0xff] }
 0x13a   : > { %v3760_v11 = vpop.f32.mrb[31].mxu1 }
 0x13b   : > { %v3761_v12 = vadd.f32 %v3760_v11, %v3759_v9  ;;  %v1039_v13 = vmax.f32 %v5738_v10, 0.0  ;;  %v855_v15 = vadd.f32 %v3690_v14, %v5699_v30  ;;  %v3691_v16 = vpop.f32.mrb[32].mxu0  ;;  %v3364_v14 = vld [vmem:[%s6670_s5 + $0x60] sm:$0xff]  ;;  %v3365_v11 = vld [vmem:[%s6670_s5 + $0x68] sm:$0xff]  ;;  %4905 = vmatpush3.bf16.msra.mxu1 %v4904_v7 }
 0x13c   : > { %v3692_v18 = vpop.f32.mrb[33].mxu0  ;;  %4906 = vmatprep.subr.bf16.mxu1 %v5073_v57 }
 0x13d   : > { %v3762_v19 = vpop.f32.mrb[32].mxu1  ;;  %1052 = vst [vmem:[#allocation2 + $0x8] sm:$0xff] %v1039_v13  ;;  %v5744_v22 = vadd.f32 %v3761_v12, %v855_v15  ;;  %v3693_v20 = vadd.f32 %v3692_v18, %v3691_v16 }
 0x13e   : > { %v3763_v21 = vpop.f32.mrb[33].mxu1 }
 0x13f   : > { %v3764_v23 = vadd.f32 %v3763_v21, %v3762_v19  ;;  %v1040_v24 = vmax.f32 %v5744_v22, 0.0  ;;  %v860_v25 = vadd.f32 %v3693_v20, %v5702_v38  ;;  %v3694_v27 = vpop.f32.mrb[34].mxu0  ;;  %v1078_v38 = vld [vmem:[%s6668_s3 + $0x10] sm:$0xff]  ;;  %v3336_v22 = vld [vmem:[%s6668_s3 + $0x148] sm:$0xff] }
 0x140   : > { %v3695_v28 = vpop.f32.mrb[35].mxu0  ;;  %v4808_v56 = vpack.c.bf16 %v1079_v42, %v1078_v38  ;;  %v1082_v21 = vld [vmem:[%s6668_s3 + $0x30] sm:$0xff]  ;;  %v1085_v38 = vld [vmem:[%s6668_s3 + $0x48] sm:$0xff] }
 0x141   : > { %v3765_v29 = vpop.f32.mrb[34].mxu1  ;;  %1053 = vst [vmem:[#allocation2 + $0x10] sm:$0xff] %v1040_v24  ;;  %v5750_v30 = vadd.f32 %v3764_v23, %v860_v25  ;;  %v3696_v31 = vadd.f32 %v3695_v28, %v3694_v27  ;;  %v1083_v23 = vld [vmem:[%s6668_s3 + $0x38] sm:$0xff]  ;;  %v4907_v28 = vpack.c.bf16 %v3365_v11, %v3364_v14  ;;  %v1088_v11 = vld [vmem:[%s6668_s3 + $0x60] sm:$0xff] }
 0x142   : > { %v3766_v32 = vpop.f32.mrb[35].mxu1 }
 0x143   : > { %v3767_v33 = vadd.f32 %v3766_v32, %v3765_v29  ;;  %v1041_v34 = vmax.f32 %v5750_v30, 0.0  ;;  %v865_v36 = vadd.f32 %v3696_v31, %v5705_v46  ;;  %v3697_v37 = vpop.f32.mrb[36].mxu0  ;;  %4908 = vmatpush3.bf16.msra.mxu1 %v4907_v28  ;;  %v3337_v30 = vld [vmem:[%s6668_s3 + $0x150] sm:$0xff] }
 0x144   : > { %v3698_v39 = vpop.f32.mrb[37].mxu0  ;;  %v1092_v41 = vld [vmem:[#allocation2 + $0x1] sm:$0xff]  ;;  %4909 = vmatprep.subr.bf16.mxu1 %v5073_v57 }
 0x145   : > { %v3768_v40 = vpop.f32.mrb[36].mxu1  ;;  %1054 = vst [vmem:[#allocation2 + $0x18] sm:$0xff] %v1041_v34  ;;  %v5762_v43 = vadd.f32 %v3767_v33, %v865_v36  ;;  %v3699_v45 = vadd.f32 %v3698_v39, %v3697_v37  ;;  %4089 = vmatprep.mubr.f32.mxu0 %v1092_v41  ;;  %v4816_v36 = vpack.c.bf16 %v1083_v23, %v1082_v21  ;;  %v1084_v41 = vld [vmem:[%s6668_s3 + $0x40] sm:$0xff] }
 0x146   : > { %v3769_v46 = vpop.f32.mrb[37].mxu1  ;;  %v4820_v50 = vpack.c.bf16 %v1085_v38, %v1084_v41 }
 0x147   : > { %v3770_v47 = vadd.f32 %v3769_v46, %v3768_v40  ;;  %v1042_v51 = vmax.f32 %v5762_v43, 0.0  ;;  %v870_v52 = vadd.f32 %v3699_v45, %v5708_v54  ;;  %v3700_v55 = vpop.f32.mrb[38].mxu0  ;;  %v1081_v54 = vld [vmem:[%s6668_s3 + $0x28] sm:$0xff] }
 0x148   : > { %v3701_v60 = vpop.f32.mrb[39].mxu0  ;;  %v1093_v0 = vld [vmem:[#allocation2 + $0x9] sm:$0xff]  ;;  %v4812_v18 = vpack.c.bf16 %v1081_v54, %v1080_v1 }
 0x149   : > { %v3771_v61 = vpop.f32.mrb[38].mxu1  ;;  %1055 = vst [vmem:[#allocation2 + $0x20] sm:$0xff] %v1042_v51  ;;  %v5787_v3 = vadd.f32 %v3770_v47, %v870_v52  ;;  %v3702_v5 = vadd.f32 %v3701_v60, %v3700_v55  ;;  %4090 = vmatmul.mubr.f32.vlgmr.msra.gmra.mrb[52].mxu0 %v1093_v0 }
 0x14a   : > { %v3772_v6 = vpop.f32.mrb[39].mxu1  ;;  %4807 = vmatpush3.bf16.msra.mxu0 %v5684_v2 }
 0x14b   : > { %v3773_v9 = vadd.f32 %v3772_v6, %v3771_v61  ;;  %v1043_v12 = vmax.f32 %v5787_v3, 0.0  ;;  %v875_v15 = vadd.f32 %v3702_v5, %v5711_v62  ;;  %v3703_v16 = vpop.f32.mrb[40].mxu0  ;;  %4809 = vmatprep.subr.bf16.mxu0 %v4808_v56  ;;  %v4824_v6 = vpack.c.bf16 %v1087_v59, %v1086_v58  ;;  %v3340_v3 = vld [vmem:[%s6668_s3 + $0x168] sm:$0xff] }
 0x14c   : > { %v3704_v19 = vpop.f32.mrb[41].mxu0  ;;  %v1094_v2 = vld [vmem:[#allocation2 + $0x11] sm:$0xff] }
 0x14d   : > { %v3774_v20 = vpop.f32.mrb[40].mxu1  ;;  %1056 = vst [vmem:[#allocation2 + $0x28] sm:$0xff] %v1043_v12  ;;  %v5807_v25 = vadd.f32 %v3773_v9, %v875_v15  ;;  %v3705_v62 = vadd.f32 %v3704_v19, %v3703_v16  ;;  %4092 = vmatprep.mubr.f32.mxu0 %v1094_v2  ;;  %v1089_v15 = vld [vmem:[%s6668_s3 + $0x68] sm:$0xff] }
 0x14e   : > { %v3775_v27 = vpop.f32.mrb[41].mxu1  ;;  %4811 = vmatpush3.bf16.msra.mxu0 %v4808_v56  ;;  %v4828_v23 = vpack.c.bf16 %v1089_v15, %v1088_v11  ;;  %v3332_v11 = vld [vmem:[%s6668_s3 + $0x128] sm:$0xff] }
 0x14f   : > { %v3776_v29 = vadd.f32 %v3775_v27, %v3774_v20  ;;  %v1044_v31 = vmax.f32 %v5807_v25, 0.0  ;;  %v880_v32 = vadd.f32 %v3705_v62, %v5714_v8  ;;  %v3706_v33 = vpop.f32.mrb[42].mxu0  ;;  %4813 = vmatprep.subr.bf16.mxu0 %v4812_v18 }
 0x150   : > { %v3707_v37 = vpop.f32.mrb[43].mxu0  ;;  %v1095_v40 = vld [vmem:[#allocation2 + $0x19] sm:$0xff] }
 0x151   : > { %v3777_v39 = vpop.f32.mrb[42].mxu1  ;;  %1057 = vst [vmem:[#allocation2 + $0x30] sm:$0xff] %v1044_v31  ;;  %v5820_v42 = vadd.f32 %v3776_v29, %v880_v32  ;;  %v3708_v8 = vadd.f32 %v3707_v37, %v3706_v33  ;;  %4093 = vmatmul.mubr.f32.gmra.mrb[54].mxu0 %v1095_v40  ;;  %v1090_v29 = vld [vmem:[%s6668_s3 + $0x70] sm:$0xff]  ;;  %v1091_v32 = vld [vmem:[%s6668_s3 + $0x78] sm:$0xff] }
 0x152   : > { %v3778_v45 = vpop.f32.mrb[43].mxu1  ;;  %4815 = vmatpush3.bf16.msra.mxu0 %v4812_v18  ;;  %v4832_v38 = vpack.c.bf16 %v1091_v32, %v1090_v29  ;;  %v3349_v29 = vld [vmem:[%s6668_s3 + $0x1b0] sm:$0xff]  ;;  %v3350_v32 = vld [vmem:[%s6668_s3 + $0x1b8] sm:$0xff] }
 0x153   : > { %v3779_v46 = vadd.f32 %v3778_v45, %v3777_v39  ;;  %v1045_v47 = vmax.f32 %v5820_v42, 0.0  ;;  %v885_v48 = vadd.f32 %v3708_v8, %v5717_v17  ;;  %v3709_v49 = vpop.f32.mrb[44].mxu0  ;;  %4817 = vmatprep.subr.bf16.mxu0 %v4816_v36  ;;  %v3342_v42 = vld [vmem:[%s6668_s3 + $0x178] sm:$0xff] }
 0x154   : > { %v3710_v52 = vpop.f32.mrb[45].mxu0  ;;  %v1096_v56 = vld [vmem:[#allocation2 + $0x21] sm:$0xff] }
 0x155   : > { %v3780_v55 = vpop.f32.mrb[44].mxu1  ;;  %1058 = vst [vmem:[#allocation2 + $0x38] sm:$0xff] %v1045_v47  ;;  %v5833_v60 = vadd.f32 %v3779_v46, %v885_v48  ;;  %v3711_v17 = vadd.f32 %v3710_v52, %v3709_v49  ;;  %4095 = vmatprep.mubr.f32.mxu0 %v1096_v56  ;;  %v3327_v48 = vld [vmem:[%s6668_s3 + $0x100] sm:$0xff]  ;;  %v3328_v49 = vld [vmem:[%s6668_s3 + $0x108] sm:$0xff] }
 0x156   : > { %v3781_v61 = vpop.f32.mrb[45].mxu1  ;;  %4819 = vmatpush3.bf16.msra.mxu0 %v4816_v36  ;;  %v4836_v59 = vpack.c.bf16 %v3328_v49, %v3327_v48 }
 0x157   : > { %v3782_v0 = vadd.f32 %v3781_v61, %v3780_v55  ;;  %v1046_v1 = vmax.f32 %v5833_v60, 0.0  ;;  %v890_v54 = vadd.f32 %v3711_v17, %v5720_v26  ;;  %v3712_v5 = vpop.f32.mrb[46].mxu0  ;;  %4821 = vmatprep.subr.bf16.mxu0 %v4820_v50 }
 0x158   : > { %v3713_v7 = vpop.f32.mrb[47].mxu0  ;;  %v1097_v14 = vld [vmem:[#allocation2 + $0x29] sm:$0xff] }
 0x159   : > { %v3783_v9 = vpop.f32.mrb[46].mxu1  ;;  %1059 = vst [vmem:[#allocation2 + $0x40] sm:$0xff] %v1046_v1  ;;  %v5845_v16 = vadd.f32 %v3782_v0, %v890_v54  ;;  %v3714_v26 = vadd.f32 %v3713_v7, %v3712_v5  ;;  %4096 = vmatmul.mubr.f32.gmra.mrb[56].mxu0 %v1097_v14  ;;  %v3329_v7 = vld [vmem:[%s6668_s3 + $0x110] sm:$0xff]  ;;  %v3331_v14 = vld [vmem:[%s6668_s3 + $0x120] sm:$0xff] }
 0x15a   : > { %v3784_v18 = vpop.f32.mrb[47].mxu1  ;;  %4823 = vmatpush3.bf16.msra.mxu0 %v4820_v50  ;;  %v4844_v15 = vpack.c.bf16 %v3332_v11, %v3331_v14 }
 0x15b   : > { %v3785_v19 = vadd.f32 %v3784_v18, %v3783_v9  ;;  %v1047_v20 = vmax.f32 %v5845_v16, 0.0  ;;  %v895_v2 = vadd.f32 %v3714_v26, %v5723_v35  ;;  %v3715_v21 = vpop.f32.mrb[48].mxu0  ;;  %4825 = vmatprep.subr.bf16.mxu0 %v4824_v6  ;;  %v3344_v16 = vld [vmem:[%s6668_s3 + $0x188] sm:$0xff]  ;;  %v3345_v18 = vld [vmem:[%s6668_s3 + $0x190] sm:$0xff] }
 0x15c   : > { %v3716_v62 = vpop.f32.mrb[49].mxu0  ;;  %v1098_v28 = vld [vmem:[#allocation2 + $0x31] sm:$0xff] }
 0x15d   : > { %v3786_v27 = vpop.f32.mrb[48].mxu1  ;;  %1060 = vst [vmem:[#allocation2 + $0x48] sm:$0xff] %v1047_v20  ;;  %v5857_v33 = vadd.f32 %v3785_v19, %v895_v2  ;;  %v3717_v35 = vadd.f32 %v3716_v62, %v3715_v21  ;;  %4098 = vmatprep.mubr.f32.mxu0 %v1098_v28  ;;  %v3346_v19 = vld [vmem:[%s6668_s3 + $0x198] sm:$0xff]  ;;  %v3347_v21 = vld [vmem:[%s6668_s3 + $0x1a0] sm:$0xff] }
 0x15e   : > { %v3787_v36 = vpop.f32.mrb[49].mxu1  ;;  %4827 = vmatpush3.bf16.msra.mxu0 %v4824_v6  ;;  %v1372_v2 = vld [vmem:[#allocation2 + $0x12] sm:$0xff]  ;;  %v1373_v62 = vld [vmem:[#allocation2 + $0x1a] sm:$0xff]  ;;  %v1374_v28 = vld [vmem:[#allocation2 + $0x22] sm:$0xff] }
 0x15f   : > { %v3788_v37 = vadd.f32 %v3787_v36, %v3786_v27  ;;  %v1048_v39 = vmax.f32 %v5857_v33, 0.0  ;;  %v900_v40 = vadd.f32 %v3717_v35, %v5726_v44  ;;  %v3718_v41 = vpop.f32.mrb[50].mxu0  ;;  %4829 = vmatprep.subr.bf16.mxu0 %v4828_v23  ;;  %v1375_v33 = vld [vmem:[#allocation2 + $0x2a] sm:$0xff]  ;;  %v4880_v35 = vpack.c.bf16 %v3350_v32, %v3349_v29  ;;  %v1376_v36 = vld [vmem:[#allocation2 + $0x32] sm:$0xff] }
 0x160   : > { %v3719_v8 = vpop.f32.mrb[51].mxu0  ;;  %v1099_v46 = vld [vmem:[#allocation2 + $0x39] sm:$0xff] }
 0x161   : > { %v3789_v45 = vpop.f32.mrb[50].mxu1  ;;  %1061 = vst [vmem:[#allocation2 + $0x50] sm:$0xff] %v1048_v39  ;;  %v1030_v50 = vadd.f32 %v3788_v37, %v900_v40  ;;  %v3720_v52 = vadd.f32 %v3719_v8, %v3718_v41  ;;  %4099 = vmatmul.mubr.f32.gmra.mrb[58].mxu0 %v1099_v46  ;;  %v3351_v37 = vld [vmem:[%s6668_s3 + $0x1c0] sm:$0xff]  ;;  %v3353_v8 = vld [vmem:[%s6668_s3 + $0x1d0] sm:$0xff] }
 0x162   : > { %v3790_v44 = vpop.f32.mrb[51].mxu1  ;;  %4831 = vmatpush3.bf16.msra.mxu0 %v4828_v23  ;;  %v3348_v23 = vld [vmem:[%s6668_s3 + $0x1a8] sm:$0xff]  ;;  %v1377_v40 = vld [vmem:[#allocation2 + $0x3a] sm:$0xff] }
 0x163   : > { %v3791_v55 = vadd.f32 %v3790_v44, %v3789_v45  ;;  %v1049_v56 = vmax.f32 %v1030_v50, 0.0  ;;  %v905_v58 = vadd.f32 %v3720_v52, %v5729_v53  ;;  %4833 = vmatprep.subr.bf16.mxu0 %v4832_v38  ;;  %v3330_v53 = vld [vmem:[%s6668_s3 + $0x118] sm:$0xff]  ;;  %v4876_v27 = vpack.c.bf16 %v3348_v23, %v3347_v21  ;;  %v3355_v50 = vld [vmem:[%s6668_s3 + $0x1e0] sm:$0xff]  ;;  %v3356_v52 = vld [vmem:[%s6668_s3 + $0x1e8] sm:$0xff] }
 0x164   : > { %v1100_v17 = vld [vmem:[#allocation2 + $0x41] sm:$0xff]  ;;  %v4840_v9 = vpack.c.bf16 %v3330_v53, %v3329_v7  ;;  %v3354_v45 = vld [vmem:[%s6668_s3 + $0x1d8] sm:$0xff] }
 0x165   : > { %1062 = vst [vmem:[#allocation2 + $0x58] sm:$0xff] %v1049_v56  ;;  %v1035_v61 = vadd.f32 %v3791_v55, %v905_v58  ;;  %4101 = vmatprep.mubr.f32.mxu0 %v1100_v17  ;;  %v4888_v48 = vpack.c.bf16 %v3354_v45, %v3353_v8  ;;  %v4892_v55 = vpack.c.bf16 %v3356_v52, %v3355_v50  ;;  %v3357_v58 = vld [vmem:[%s6668_s3 + $0x1f0] sm:$0xff]  ;;  %v1543_v53 = vld [vmem:[#allocation2 + $0x3b] sm:$0xff] }
 0x166   : > { %4835 = vmatpush3.bf16.msra.mxu0 %v4832_v38  ;;  %v1378_v38 = vld [vmem:[#allocation2 + $0x42] sm:$0xff]  ;;  %v1537_v17 = vld [vmem:[#allocation2 + $0xb] sm:$0xff]  ;;  %v1542_v7 = vld [vmem:[#allocation2 + $0x33] sm:$0xff] }
 0x167   : > { %v1050_v0 = vmax.f32 %v1035_v61, 0.0  ;;  %4837 = vmatprep.subr.bf16.mxu0 %v4836_v59  ;;  %v1759_v45 = vld [vmem:[%s6670_s5 + $0x10] sm:$0xff]  ;;  %v3454_v52 = vld [vmem:[%s6670_s5 + $0x180] sm:$0xff] }
 0x168   : > { %v1101_v54 = vld [vmem:[#allocation2 + $0x49] sm:$0xff] }
 0x169   : > { %1063 = vst [vmem:[#allocation2 + $0x60] sm:$0xf] %v1050_v0  ;;  %4102 = vmatmul.mubr.f32.gmra.mrb[60].mxu0 %v1101_v54  ;;  %v1379_v46 = vld [vmem:[#allocation2 + $0x4a] sm:$0xff]  ;;  %v1538_v0 = vld [vmem:[#allocation2 + $0x13] sm:$0xff]  ;;  %v1539_v54 = vld [vmem:[#allocation2 + $0x1b] sm:$0xff] }
 0x16a   : > { %v1545_v14 = vld [vmem:[#allocation2 + $0x4b] sm:$0xff] }
 0x16c   : > { %v1102_v5 = vld [vmem:[#allocation2 + $0x51] sm:$0xff]  ;;  %v1103_v6 = vld [vmem:[#allocation2 + $0x59] sm:$0x1] }
 0x16d   : > { %4104 = vmatprep.mubr.f32.mxu0 %v1102_v5  ;;  %v1075_v25 = vld [vmem:[#allocation2 + $0x58] sm:$0x1]  ;;  %v1540_v5 = vld [vmem:[#allocation2 + $0x23] sm:$0xff] }
 0x16e   : > { %4105 = vmatmul.mubr.f32.gmra.mrb[62].mxu0 %v1103_v6  ;;  %v1380_v49 = vld [vmem:[#allocation2 + $0x52] sm:$0xff] }
 0x16f   : > { %4139 = vmatprep.mubr.f32.mxu0 %v1038_v4  ;;  %v3334_v4 = vld [vmem:[%s6668_s3 + $0x138] sm:$0xff]  ;;  %v1541_v6 = vld [vmem:[#allocation2 + $0x2b] sm:$0xff] }
 0x170   : > { %v4848_v10 = vpack.c.bf16 %v3334_v4, %v3333_v63  ;;  %v1381_v44 = vld [vmem:[#allocation2 + $0x5a] sm:$0xff]  ;;  %v1382_v56 = vld [vmem:[#allocation2 + $0x62] sm:$0x1]  ;;  %v1548_v63 = vld [vmem:[#allocation2 + $0x63] sm:$0x1] }
 0x171   : > { %v1546_v11 = vld [vmem:[#allocation2 + $0x53] sm:$0xff]  ;;  %v3420_v4 = vld [vmem:[%s6670_s5 + $0x100] sm:$0xff] }
 0x172   : > { %4140 = vmatmul.mubr.f32.vlgmr.msra.gmra.mrb[52].mxu0 %v1039_v13  ;;  %v3335_v13 = vld [vmem:[%s6668_s3 + $0x140] sm:$0xff] }
 0x173   : > { %4839 = vmatpush3.bf16.msra.mxu0 %v4836_v59  ;;  %4142 = vmatprep.mubr.f32.mxu0 %v1040_v24  ;;  %v4852_v24 = vpack.c.bf16 %v3336_v22, %v3335_v13  ;;  %v3358_v59 = vld [vmem:[%s6668_s3 + $0x1f8] sm:$0xff]  ;;  %v3422_v22 = vld [vmem:[%s6670_s5 + $0x110] sm:$0xff] }
 0x174   : > { %4841 = vmatprep.subr.bf16.mxu0 %v4840_v9  ;;  %v4896_v61 = vpack.c.bf16 %v3358_v59, %v3357_v58 }
 0x176   : > { %4143 = vmatmul.mubr.f32.gmra.mrb[54].mxu0 %v1041_v34  ;;  %v3338_v34 = vld [vmem:[%s6668_s3 + $0x158] sm:$0xff] }
 0x177   : > { %4843 = vmatpush3.bf16.msra.mxu0 %v4840_v9  ;;  %4145 = vmatprep.mubr.f32.mxu0 %v1042_v51  ;;  %v4856_v43 = vpack.c.bf16 %v3338_v34, %v3337_v30  ;;  %v3339_v51 = vld [vmem:[%s6668_s3 + $0x160] sm:$0xff]  ;;  %v3366_v34 = vld [vmem:[%s6670_s5 + $0x70] sm:$0xff] }
 0x178   : > { %4845 = vmatprep.subr.bf16.mxu0 %v4844_v15  ;;  %v1544_v9 = vld [vmem:[#allocation2 + $0x43] sm:$0xff] }
 0x17a   : > { %4146 = vmatmul.mubr.f32.gmra.mrb[56].mxu0 %v1043_v12  ;;  %v4860_v12 = vpack.c.bf16 %v3340_v3, %v3339_v51  ;;  %v3424_v3 = vld [vmem:[%s6670_s5 + $0x120] sm:$0xff] }
 0x17b   : > { %4847 = vmatpush3.bf16.msra.mxu0 %v4844_v15  ;;  %4148 = vmatprep.mubr.f32.mxu0 %v1044_v31  ;;  %v3341_v31 = vld [vmem:[%s6668_s3 + $0x170] sm:$0xff]  ;;  %v1547_v15 = vld [vmem:[#allocation2 + $0x5b] sm:$0xff] }
 0x17c   : > { %4849 = vmatprep.subr.bf16.mxu0 %v4848_v10  ;;  %v4864_v60 = vpack.c.bf16 %v3342_v42, %v3341_v31  ;;  %v3426_v31 = vld [vmem:[%s6670_s5 + $0x130] sm:$0xff]  ;;  %v3427_v42 = vld [vmem:[%s6670_s5 + $0x138] sm:$0xff] }
 0x17e   : > { %4149 = vmatmul.mubr.f32.gmra.mrb[58].mxu0 %v1045_v47  ;;  %v1371_v47 = vld [vmem:[#allocation2 + $0xa] sm:$0xff] }
 0x17f   : > { %4851 = vmatpush3.bf16.msra.mxu0 %v4848_v10  ;;  %4151 = vmatprep.mubr.f32.mxu0 %v1046_v1  ;;  %v3343_v1 = vld [vmem:[%s6668_s3 + $0x180] sm:$0xff]  ;;  %v3421_v10 = vld [vmem:[%s6670_s5 + $0x108] sm:$0xff] }
 0x180   : > { %4853 = vmatprep.subr.bf16.mxu0 %v4852_v24  ;;  %v4868_v26 = vpack.c.bf16 %v3344_v16, %v3343_v1  ;;  %v4949_v13 = vpack.c.bf16 %v3421_v10, %v3420_v4  ;;  %v6025_v1 = vld [vmem:[%s6669_s4] ss:$0 sm:$0xff] }
 0x182   : > { %4152 = vmatmul.mubr.f32.gmra.mrb[60].mxu0 %v1047_v20  ;;  %v4872_v20 = vpack.c.bf16 %v3346_v19, %v3345_v18 }
 0x183   : > { %4855 = vmatpush3.bf16.msra.mxu0 %v4852_v24  ;;  %4154 = vmatprep.mubr.f32.mxu0 %v1048_v39  ;;  %v3352_v39 = vld [vmem:[%s6668_s3 + $0x1c8] sm:$0xff]  ;;  %v3423_v24 = vld [vmem:[%s6670_s5 + $0x118] sm:$0xff] }
 0x184   : > { %4857 = vmatprep.subr.bf16.mxu0 %v4856_v43  ;;  %v4884_v41 = vpack.c.bf16 %v3352_v39, %v3351_v37  ;;  %v4952_v30 = vpack.c.bf16 %v3423_v24, %v3422_v22  ;;  %v1764_v22 = vld [vmem:[%s6670_s5 + $0x38] sm:$0xff] }
 0x186   : > { %4155 = vmatmul.mubr.f32.gmra.mrb[62].mxu0 %v1075_v25 }
 0x187   : > { %4859 = vmatpush3.bf16.msra.mxu0 %v4856_v43  ;;  %4189 = vmatprep.mubr.f32.mxu0 %v1371_v47  ;;  %v3367_v43 = vld [vmem:[%s6670_s5 + $0x78] sm:$0xff]  ;;  %v5075_v47 = vmov 0.0  }
 0x188   : > { %4861 = vmatprep.subr.bf16.mxu0 %v4860_v12  ;;  %v4910_v51 = vpack.c.bf16 %v3367_v43, %v3366_v34  ;;  %4273 = vmatprep.mubr.msk.f32.mxu1 %vm5074_vm0, %v5075_v47 }
 0x18a   : > { %4911 = vmatpush3.bf16.msra.mxu1 %v4910_v51 }
 0x18b   : > { %4863 = vmatpush3.bf16.msra.mxu0 %v4860_v12  ;;  %v3425_v12 = vld [vmem:[%s6670_s5 + $0x128] sm:$0xff]  ;;  %4912 = vmatprep.subr.bf16.mxu1 %v5073_v57 }
 0x18c   : > { %4865 = vmatprep.subr.bf16.mxu0 %v4864_v60  ;;  %v4955_v25 = vpack.c.bf16 %v3425_v12, %v3424_v3  ;;  %v3459_v12 = vld [vmem:[%s6670_s5 + $0x1a8] sm:$0xff] }
 0x18f   : > { %4867 = vmatpush3.bf16.msra.mxu0 %v4864_v60  ;;  %v4958_v60 = vpack.c.bf16 %v3427_v42, %v3426_v31 }
 0x190   : > { %4869 = vmatprep.subr.bf16.mxu0 %v4868_v26 }
 0x192   : > { %4190 = vmatmul.mubr.f32.vlgmr.msra.gmra.mrb[52].mxu0 %v1372_v2 }
 0x193   : > { %4192 = vmatprep.mubr.f32.mxu0 %v1373_v62  ;;  %4871 = vmatpush3.bf16.msra.mxu0 %v4868_v26 }
 0x194   : > { %4873 = vmatprep.subr.bf16.mxu0 %v4872_v20 }
 0x196   : > { %4193 = vmatmul.mubr.f32.gmra.mrb[54].mxu0 %v1374_v28 }
 0x197   : > { %4195 = vmatprep.mubr.f32.mxu0 %v1375_v33  ;;  %4875 = vmatpush3.bf16.msra.mxu0 %v4872_v20  ;;  %v1757_v33 = vld [vmem:[%s6670_s5] sm:$0xff] }
 0x198   : > { %4877 = vmatprep.subr.bf16.mxu0 %v4876_v27 }
 0x19a   : > { %4196 = vmatmul.mubr.f32.gmra.mrb[56].mxu0 %v1376_v36 }
 0x19b   : > { %4198 = vmatprep.mubr.f32.mxu0 %v1377_v40  ;;  %4879 = vmatpush3.bf16.msra.mxu0 %v4876_v27 }
 0x19c   : > { %4881 = vmatprep.subr.bf16.mxu0 %v4880_v35 }
 0x19e   : > { %4199 = vmatmul.mubr.f32.gmra.mrb[58].mxu0 %v1378_v38 }
 0x19f   : > { %4201 = vmatprep.mubr.f32.mxu0 %v1379_v46  ;;  %4883 = vmatpush3.bf16.msra.mxu0 %v4880_v35  ;;  %v1758_v35 = vld [vmem:[%s6670_s5 + $0x8] sm:$0xff]  ;;  %v1760_v46 = vld [vmem:[%s6670_s5 + $0x18] sm:$0xff] }
 0x1a0   : > { %4885 = vmatprep.subr.bf16.mxu0 %v4884_v41 }
 0x1a2   : > { %4202 = vmatmul.mubr.f32.gmra.mrb[60].mxu0 %v1380_v49 }
 0x1a3   : > { %4204 = vmatprep.mubr.f32.mxu0 %v1381_v44  ;;  %4887 = vmatpush3.bf16.msra.mxu0 %v4884_v41  ;;  %v4913_v41 = vpack.c.bf16 %v1758_v35, %v1757_v33  ;;  %v3455_v44 = vld [vmem:[%s6670_s5 + $0x188] sm:$0xff]  ;;  %v3386_v33 = vld [vmem:[%s6670_s5 + $0x80] sm:$0xff] }
 0x1a4   : > { %4889 = vmatprep.subr.bf16.mxu0 %v4888_v48  ;;  %v3387_v35 = vld [vmem:[%s6670_s5 + $0x88] sm:$0xff] }
 0x1a6   : > { %4205 = vmatmul.mubr.f32.gmra.mrb[62].mxu0 %v1382_v56 }
 0x1a7   : > { %4891 = vmatpush3.bf16.msra.mxu0 %v4888_v48  ;;  %4239 = vmatprep.mubr.f32.mxu0 %v1537_v17  ;;  %v4916_v17 = vpack.c.bf16 %v1760_v46, %v1759_v45  ;;  %v3489_v46 = vld [vmem:[%s6670_s5 + $0x208] sm:$0xff] }
 0x1a8   : > { %4893 = vmatprep.subr.bf16.mxu0 %v4892_v55 }
 0x1ab   : > { %4895 = vmatpush3.bf16.msra.mxu0 %v4892_v55 }
 0x1ac   : > { %4897 = vmatprep.subr.bf16.mxu0 %v4896_v61 }
 0x1af   : > { %4899 = vmatpush3.bf16.msra.mxu0 %v4896_v61  ;;  %v1761_v61 = vld [vmem:[%s6670_s5 + $0x20] sm:$0xff] }
 0x1b0   : > { %4948 = vmatprep.subr.bf16.mxu0 %v5073_v57 }
 0x1b2   : > { %4240 = vmatmul.mubr.f32.vlgmr.msra.gmra.mrb[52].mxu0 %v1538_v0  ;;  %v1762_v0 = vld [vmem:[%s6670_s5 + $0x28] sm:$0xff] }
 0x1b3   : > { %4242 = vmatprep.mubr.f32.mxu0 %v1539_v54  ;;  %4950 = vmatpush3.bf16.msra.mxu0 %v4949_v13  ;;  %v4973_v54 = vpack.c.bf16 %v3455_v44, %v3454_v52  ;;  %v4919_v10 = vpack.c.bf16 %v1762_v0, %v1761_v61  ;;  %v1763_v13 = vld [vmem:[%s6670_s5 + $0x30] sm:$0xff]  ;;  %v3393_v61 = vld [vmem:[%s6670_s5 + $0xb8] sm:$0xff] }
 0x1b4   : > { %4951 = vmatprep.subr.bf16.mxu0 %v5073_v57  ;;  %v3490_v44 = vld [vmem:[%s6670_s5 + $0x210] sm:$0xff] }
 0x1b6   : > { %4243 = vmatmul.mubr.f32.gmra.mrb[54].mxu0 %v1540_v5  ;;  %v3456_v5 = vld [vmem:[%s6670_s5 + $0x190] sm:$0xff] }
 0x1b7   : > { %4245 = vmatprep.mubr.f32.mxu0 %v1541_v6  ;;  %4953 = vmatpush3.bf16.msra.mxu0 %v4952_v30  ;;  %v3458_v30 = vld [vmem:[%s6670_s5 + $0x1a0] sm:$0xff] }
 0x1b8   : > { %4954 = vmatprep.subr.bf16.mxu0 %v5073_v57 }
 0x1ba   : > { %4246 = vmatmul.mubr.f32.gmra.mrb[56].mxu0 %v1542_v7 }
 0x1bb   : > { %4248 = vmatprep.mubr.f32.mxu0 %v1543_v53  ;;  %4956 = vmatpush3.bf16.msra.mxu0 %v4955_v25 }
 0x1bc   : > { %4957 = vmatprep.subr.bf16.mxu0 %v5073_v57 }
 0x1be   : > { %4249 = vmatmul.mubr.f32.gmra.mrb[58].mxu0 %v1544_v9 }
 0x1bf   : > { %4251 = vmatprep.mubr.f32.mxu0 %v1545_v14  ;;  %4959 = vmatpush3.bf16.msra.mxu0 %v4958_v60  ;;  %v3457_v14 = vld [vmem:[%s6670_s5 + $0x198] sm:$0xff]  ;;  %v4922_v60 = vpack.c.bf16 %v1764_v22, %v1763_v13 }
 0x1c0   : > { %4972 = vmatprep.subr.bf16.mxu0 %v5073_v57  ;;  %v4976_v24 = vpack.c.bf16 %v3457_v14, %v3456_v5  ;;  %v3494_v14 = vld [vmem:[%s6670_s5 + $0x230] sm:$0xff] }
 0x1c2   : > { %4252 = vmatmul.mubr.f32.gmra.mrb[60].mxu0 %v1546_v11 }
 0x1c3   : > { %4254 = vmatprep.mubr.f32.mxu0 %v1547_v15 }
 0x1c6   : > { %4255 = vmatmul.mubr.f32.gmra.mrb[62].mxu0 %v1548_v63 }
 0x1c7   : > { %4445 = vmatprep.mubr.msk.f32.mxu0 %vm5074_vm0, %v5075_v47 }
 0x285   : > { %v4241_v16 = vpop.f32.mrb[52].mxu0 }
 0x286   : > { %v1711_v26 = vadd.f32 %v4241_v16, %v6025_v1  ;;  %v1632_v18 = vpop.f32.mrb[53].mxu0  ;;  %v4979_v16 = vpack.c.bf16 %v3459_v12, %v3458_v30  ;;  %v3404_v12 = vld [vmem:[%s6670_s5 + $0xc8] sm:$0xff] }
 0x287   : > { %v1710_v19 = vadd.f32 %v6025_v1, %v1632_v18 }
 0x288   : > { %v1723_v20 = vmax.f32 %v1711_v26, 0.0 }
 0x289   : > { %v1722_v2 = vmax.f32 %v1710_v19, 0.0  ;;  %v4244_v21 = vpop.f32.mrb[54].mxu0  ;;  %v3461_v19 = vld [vmem:[%s6670_s5 + $0x1b8] sm:$0xff] }
 0x28a   : > { %1736 = vst.msk [vmem:[#allocation3 + $0x8] sm:$0xff] %vm1734_vm1, %v1723_v20  ;;  %v1713_v23 = vadd.f32 %v4244_v21, %v6025_v1  ;;  %v1642_v62 = vpop.f32.mrb[55].mxu0 }
 0x28b   : > { %1735 = vst.msk [vmem:[#allocation3] sm:$0xff] %vm1734_vm1, %v1722_v2  ;;  %v1712_v27 = vadd.f32 %v6025_v1, %v1642_v62 }
 0x28c   : > { %v1725_v28 = vmax.f32 %v1713_v23, 0.0 }
 0x28d   : > { %v1724_v29 = vmax.f32 %v1712_v27, 0.0  ;;  %v4247_v32 = vpop.f32.mrb[56].mxu0 }
 0x28e   : > { %1738 = vst.msk [vmem:[#allocation3 + $0x18] sm:$0xff] %vm1734_vm1, %v1725_v28  ;;  %v1715_v36 = vadd.f32 %v4247_v32, %v6025_v1  ;;  %v1652_v37 = vpop.f32.mrb[57].mxu0 }
 0x28f   : > { %1737 = vst.msk [vmem:[#allocation3 + $0x10] sm:$0xff] %vm1734_vm1, %v1724_v29  ;;  %v1714_v39 = vadd.f32 %v6025_v1, %v1652_v37 }
 0x290   : > { %v1727_v40 = vmax.f32 %v1715_v36, 0.0 }
 0x291   : > { %v1726_v38 = vmax.f32 %v1714_v39, 0.0  ;;  %v4250_v8 = vpop.f32.mrb[58].mxu0  ;;  %v4925_v39 = vpack.c.bf16 %v3387_v35, %v3386_v33 }
 0x292   : > { %1740 = vst.msk [vmem:[#allocation3 + $0x28] sm:$0xff] %vm1734_vm1, %v1727_v40  ;;  %v1717_v48 = vadd.f32 %v4250_v8, %v6025_v1  ;;  %v1662_v49 = vpop.f32.mrb[59].mxu0  ;;  %v1765_v50 = vld [vmem:[#allocation3 + $0x1] sm:$0xff] }
 0x293   : > { %1739 = vst.msk [vmem:[#allocation3 + $0x20] sm:$0xff] %vm1734_vm1, %v1726_v38  ;;  %v1716_v55 = vadd.f32 %v6025_v1, %v1662_v49  ;;  %4274 = vmatmul.mubr.msk.f32.vlgmr.msra.gmra.mrb[52].mxu1 %vm1734_vm1, %v1765_v50  ;;  %v3388_v40 = vld [vmem:[%s6670_s5 + $0x90] sm:$0xff]  ;;  %v3488_v38 = vld [vmem:[%s6670_s5 + $0x200] sm:$0xff]  ;;  %v1748_v8 = vld [vmem:[#allocation3] sm:$0xff] }
 0x294   : > { %v1729_v56 = vmax.f32 %v1717_v48, 0.0  ;;  %4914 = vmatpush3.bf16.msra.mxu1 %v4913_v41  ;;  %4276 = vmatprep.mubr.msk.f32.mxu1 %vm5074_vm0, %v5075_v47  ;;  %v3389_v41 = vld [vmem:[%s6670_s5 + $0x98] sm:$0xff]  ;;  %v3390_v49 = vld [vmem:[%s6670_s5 + $0xa0] sm:$0xff]  ;;  %v3391_v50 = vld [vmem:[%s6670_s5 + $0xa8] sm:$0xff]  ;;  %v6189_v52 = vpack.c.bf16 %v3489_v46, %v3488_v38 }
 0x295   : > { %v1728_v58 = vmax.f32 %v1716_v55, 0.0  ;;  %v4253_v59 = vpop.f32.mrb[60].mxu0  ;;  %4915 = vmatprep.subr.bf16.mxu1 %v5073_v57  ;;  %v4928_v48 = vpack.c.bf16 %v3389_v41, %v3388_v40  ;;  %v1749_v55 = vld [vmem:[#allocation3 + $0x8] sm:$0xff]  ;;  %v3437_v46 = vld [vmem:[%s6670_s5 + $0x140] sm:$0xff] }
 0x296   : > { %1742 = vst.msk [vmem:[#allocation3 + $0x38] sm:$0xff] %vm1734_vm1, %v1729_v56  ;;  %v1719_v6 = vadd.f32 %v4253_v59, %v6025_v1  ;;  %v1672_v7 = vpop.f32.mrb[61].mxu0  ;;  %v1766_v53 = vld [vmem:[#allocation3 + $0x9] sm:$0xff]  ;;  %v1767_v51 = vld [vmem:[#allocation3 + $0x11] sm:$0xff]  ;;  %v4931_v59 = vpack.c.bf16 %v3391_v50, %v3390_v49 }
 0x297   : > { %v2385_v9 = vld [vmem:[#allocation3 + $0xb] sm:$0xff]  ;;  %1741 = vst.msk [vmem:[#allocation3 + $0x30] sm:$0xff] %vm1734_vm1, %v1728_v58  ;;  %v1718_v11 = vadd.f32 %v6025_v1, %v1672_v7  ;;  %4277 = vmatmul.mubr.msk.f32.gmra.mrb[54].mxu1 %vm1734_vm1, %v1766_v53  ;;  %v2386_v3 = vld [vmem:[#allocation3 + $0x13] sm:$0xff]  ;;  %v3493_v7 = vld [vmem:[%s6670_s5 + $0x228] sm:$0xff] }
 0x298   : > { %4446 = vmatmul.mubr.msk.f32.vlgmr.msra.gmra.mrb[64].mxu0 %vm1734_vm1, %v2385_v9  ;;  %v1731_v15 = vmax.f32 %v1719_v6, 0.0  ;;  %4279 = vmatprep.mubr.msk.f32.mxu1 %vm5074_vm0, %v5075_v47  ;;  %v6194_v56 = vld [vmem:[#allocation3 + $0x14] sm:$0xff] }
 0x299   : > { %4448 = vmatprep.mubr.msk.f32.mxu0 %vm5074_vm0, %v5075_v47  ;;  %v1730_v63 = vmax.f32 %v1718_v11, 0.0  ;;  %v4256_v4 = vpop.f32.mrb[62].mxu0  ;;  %4917 = vmatpush3.bf16.msra.mxu1 %v4916_v17  ;;  %v3491_v58 = vld [vmem:[%s6670_s5 + $0x218] sm:$0xff]  ;;  %v3392_v17 = vld [vmem:[%s6670_s5 + $0xb0] sm:$0xff]  ;;  %v1751_v11 = vld [vmem:[#allocation3 + $0x18] sm:$0xff] }
 0x29a   : > { %4974 = vmatpush3.bf16.msra.mxu0 %v4973_v54  ;;  %1744 = vst.msk [vmem:[#allocation3 + $0x48] sm:$0xff] %vm1734_vm1, %v1731_v15  ;;  %v1721_v34 = vadd.f32 %v4256_v4, %v6025_v1  ;;  %v1682_v43 = vpop.f32.mrb[63].mxu0  ;;  %4918 = vmatprep.subr.bf16.mxu1 %v5073_v57  ;;  %v1768_v26 = vld [vmem:[#allocation3 + $0x19] sm:$0xff]  ;;  %v1769_v2 = vld [vmem:[#allocation3 + $0x21] sm:$0xff]  ;;  %v6213_v0 = vpack.c.bf16 %v3491_v58, %v3490_v44  ;;  %v1750_v5 = vld [vmem:[#allocation3 + $0x10] sm:$0xff] }
 0x29b   : > { %4975 = vmatprep.subr.bf16.mxu0 %v5073_v57  ;;  %1743 = vst.msk [vmem:[#allocation3 + $0x40] sm:$0xff] %vm1734_vm1, %v1730_v63  ;;  %v1720_v25 = vadd.f32 %v6025_v1, %v1682_v43  ;;  %4280 = vmatmul.mubr.msk.f32.gmra.mrb[56].mxu1 %vm1734_vm1, %v1767_v51  ;;  %v3460_v1 = vld [vmem:[%s6670_s5 + $0x1b0] sm:$0xff]  ;;  %v2387_v18 = vld [vmem:[#allocation3 + $0x1b] sm:$0xff]  ;;  %v4934_v53 = vpack.c.bf16 %v3393_v61, %v3392_v17  ;;  %v3495_v63 = vld [vmem:[%s6670_s5 + $0x238] sm:$0xff] }
 0x29c   : > { %4449 = vmatmul.mubr.msk.f32.gmra.mrb[66].mxu0 %vm1734_vm1, %v2386_v3  ;;  %v1733_v31 = vmax.f32 %v1721_v34, 0.0  ;;  %4282 = vmatprep.mubr.msk.f32.mxu1 %vm5074_vm0, %v5075_v47  ;;  %v4982_v20 = vpack.c.bf16 %v3461_v19, %v3460_v1  ;;  %v2388_v21 = vld [vmem:[#allocation3 + $0x23] sm:$0xff]  ;;  %v3492_v54 = vld [vmem:[%s6670_s5 + $0x220] sm:$0xff]  ;;  %v6253_v4 = vpack.c.bf16 %v3495_v63, %v3494_v14  ;;  %v3440_v58 = vld [vmem:[%s6670_s5 + $0x158] sm:$0xff] }
 0x29d   : > { %4451 = vmatprep.mubr.msk.f32.mxu0 %vm5074_vm0, %v5075_v47  ;;  %v1732_v42 = vmax.f32 %v1720_v25, 0.0  ;;  %4920 = vmatpush3.bf16.msra.mxu1 %v4919_v10  ;;  %v6218_v6 = vld [vmem:[#allocation3 + $0x1c] sm:$0xff]  ;;  %v6233_v9 = vpack.c.bf16 %v3493_v7, %v3492_v54  ;;  %v6238_v15 = vld [vmem:[#allocation3 + $0x24] sm:$0xff]  ;;  %v3444_v7 = vld [vmem:[%s6670_s5 + $0x178] sm:$0xff] }
 0x29e   : > { %4977 = vmatpush3.bf16.msra.mxu0 %v4976_v24  ;;  %1747 = vst.msk [vmem:[#allocation3 + $0x58] sm:$0x1] %vm1746_vm2, %v1733_v31  ;;  %4921 = vmatprep.subr.bf16.mxu1 %v5073_v57  ;;  %v1770_v23 = vld [vmem:[#allocation3 + $0x29] sm:$0xff]  ;;  %v1771_v27 = vld [vmem:[#allocation3 + $0x31] sm:$0xff]  ;;  %v1752_v10 = vld [vmem:[#allocation3 + $0x20] sm:$0xff] }
 0x29f   : > { %4978 = vmatprep.subr.bf16.mxu0 %v5073_v57  ;;  %1745 = vst.msk [vmem:[#allocation3 + $0x50] sm:$0xff] %vm1734_vm1, %v1732_v42  ;;  %4283 = vmatmul.mubr.msk.f32.gmra.mrb[58].mxu1 %vm1734_vm1, %v1768_v26  ;;  %v2389_v62 = vld [vmem:[#allocation3 + $0x2b] sm:$0xff]  ;;  %v2390_v28 = vld [vmem:[#allocation3 + $0x33] sm:$0xff]  ;;  %v3442_v61 = vld [vmem:[%s6670_s5 + $0x168] sm:$0xff] }
 0x2a0   : > { %4452 = vmatmul.mubr.msk.f32.gmra.mrb[68].mxu0 %vm1734_vm1, %v2387_v18  ;;  %4285 = vmatprep.mubr.msk.f32.mxu1 %vm5074_vm0, %v5075_v47  ;;  %v6255_v13 = vld [vmem:[#allocation3 + $0x2c] sm:$0xff]  ;;  %v6267_v24 = vld [vmem:[#allocation3 + $0x34] sm:$0xff]  ;;  %v3472_v63 = vld [vmem:[%s6670_s5 + $0x1c8] sm:$0xff] }
 0x2a1   : > { %4454 = vmatprep.mubr.msk.f32.mxu0 %vm5074_vm0, %v5075_v47  ;;  %4923 = vmatpush3.bf16.msra.mxu1 %v4922_v60  ;;  %v2393_v45 = vld [vmem:[#allocation3 + $0x4b] sm:$0x7]  ;;  %v1754_v30 = vld [vmem:[#allocation3 + $0x30] sm:$0xff]  ;;  %v1755_v43 = vld [vmem:[#allocation3 + $0x38] sm:$0xff] }
 0x2a2   : > { %4980 = vmatpush3.bf16.msra.mxu0 %v4979_v16  ;;  %4924 = vmatprep.subr.bf16.mxu1 %v5073_v57  ;;  %v1772_v29 = vld [vmem:[#allocation3 + $0x39] sm:$0xff]  ;;  %v1773_v36 = vld [vmem:[#allocation3 + $0x41] sm:$0x7]  ;;  %v1753_v22 = vld [vmem:[#allocation3 + $0x28] sm:$0xff] }
 0x2a3   : > { %4981 = vmatprep.subr.bf16.mxu0 %v5073_v57  ;;  %4286 = vmatmul.mubr.msk.f32.gmra.mrb[60].mxu1 %vm1734_vm1, %v1769_v2  ;;  %v2391_v32 = vld [vmem:[#allocation3 + $0x3b] sm:$0xff]  ;;  %v2392_v37 = vld [vmem:[#allocation3 + $0x43] sm:$0xff]  ;;  %v3406_v26 = vld [vmem:[%s6670_s5 + $0xd8] sm:$0xff] }
 0x2a4   : > { %4455 = vmatmul.mubr.msk.f32.gmra.mrb[70].mxu0 %vm1734_vm1, %v2388_v21  ;;  %4288 = vmatprep.mubr.msk.f32.mxu1 %vm5074_vm0, %v5075_v47  ;;  %v6276_v34 = vld [vmem:[#allocation3 + $0x3c] sm:$0xff]  ;;  %v6285_v51 = vld [vmem:[#allocation3 + $0x44] sm:$0xff]  ;;  %v2063_v41 = vld [vmem:[#allocation3 + $0x32] sm:$0xff] }
 0x2a5   : > { %4457 = vmatprep.mubr.msk.f32.mxu0 %vm5074_vm0, %v5075_v47  ;;  %v3403_v3 = vld [vmem:[%s6670_s5 + $0xc0] sm:$0xff]  ;;  %v1756_v25 = vld [vmem:[#allocation3 + $0x40] sm:$0x7]  ;;  %v3405_v60 = vld [vmem:[%s6670_s5 + $0xd0] sm:$0xff] }
 0x2a6   : > { %4983 = vmatpush3.bf16.msra.mxu0 %v4982_v20  ;;  %v2720_v31 = vld [vmem:[#allocation3 + $0x4c] sm:$0xff]  ;;  %v4937_v42 = vpack.c.bf16 %v3404_v12, %v3403_v3  ;;  %v2057_v16 = vld [vmem:[#allocation3 + $0x2] sm:$0xff]  ;;  %v2721_v1 = vld [vmem:[#allocation3 + $0x54] sm:$0x7]  ;;  %v4940_v18 = vpack.c.bf16 %v3406_v26, %v3405_v60 }
 0x2a7   : > { %4996 = vmatprep.subr.bf16.mxu0 %v5073_v57  ;;  %4289 = vmatmul.mubr.msk.f32.gmra.mrb[62].mxu1 %vm1734_vm1, %v1770_v23  ;;  %v3407_v19 = vld [vmem:[%s6670_s5 + $0xe0] sm:$0xff]  ;;  %v6322_v20 = vld [vmem:[#allocation3 + $0xa] sm:$0xff]  ;;  %v3408_v21 = vld [vmem:[%s6670_s5 + $0xe8] sm:$0xff] }
 0x2a8   : > { %4458 = vmatmul.mubr.msk.f32.gmra.mrb[72].mxu0 %vm1734_vm1, %v2389_v62  ;;  %4291 = vmatprep.mubr.msk.f32.mxu1 %vm5074_vm0, %v5075_v47  ;;  %v3041_v2 = vld [vmem:[#allocation3 + $0x16] sm:$0xff]  ;;  %v4943_v23 = vpack.c.bf16 %v3408_v21, %v3407_v19  ;;  %v3409_v62 = vld [vmem:[%s6670_s5 + $0xf0] sm:$0xff]  ;;  %v3046_v38 = vld [vmem:[#allocation3 + $0x3e] sm:$0xff] }
 0x2a9   : > { %4460 = vmatprep.mubr.msk.f32.mxu0 %vm5074_vm0, %v5075_v47  ;;  %v2060_v33 = vld [vmem:[#allocation3 + $0x1a] sm:$0xff]  ;;  %v3043_v35 = vld [vmem:[#allocation3 + $0x26] sm:$0xff]  ;;  %v2065_v49 = vld [vmem:[#allocation3 + $0x42] sm:$0x7] }
 0x2aa   : > { %v3045_v40 = vld [vmem:[#allocation3 + $0x36] sm:$0xff]  ;;  %v3048_v50 = vld [vmem:[#allocation3 + $0x4e] sm:$0xff]  ;;  %v2228_v14 = vld [vmem:[#allocation3 + $0x42] sm:$0xff] }
 0x2ab   : > { %4292 = vmatmul.mubr.msk.f32.gmra.mrb[64].mxu1 %vm1734_vm1, %v1771_v27  ;;  %v2059_v27 = vld [vmem:[#allocation3 + $0x12] sm:$0xff]  ;;  %v3477_v60 = vld [vmem:[%s6670_s5 + $0x1f0] sm:$0xff] }
 0x2ac   : > { %4461 = vmatmul.mubr.msk.f32.gmra.mrb[74].mxu0 %vm1734_vm1, %v2390_v28  ;;  %4294 = vmatprep.mubr.msk.f32.mxu1 %vm5074_vm0, %v5075_v47  ;;  %v3042_v28 = vld [vmem:[#allocation3 + $0x1e] sm:$0xff]  ;;  %v2549_v3 = vld [vmem:[#allocation3 + $0xc] sm:$0xff]  ;;  %v3049_v19 = vld [vmem:[#allocation3 + $0x56] sm:$0x7] }
 0x2ad   : > { %4463 = vmatprep.mubr.msk.f32.mxu0 %vm5074_vm0, %v5075_v47  ;;  %v3441_v17 = vld [vmem:[%s6670_s5 + $0x160] sm:$0xff] }
 0x2ae   : > { %v4967_v54 = vpack.c.bf16 %v3442_v61, %v3441_v17 }
 0x2af   : > { %4295 = vmatmul.mubr.msk.f32.gmra.mrb[66].mxu1 %vm1734_vm1, %v1772_v29  ;;  %v3410_v29 = vld [vmem:[%s6670_s5 + $0xf8] sm:$0xff] }
 0x2b0   : > { %4464 = vmatmul.mubr.msk.f32.gmra.mrb[76].mxu0 %vm1734_vm1, %v2391_v32  ;;  %4297 = vmatprep.mubr.msk.f32.mxu1 %vm5074_vm0, %v5075_v47  ;;  %v4946_v32 = vpack.c.bf16 %v3410_v29, %v3409_v62 }
 0x2b1   : > { %4466 = vmatprep.mubr.msk.f32.mxu0 %vm5074_vm0, %v5075_v47 }
 0x2b3   : > { %4298 = vmatmul.mubr.msk.f32.gmra.mrb[68].mxu1 %vm1734_vm1, %v1773_v36  ;;  %v2061_v36 = vld [vmem:[#allocation3 + $0x22] sm:$0xff] }
 0x2b4   : > { %4467 = vmatmul.mubr.msk.f32.gmra.mrb[78].mxu0 %vm1734_vm1, %v2392_v37  ;;  %4316 = vmatprep.mubr.msk.f32.mxu1 %vm5074_vm0, %v5075_v47  ;;  %v3044_v37 = vld [vmem:[#allocation3 + $0x2e] sm:$0xff] }
 0x2b5   : > { %4469 = vmatprep.mubr.msk.f32.mxu0 %vm5074_vm0, %v5075_v47 }
 0x2b7   : > { %4317 = vmatmul.mubr.msk.f32.vlgmr.msra.gmra.mrb[70].mxu1 %vm1734_vm1, %v1748_v8  ;;  %v2064_v8 = vld [vmem:[#allocation3 + $0x3a] sm:$0xff] }
 0x2b8   : > { %4470 = vmatmul.mubr.msk.f32.gmra.mrb[80].mxu0 %vm1734_vm1, %v2393_v45  ;;  %4926 = vmatpush3.bf16.msra.mxu1 %v4925_v39  ;;  %v2062_v39 = vld [vmem:[#allocation3 + $0x2a] sm:$0xff] }
 0x2b9   : > { %4319 = vmatprep.mubr.msk.f32.mxu1 %vm5074_vm0, %v5075_v47  ;;  %4531 = vmatprep.mubr.msk.f32.mxu0 %vm5074_vm0, %v5075_v47  ;;  %v3047_v45 = vld [vmem:[#allocation3 + $0x46] sm:$0xff] }
 0x2ba   : > { %4927 = vmatprep.subr.bf16.mxu1 %v5073_v57 }
 0x2bb   : > { %4320 = vmatmul.mubr.msk.f32.gmra.mrb[72].mxu1 %vm1734_vm1, %v1749_v55  ;;  %v3439_v55 = vld [vmem:[%s6670_s5 + $0x150] sm:$0xff] }
 0x2bc   : > { %4532 = vmatmul.mubr.msk.f32.vlgmr.msra.gmra.mrb[82].mxu0 %vm1734_vm1, %v6194_v56  ;;  %4322 = vmatprep.mubr.msk.f32.mxu1 %vm5074_vm0, %v5075_v47 }
 0x2bd   : > { %4534 = vmatprep.mubr.msk.f32.mxu0 %vm5074_vm0, %v5075_v47  ;;  %4929 = vmatpush3.bf16.msra.mxu1 %v4928_v48  ;;  %v3438_v48 = vld [vmem:[%s6670_s5 + $0x148] sm:$0xff] }
 0x2be   : > { %4998 = vmatpush3.bf16.msra.mxu0 %v6189_v52  ;;  %4930 = vmatprep.subr.bf16.mxu1 %v5073_v57  ;;  %v4961_v44 = vpack.c.bf16 %v3438_v48, %v3437_v46 }
 0x2bf   : > { %4999 = vmatprep.subr.bf16.mxu0 %v5073_v57  ;;  %4323 = vmatmul.mubr.msk.f32.gmra.mrb[74].mxu1 %vm1734_vm1, %v1750_v5  ;;  %v3443_v5 = vld [vmem:[%s6670_s5 + $0x170] sm:$0xff] }
 0x2c0   : > { %4535 = vmatmul.mubr.msk.f32.gmra.mrb[84].mxu0 %vm1734_vm1, %v6218_v6  ;;  %4325 = vmatprep.mubr.msk.f32.mxu1 %vm5074_vm0, %v5075_v47 }
 0x2c1   : > { %4537 = vmatprep.mubr.msk.f32.mxu0 %vm5074_vm0, %v5075_v47  ;;  %4932 = vmatpush3.bf16.msra.mxu1 %v4931_v59  ;;  %v4964_v59 = vpack.c.bf16 %v3440_v58, %v3439_v55 }
 0x2c2   : > { %5001 = vmatpush3.bf16.msra.mxu0 %v6213_v0  ;;  %4933 = vmatprep.subr.bf16.mxu1 %v5073_v57 }
 0x2c3   : > { %5002 = vmatprep.subr.bf16.mxu0 %v5073_v57  ;;  %4326 = vmatmul.mubr.msk.f32.gmra.mrb[76].mxu1 %vm1734_vm1, %v1751_v11  ;;  %v3471_v11 = vld [vmem:[%s6670_s5 + $0x1c0] sm:$0xff] }
 0x2c4   : > { %4538 = vmatmul.mubr.msk.f32.gmra.mrb[86].mxu0 %vm1734_vm1, %v6238_v15  ;;  %4328 = vmatprep.mubr.msk.f32.mxu1 %vm5074_vm0, %v5075_v47 }
 0x2c5   : > { %4540 = vmatprep.mubr.msk.f32.mxu0 %vm5074_vm0, %v5075_v47  ;;  %4935 = vmatpush3.bf16.msra.mxu1 %v4934_v53  ;;  %v4970_v53 = vpack.c.bf16 %v3444_v7, %v3443_v5 }
 0x2c6   : > { %5004 = vmatpush3.bf16.msra.mxu0 %v6233_v9  ;;  %4936 = vmatprep.subr.bf16.mxu1 %v5073_v57 }
 0x2c7   : > { %5005 = vmatprep.subr.bf16.mxu0 %v5073_v57  ;;  %4329 = vmatmul.mubr.msk.f32.gmra.mrb[78].mxu1 %vm1734_vm1, %v1752_v10  ;;  %v2229_v10 = vld [vmem:[#allocation3 + $0x4a] sm:$0x7] }
 0x2c8   : > { %4541 = vmatmul.mubr.msk.f32.gmra.mrb[88].mxu0 %vm1734_vm1, %v6255_v13  ;;  %4331 = vmatprep.mubr.msk.f32.mxu1 %vm5074_vm0, %v5075_v47 }
 0x2c9   : > { %4543 = vmatprep.mubr.msk.f32.mxu0 %vm5074_vm0, %v5075_v47 }
 0x2ca   : > { %5007 = vmatpush3.bf16.msra.mxu0 %v6253_v4 }
 0x2cb   : > { %4332 = vmatmul.mubr.msk.f32.gmra.mrb[80].mxu1 %vm1734_vm1, %v1753_v22  ;;  %v4985_v22 = vpack.c.bf16 %v3472_v63, %v3471_v11 }
 0x2cc   : > { %4544 = vmatmul.mubr.msk.f32.gmra.mrb[90].mxu0 %vm1734_vm1, %v6267_v24  ;;  %4334 = vmatprep.mubr.msk.f32.mxu1 %vm5074_vm0, %v5075_v47 }
 0x2cd   : > { %4546 = vmatprep.mubr.msk.f32.mxu0 %vm5074_vm0, %v5075_v47 }
 0x2cf   : > { %4335 = vmatmul.mubr.msk.f32.gmra.mrb[82].mxu1 %vm1734_vm1, %v1754_v30  ;;  %v3473_v30 = vld [vmem:[%s6670_s5 + $0x1d0] sm:$0xff] }
 0x2d0   : > { %4547 = vmatmul.mubr.msk.f32.gmra.mrb[92].mxu0 %vm1734_vm1, %v6276_v34  ;;  %4337 = vmatprep.mubr.msk.f32.mxu1 %vm5074_vm0, %v5075_v47 }
 0x2d1   : > { %4549 = vmatprep.mubr.msk.f32.mxu0 %vm5074_vm0, %v5075_v47 }
 0x2d3   : > { %4338 = vmatmul.mubr.msk.f32.gmra.mrb[84].mxu1 %vm1734_vm1, %v1755_v43  ;;  %v3474_v43 = vld [vmem:[%s6670_s5 + $0x1d8] sm:$0xff] }
 0x2d4   : > { %4550 = vmatmul.mubr.msk.f32.gmra.mrb[94].mxu0 %vm1734_vm1, %v6285_v51  ;;  %4340 = vmatprep.mubr.msk.f32.mxu1 %vm5074_vm0, %v5075_v47  ;;  %v4988_v12 = vpack.c.bf16 %v3474_v43, %v3473_v30 }
 0x2d5   : > { %4552 = vmatprep.mubr.msk.f32.mxu0 %vm5074_vm0, %v5075_v47 }
 0x2d7   : > { %4341 = vmatmul.mubr.msk.f32.gmra.mrb[86].mxu1 %vm1734_vm1, %v1756_v25  ;;  %v3475_v25 = vld [vmem:[%s6670_s5 + $0x1e0] sm:$0xff] }
 0x2d8   : > { %4553 = vmatmul.mubr.msk.f32.gmra.mrb[96].mxu0 %vm1734_vm1, %v2720_v31  ;;  %4359 = vmatprep.mubr.msk.f32.mxu1 %vm5074_vm0, %v5075_v47  ;;  %v3476_v31 = vld [vmem:[%s6670_s5 + $0x1e8] sm:$0xff] }
 0x2d9   : > { %4555 = vmatprep.mubr.msk.f32.mxu0 %vm5074_vm0, %v5075_v47 }
 0x2db   : > { %4360 = vmatmul.mubr.msk.f32.vlgmr.msra.gmra.mrb[88].mxu1 %vm1734_vm1, %v2057_v16  ;;  %v3478_v16 = vld [vmem:[%s6670_s5 + $0x1f8] sm:$0xff] }
 0x2dc   : > { %4556 = vmatmul.mubr.msk.f32.gmra.mrb[98].mxu0 %vm1734_vm1, %v2721_v1  ;;  %4938 = vmatpush3.bf16.msra.mxu1 %v4937_v42  ;;  %v4991_v42 = vpack.c.bf16 %v3476_v31, %v3475_v25 }
 0x2dd   : > { %4362 = vmatprep.mubr.msk.f32.mxu1 %vm5074_vm0, %v5075_v47  ;;  %4617 = vmatprep.mubr.msk.f32.mxu0 %vm5074_vm0, %v5075_v47 }
 0x2de   : > { %4939 = vmatprep.subr.bf16.mxu1 %v5073_v57 }
 0x2df   : > { %4363 = vmatmul.mubr.msk.f32.gmra.mrb[90].mxu1 %vm1734_vm1, %v6322_v20 }
 0x2e0   : > { %4618 = vmatmul.mubr.msk.f32.vlgmr.msra.gmra.mrb[100].mxu0 %vm1734_vm1, %v3041_v2  ;;  %4365 = vmatprep.mubr.msk.f32.mxu1 %vm5074_vm0, %v5075_v47 }
 0x2e1   : > { %4620 = vmatprep.mubr.msk.f32.mxu0 %vm5074_vm0, %v5075_v47  ;;  %4941 = vmatpush3.bf16.msra.mxu1 %v4940_v18 }
 0x2e2   : > { %4942 = vmatprep.subr.bf16.mxu1 %v5073_v57 }
 0x2e3   : > { %4366 = vmatmul.mubr.msk.f32.gmra.mrb[92].mxu1 %vm1734_vm1, %v2059_v27 }
 0x2e4   : > { %4621 = vmatmul.mubr.msk.f32.gmra.mrb[102].mxu0 %vm1734_vm1, %v3042_v28  ;;  %4368 = vmatprep.mubr.msk.f32.mxu1 %vm5074_vm0, %v5075_v47 }
 0x2e5   : > { %4623 = vmatprep.mubr.msk.f32.mxu0 %vm5074_vm0, %v5075_v47  ;;  %4944 = vmatpush3.bf16.msra.mxu1 %v4943_v23 }
 0x2e6   : > { %4945 = vmatprep.subr.bf16.mxu1 %v5073_v57 }
 0x2e7   : > { %4369 = vmatmul.mubr.msk.f32.gmra.mrb[94].mxu1 %vm1734_vm1, %v2060_v33 }
 0x2e8   : > { %4624 = vmatmul.mubr.msk.f32.gmra.mrb[104].mxu0 %vm1734_vm1, %v3043_v35  ;;  %4371 = vmatprep.mubr.msk.f32.mxu1 %vm5074_vm0, %v5075_v47 }
 0x2e9   : > { %4626 = vmatprep.mubr.msk.f32.mxu0 %vm5074_vm0, %v5075_v47  ;;  %4947 = vmatpush3.bf16.msra.mxu1 %v4946_v32 }
 0x2ea   : > { %4960 = vmatprep.subr.bf16.mxu1 %v5073_v57 }
 0x2eb   : > { %4372 = vmatmul.mubr.msk.f32.gmra.mrb[96].mxu1 %vm1734_vm1, %v2061_v36 }
 0x2ec   : > { %4627 = vmatmul.mubr.msk.f32.gmra.mrb[106].mxu0 %vm1734_vm1, %v3044_v37  ;;  %4374 = vmatprep.mubr.msk.f32.mxu1 %vm5074_vm0, %v5075_v47 }
 0x2ed   : > { %4629 = vmatprep.mubr.msk.f32.mxu0 %vm5074_vm0, %v5075_v47 }
 0x2ef   : > { %4375 = vmatmul.mubr.msk.f32.gmra.mrb[98].mxu1 %vm1734_vm1, %v2062_v39 }
 0x2f0   : > { %4630 = vmatmul.mubr.msk.f32.gmra.mrb[108].mxu0 %vm1734_vm1, %v3045_v40  ;;  %4377 = vmatprep.mubr.msk.f32.mxu1 %vm5074_vm0, %v5075_v47 }
 0x2f1   : > { %4632 = vmatprep.mubr.msk.f32.mxu0 %vm5074_vm0, %v5075_v47 }
 0x2f3   : > { %4378 = vmatmul.mubr.msk.f32.gmra.mrb[100].mxu1 %vm1734_vm1, %v2063_v41 }
 0x2f4   : > { %4633 = vmatmul.mubr.msk.f32.gmra.mrb[110].mxu0 %vm1734_vm1, %v3046_v38  ;;  %4380 = vmatprep.mubr.msk.f32.mxu1 %vm5074_vm0, %v5075_v47 }
 0x2f5   : > { %4635 = vmatprep.mubr.msk.f32.mxu0 %vm5074_vm0, %v5075_v47 }
 0x2f7   : > { %4381 = vmatmul.mubr.msk.f32.gmra.mrb[102].mxu1 %vm1734_vm1, %v2064_v8 }
 0x2f8   : > { %4636 = vmatmul.mubr.msk.f32.gmra.mrb[112].mxu0 %vm1734_vm1, %v3047_v45  ;;  %4383 = vmatprep.mubr.msk.f32.mxu1 %vm5074_vm0, %v5075_v47 }
 0x2f9   : > { %4638 = vmatprep.mubr.msk.f32.mxu0 %vm5074_vm0, %v5075_v47 }
 0x2fb   : > { %4384 = vmatmul.mubr.msk.f32.gmra.mrb[104].mxu1 %vm1734_vm1, %v2065_v49 }
 0x2fc   : > { %4639 = vmatmul.mubr.msk.f32.gmra.mrb[114].mxu0 %vm1734_vm1, %v3048_v50  ;;  %4402 = vmatprep.mubr.msk.f32.mxu1 %vm5074_vm0, %v5075_v47 }
 0x2ff   : > { %4403 = vmatmul.mubr.msk.f32.vlgmr.msra.gmra.mrb[106].mxu1 %vm1734_vm1, %v6322_v20 }
 0x300   : > { %4962 = vmatpush3.bf16.msra.mxu1 %v4961_v44  ;;  %4405 = vmatprep.mubr.msk.f32.mxu1 %vm5074_vm0, %v5075_v47 }
 0x301   : > { %4963 = vmatprep.subr.bf16.mxu1 %v5073_v57 }
 0x303   : > { %4406 = vmatmul.mubr.msk.f32.gmra.mrb[108].mxu1 %vm1734_vm1, %v2059_v27 }
 0x304   : > { %4408 = vmatprep.mubr.msk.f32.mxu1 %vm5074_vm0, %v5075_v47  ;;  %4965 = vmatpush3.bf16.msra.mxu1 %v4964_v59 }
 0x305   : > { %4966 = vmatprep.subr.bf16.mxu1 %v5073_v57 }
 0x307   : > { %4409 = vmatmul.mubr.msk.f32.gmra.mrb[110].mxu1 %vm1734_vm1, %v2060_v33 }
 0x308   : > { %4411 = vmatprep.mubr.msk.f32.mxu1 %vm5074_vm0, %v5075_v47  ;;  %4968 = vmatpush3.bf16.msra.mxu1 %v4967_v54 }
 0x309   : > { %4969 = vmatprep.subr.bf16.mxu1 %v5073_v57 }
 0x30b   : > { %4412 = vmatmul.mubr.msk.f32.gmra.mrb[112].mxu1 %vm1734_vm1, %v2061_v36 }
 0x30c   : > { %4414 = vmatprep.mubr.msk.f32.mxu1 %vm5074_vm0, %v5075_v47  ;;  %4971 = vmatpush3.bf16.msra.mxu1 %v4970_v53 }
 0x30d   : > { %4984 = vmatprep.subr.bf16.mxu1 %v5073_v57 }
 0x30f   : > { %4415 = vmatmul.mubr.msk.f32.gmra.mrb[114].mxu1 %vm1734_vm1, %v2062_v39 }
 0x310   : > { %4417 = vmatprep.mubr.msk.f32.mxu1 %vm5074_vm0, %v5075_v47 }
 0x313   : > { %4418 = vmatmul.mubr.msk.f32.gmra.mrb[116].mxu1 %vm1734_vm1, %v2063_v41 }
 0x314   : > { %4420 = vmatprep.mubr.msk.f32.mxu1 %vm5074_vm0, %v5075_v47 }
 0x317   : > { %4421 = vmatmul.mubr.msk.f32.gmra.mrb[118].mxu1 %vm1734_vm1, %v2064_v8 }
 0x318   : > { %4423 = vmatprep.mubr.msk.f32.mxu1 %vm5074_vm0, %v5075_v47 }
 0x31b   : > { %4424 = vmatmul.mubr.msk.f32.gmra.mrb[120].mxu1 %vm1734_vm1, %v2228_v14 }
 0x31c   : > { %4426 = vmatprep.mubr.msk.f32.mxu1 %vm5074_vm0, %v5075_v47 }
 0x31f   : > { %4427 = vmatmul.mubr.msk.f32.gmra.mrb[122].mxu1 %vm1734_vm1, %v2229_v10 }
 0x320   : > { %4488 = vmatprep.mubr.msk.f32.mxu1 %vm5074_vm0, %v5075_v47 }
 0x323   : > { %4489 = vmatmul.mubr.msk.f32.vlgmr.msra.gmra.mrb[124].mxu1 %vm1734_vm1, %v2549_v3 }
 0x324   : > { %4986 = vmatpush3.bf16.msra.mxu1 %v4985_v22  ;;  %4491 = vmatprep.mubr.msk.f32.mxu1 %vm5074_vm0, %v5075_v47 }
 0x325   : > { %4987 = vmatprep.subr.bf16.mxu1 %v5073_v57 }
 0x327   : > { %4492 = vmatmul.mubr.msk.f32.gmra.mrb[126].mxu1 %vm1734_vm1, %v6194_v56  ;;  %v4994_v56 = vpack.c.bf16 %v3478_v16, %v3477_v60 }
 0x328   : > { %4494 = vmatprep.mubr.msk.f32.mxu1 %vm5074_vm0, %v5075_v47  ;;  %4989 = vmatpush3.bf16.msra.mxu1 %v4988_v12 }
 0x329   : > { %4990 = vmatprep.subr.bf16.mxu1 %v5073_v57 }
 0x32b   : > { %4495 = vmatmul.mubr.msk.f32.gmra.mrb[128].mxu1 %vm1734_vm1, %v6218_v6  ;;  %v2557_v6 = vld [vmem:[#allocation3 + $0x4c] sm:$0x7] }
 0x32c   : > { %4497 = vmatprep.mubr.msk.f32.mxu1 %vm5074_vm0, %v5075_v47  ;;  %4992 = vmatpush3.bf16.msra.mxu1 %v4991_v42 }
 0x32d   : > { %4993 = vmatprep.subr.bf16.mxu1 %v5073_v57 }
 0x32f   : > { %4498 = vmatmul.mubr.msk.f32.gmra.mrb[130].mxu1 %vm1734_vm1, %v6238_v15  ;;  %v2877_v15 = vld [vmem:[#allocation3 + $0x15] sm:$0xff] }
 0x330   : > { %4500 = vmatprep.mubr.msk.f32.mxu1 %vm5074_vm0, %v5075_v47  ;;  %4995 = vmatpush3.bf16.msra.mxu1 %v4994_v56 }
 0x331   : > { %5008 = vmatprep.subr.bf16.mxu1 %v5073_v57 }
 0x333   : > { %4501 = vmatmul.mubr.msk.f32.gmra.mrb[132].mxu1 %vm1734_vm1, %v6255_v13  ;;  %v2878_v13 = vld [vmem:[#allocation3 + $0x1d] sm:$0xff] }
 0x334   : > { %4503 = vmatprep.mubr.msk.f32.mxu1 %vm5074_vm0, %v5075_v47 }
 0x337   : > { %4504 = vmatmul.mubr.msk.f32.gmra.mrb[134].mxu1 %vm1734_vm1, %v6267_v24  ;;  %v2879_v24 = vld [vmem:[#allocation3 + $0x25] sm:$0xff] }
 0x338   : > { %4506 = vmatprep.mubr.msk.f32.mxu1 %vm5074_vm0, %v5075_v47 }
 0x33b   : > { %4507 = vmatmul.mubr.msk.f32.gmra.mrb[136].mxu1 %vm1734_vm1, %v6276_v34  ;;  %v2882_v34 = vld [vmem:[#allocation3 + $0x3d] sm:$0xff] }
 0x33c   : > { %4509 = vmatprep.mubr.msk.f32.mxu1 %vm5074_vm0, %v5075_v47 }
 0x33f   : > { %4510 = vmatmul.mubr.msk.f32.gmra.mrb[138].mxu1 %vm1734_vm1, %v6285_v51  ;;  %v2885_v51 = vld [vmem:[#allocation3 + $0x55] sm:$0x7] }
 0x340   : > { %4512 = vmatprep.mubr.msk.f32.mxu1 %vm5074_vm0, %v5075_v47 }
 0x343   : > { %4513 = vmatmul.mubr.msk.f32.gmra.mrb[140].mxu1 %vm1734_vm1, %v2557_v6 }
 0x344   : > { %4574 = vmatprep.mubr.msk.f32.mxu1 %vm5074_vm0, %v5075_v47 }
 0x347   : > { %4575 = vmatmul.mubr.msk.f32.vlgmr.msra.gmra.mrb[142].mxu1 %vm1734_vm1, %v2877_v15 }
 0x348   : > { %5012 = vmatpush3.bf16.msra.mxu1 %v6189_v52  ;;  %4577 = vmatprep.mubr.msk.f32.mxu1 %vm5074_vm0, %v5075_v47  ;;  %v2880_v52 = vld [vmem:[#allocation3 + $0x2d] sm:$0xff] }
 0x349   : > { %5009 = vmatprep.subr.bf16.mxu1 %v5073_v57 }
 0x34b   : > { %4578 = vmatmul.mubr.msk.f32.gmra.mrb[144].mxu1 %vm1734_vm1, %v2878_v13 }
 0x34c   : > { %4580 = vmatprep.mubr.msk.f32.mxu1 %vm5074_vm0, %v5075_v47  ;;  %5013 = vmatpush3.bf16.msra.mxu1 %v6213_v0  ;;  %v2881_v0 = vld [vmem:[#allocation3 + $0x35] sm:$0xff] }
 0x34d   : > { %5010 = vmatprep.subr.bf16.mxu1 %v5073_v57 }
 0x34f   : > { %4581 = vmatmul.mubr.msk.f32.gmra.mrb[146].mxu1 %vm1734_vm1, %v2879_v24 }
 0x350   : > { %4583 = vmatprep.mubr.msk.f32.mxu1 %vm5074_vm0, %v5075_v47  ;;  %5014 = vmatpush3.bf16.msra.mxu1 %v6233_v9  ;;  %v2884_v9 = vld [vmem:[#allocation3 + $0x4d] sm:$0xff] }
 0x351   : > { %5011 = vmatprep.subr.bf16.mxu1 %v5073_v57  ;;  %v2883_v57 = vld [vmem:[#allocation3 + $0x45] sm:$0xff] }
 0x353   : > { %4584 = vmatmul.mubr.msk.f32.gmra.mrb[148].mxu1 %vm1734_vm1, %v2880_v52 }
 0x354   : > { %4586 = vmatprep.mubr.msk.f32.mxu1 %vm5074_vm0, %v5075_v47  ;;  %5015 = vmatpush3.bf16.msra.mxu1 %v6253_v4 }
 0x357   : > { %4587 = vmatmul.mubr.msk.f32.gmra.mrb[150].mxu1 %vm1734_vm1, %v2881_v0 }
 0x358   : > { %4589 = vmatprep.mubr.msk.f32.mxu1 %vm5074_vm0, %v5075_v47 }
 0x35b   : > { %4590 = vmatmul.mubr.msk.f32.gmra.mrb[152].mxu1 %vm1734_vm1, %v2882_v34 }
 0x35c   : > { %4592 = vmatprep.mubr.msk.f32.mxu1 %vm5074_vm0, %v5075_v47 }
 0x35f   : > { %4593 = vmatmul.mubr.msk.f32.gmra.mrb[154].mxu1 %vm1734_vm1, %v2883_v57 }
 0x360   : > { %4595 = vmatprep.mubr.msk.f32.mxu1 %vm5074_vm0, %v5075_v47 }
 0x363   : > { %4596 = vmatmul.mubr.msk.f32.gmra.mrb[156].mxu1 %vm1734_vm1, %v2884_v9 }
 0x364   : > { %4598 = vmatprep.mubr.msk.f32.mxu1 %vm5074_vm0, %v5075_v47 }
 0x366   : > { %v1876_v4 = vpop.f32.mrb[52].mxu1 }
 0x367   : > { %v4275_v1 = vpop.f32.mrb[53].mxu1  ;;  %4599 = vmatmul.mubr.msk.f32.gmra.mrb[158].mxu1 %vm1734_vm1, %v2885_v51 }
 0x368   : > { %4641 = vmatprep.mubr.msk.f32.mxu1 %vm5074_vm0, %v5075_v47 }
 0x36a   : > { %v1881_v26 = vpop.f32.mrb[54].mxu1 }
 0x36b   : > { %v6535_v18 = vpop.f32.mrb[64].mxu0  ;;  %v4278_v20 = vpop.f32.mrb[55].mxu1  ;;  %4642 = vmatmul.mubr.msk.f32.vlgmr.msra.gmra.mrb[160].mxu1 %vm1734_vm1, %v3049_v19 }
 0x36c   : > { %v4447_v2 = vpop.f32.mrb[65].mxu0 }
 0x36e   : > { %v1886_v21 = vpop.f32.mrb[56].mxu1 }
 0x36f   : > { %v6538_v23 = vpop.f32.mrb[66].mxu0  ;;  %v4281_v62 = vpop.f32.mrb[57].mxu1 }
 0x370   : > { %v4450_v27 = vpop.f32.mrb[67].mxu0 }
 0x372   : > { %v1891_v28 = vpop.f32.mrb[58].mxu1 }
 0x373   : > { %v6540_v29 = vpop.f32.mrb[68].mxu0  ;;  %v4284_v32 = vpop.f32.mrb[59].mxu1 }
 0x374   : > { %v4453_v33 = vpop.f32.mrb[69].mxu0 }
 0x376   : > { %v1896_v35 = vpop.f32.mrb[60].mxu1 }
 0x377   : > { %v6542_v47 = vpop.f32.mrb[70].mxu0  ;;  %v4287_v36 = vpop.f32.mrb[61].mxu1 }
 0x378   : > { %v4456_v37 = vpop.f32.mrb[71].mxu0 }
 0x37a   : > { %v1901_v39 = vpop.f32.mrb[62].mxu1 }
 0x37b   : > { %v6544_v40 = vpop.f32.mrb[72].mxu0  ;;  %v4290_v41 = vpop.f32.mrb[63].mxu1 }
 0x37c   : > { %v4459_v38 = vpop.f32.mrb[73].mxu0 }
 0x37e   : > { %v1906_v8 = vpop.f32.mrb[64].mxu1 }
 0x37f   : > { %v6546_v45 = vpop.f32.mrb[74].mxu0  ;;  %v4293_v46 = vpop.f32.mrb[65].mxu1 }
 0x380   : > { %v4462_v48 = vpop.f32.mrb[75].mxu0 }
 0x382   : > { %v1911_v49 = vpop.f32.mrb[66].mxu1 }
 0x383   : > { %v6548_v50 = vpop.f32.mrb[76].mxu0  ;;  %v4296_v44 = vpop.f32.mrb[67].mxu1 }
 0x384   : > { %v4465_v55 = vpop.f32.mrb[77].mxu0 }
 0x386   : > { %v1916_v58 = vpop.f32.mrb[68].mxu1 }
 0x387   : > { %v6550_v59 = vpop.f32.mrb[78].mxu0  ;;  %v4299_v17 = vpop.f32.mrb[69].mxu1 }
 0x388   : > { %v4468_v61 = vpop.f32.mrb[79].mxu0 }
 0x38a   : > { %v2013_v54 = vpop.f32.mrb[70].mxu1 }
 0x38b   : > { %v6552_v5 = vpop.f32.mrb[80].mxu0  ;;  %v2014_v7 = vadd.f32 %v2013_v54, %v1876_v4  ;;  %v4318_v53 = vpop.f32.mrb[71].mxu1 }
 0x38c   : > { %v4471_v14 = vpop.f32.mrb[81].mxu0 }
 0x38e   : > { %v2018_v11 = vpop.f32.mrb[72].mxu1 }
 0x38f   : > { %v6554_v63 = vpop.f32.mrb[82].mxu0  ;;  %v2019_v10 = vadd.f32 %v2018_v11, %v1881_v26  ;;  %v4321_v22 = vpop.f32.mrb[73].mxu1 }
 0x390   : > { %v4533_v30 = vpop.f32.mrb[83].mxu0 }
 0x392   : > { %v2023_v43 = vpop.f32.mrb[74].mxu1 }
 0x393   : > { %v6556_v3 = vpop.f32.mrb[84].mxu0  ;;  %v2024_v12 = vadd.f32 %v2023_v43, %v1886_v21  ;;  %v4324_v25 = vpop.f32.mrb[75].mxu1 }
 0x394   : > { %v4536_v31 = vpop.f32.mrb[85].mxu0 }
 0x396   : > { %v2028_v42 = vpop.f32.mrb[76].mxu1 }
 0x397   : > { %v6558_v60 = vpop.f32.mrb[86].mxu0  ;;  %v2029_v16 = vadd.f32 %v2028_v42, %v1891_v28  ;;  %v4327_v56 = vpop.f32.mrb[77].mxu1 }
 0x398   : > { %v4539_v6 = vpop.f32.mrb[87].mxu0 }
 0x39a   : > { %v2033_v15 = vpop.f32.mrb[78].mxu1 }
 0x39b   : > { %v6560_v13 = vpop.f32.mrb[88].mxu0  ;;  %v2034_v24 = vadd.f32 %v2033_v15, %v1896_v35  ;;  %v4330_v52 = vpop.f32.mrb[79].mxu1 }
 0x39c   : > { %v4542_v0 = vpop.f32.mrb[89].mxu0 }
 0x39e   : > { %v2038_v34 = vpop.f32.mrb[80].mxu1 }
 0x39f   : > { %v6562_v57 = vpop.f32.mrb[90].mxu0  ;;  %v2039_v9 = vadd.f32 %v2038_v34, %v1901_v39  ;;  %v4333_v4 = vpop.f32.mrb[81].mxu1 }
 0x3a0   : > { %v4545_v51 = vpop.f32.mrb[91].mxu0 }
 0x3a2   : > { %v2043_v1 = vpop.f32.mrb[82].mxu1 }
 0x3a3   : > { %v6564_v26 = vpop.f32.mrb[92].mxu0  ;;  %v2044_v19 = vadd.f32 %v2043_v1, %v1906_v8  ;;  %v4336_v20 = vpop.f32.mrb[83].mxu1 }
 0x3a4   : > { %v4548_v2 = vpop.f32.mrb[93].mxu0 }
 0x3a6   : > { %v2048_v21 = vpop.f32.mrb[84].mxu1 }
 0x3a7   : > { %v6566_v62 = vpop.f32.mrb[94].mxu0  ;;  %v2049_v27 = vadd.f32 %v2048_v21, %v1911_v49  ;;  %v4339_v28 = vpop.f32.mrb[85].mxu1 }
 0x3a8   : > { %v4551_v32 = vpop.f32.mrb[95].mxu0 }
 0x3aa   : > { %v2053_v33 = vpop.f32.mrb[86].mxu1 }
 0x3ab   : > { %v6568_v35 = vpop.f32.mrb[96].mxu0  ;;  %v2054_v36 = vadd.f32 %v2053_v33, %v1916_v58  ;;  %v4342_v37 = vpop.f32.mrb[87].mxu1 }
 0x3ac   : > { %v4554_v39 = vpop.f32.mrb[97].mxu0 }
 0x3ae   : > { %v2168_v41 = vpop.f32.mrb[88].mxu1 }
 0x3af   : > { %v6570_v38 = vpop.f32.mrb[98].mxu0  ;;  %v2212_v46 = vadd.f32 %v2168_v41, %v2014_v7  ;;  %v4361_v48 = vpop.f32.mrb[89].mxu1 }
 0x3b0   : > { %v4557_v8 = vpop.f32.mrb[99].mxu0 }
 0x3b2   : > { %v2173_v44 = vpop.f32.mrb[90].mxu1 }
 0x3b3   : > { %v6572_v55 = vpop.f32.mrb[100].mxu0  ;;  %v2213_v17 = vadd.f32 %v2173_v44, %v2019_v10  ;;  %v4364_v61 = vpop.f32.mrb[91].mxu1 }
 0x3b4   : > { %v4619_v49 = vpop.f32.mrb[101].mxu0 }
 0x3b6   : > { %v2178_v54 = vpop.f32.mrb[92].mxu1 }
 0x3b7   : > { %v6574_v53 = vpop.f32.mrb[102].mxu0  ;;  %v2214_v14 = vadd.f32 %v2178_v54, %v2024_v12  ;;  %v4367_v11 = vpop.f32.mrb[93].mxu1 }
 0x3b8   : > { %v4622_v58 = vpop.f32.mrb[103].mxu0 }
 0x3ba   : > { %v2183_v22 = vpop.f32.mrb[94].mxu1 }
 0x3bb   : > { %v6576_v30 = vpop.f32.mrb[104].mxu0  ;;  %v2215_v43 = vadd.f32 %v2183_v22, %v2029_v16  ;;  %v4370_v25 = vpop.f32.mrb[95].mxu1 }
 0x3bc   : > { %v4625_v7 = vpop.f32.mrb[105].mxu0 }
 0x3be   : > { %v2188_v31 = vpop.f32.mrb[96].mxu1 }
 0x3bf   : > { %v6578_v42 = vpop.f32.mrb[106].mxu0  ;;  %v2216_v56 = vadd.f32 %v2188_v31, %v2034_v24  ;;  %v4373_v6 = vpop.f32.mrb[97].mxu1 }
 0x3c0   : > { %v4628_v10 = vpop.f32.mrb[107].mxu0 }
 0x3c2   : > { %v2193_v15 = vpop.f32.mrb[98].mxu1 }
 0x3c3   : > { %v6580_v52 = vpop.f32.mrb[108].mxu0  ;;  %v2217_v0 = vadd.f32 %v2193_v15, %v2039_v9  ;;  %v4376_v34 = vpop.f32.mrb[99].mxu1 }
 0x3c4   : > { %v4631_v12 = vpop.f32.mrb[109].mxu0 }
 0x3c6   : > { %v2198_v4 = vpop.f32.mrb[100].mxu1 }
 0x3c7   : > { %v6582_v51 = vpop.f32.mrb[110].mxu0  ;;  %v2218_v1 = vadd.f32 %v2198_v4, %v2044_v19  ;;  %v4379_v20 = vpop.f32.mrb[101].mxu1 }
 0x3c8   : > { %v4634_v16 = vpop.f32.mrb[111].mxu0 }
 0x3ca   : > { %v2203_v2 = vpop.f32.mrb[102].mxu1 }
 0x3cb   : > { %v6584_v21 = vpop.f32.mrb[112].mxu0  ;;  %v2219_v28 = vadd.f32 %v2203_v2, %v2049_v27  ;;  %v4382_v32 = vpop.f32.mrb[103].mxu1 }
 0x3cc   : > { %v4637_v24 = vpop.f32.mrb[113].mxu0 }
 0x3ce   : > { %v2208_v33 = vpop.f32.mrb[104].mxu1 }
 0x3cf   : > { %v6586_v37 = vpop.f32.mrb[114].mxu0  ;;  %v2220_v39 = vadd.f32 %v2208_v33, %v2054_v36  ;;  %v4385_v41 = vpop.f32.mrb[105].mxu1 }
 0x3d0   : > { %v4640_v9 = vpop.f32.mrb[115].mxu0 }
 0x3d2   : > { %v2332_v48 = vpop.f32.mrb[106].mxu1 }
 0x3d3   : > { %v2376_v8 = vadd.f32 %v2332_v48, %v2212_v46  ;;  %v4404_v44 = vpop.f32.mrb[107].mxu1 }
 0x3d5   : > { %v2540_v61 = vadd.f32 %v6535_v18, %v2376_v8 }
 0x3d6   : > { %v2337_v19 = vpop.f32.mrb[108].mxu1 }
 0x3d7   : > { %v2377_v49 = vadd.f32 %v2337_v19, %v2213_v17  ;;  %v4407_v54 = vpop.f32.mrb[109].mxu1 }
 0x3d9   : > { %v2541_v11 = vadd.f32 %v6538_v23, %v2377_v49 }
 0x3da   : > { %v2342_v58 = vpop.f32.mrb[110].mxu1 }
 0x3db   : > { %v2378_v27 = vadd.f32 %v2342_v58, %v2214_v14  ;;  %v4410_v22 = vpop.f32.mrb[111].mxu1 }
 0x3dd   : > { %v2542_v25 = vadd.f32 %v6540_v29, %v2378_v27 }
 0x3de   : > { %v2347_v7 = vpop.f32.mrb[112].mxu1 }
 0x3df   : > { %v2379_v31 = vadd.f32 %v2347_v7, %v2215_v43  ;;  %v4413_v36 = vpop.f32.mrb[113].mxu1 }
 0x3e1   : > { %v2543_v6 = vadd.f32 %v6542_v47, %v2379_v31 }
 0x3e2   : > { %v2352_v10 = vpop.f32.mrb[114].mxu1 }
 0x3e3   : > { %v2380_v46 = vadd.f32 %v2352_v10, %v2216_v56  ;;  %v4416_v15 = vpop.f32.mrb[115].mxu1 }
 0x3e5   : > { %v2544_v18 = vadd.f32 %v6544_v40, %v2380_v46 }
 0x3e6   : > { %v2357_v34 = vpop.f32.mrb[116].mxu1 }
 0x3e7   : > { %v2381_v17 = vadd.f32 %v2357_v34, %v2217_v0  ;;  %v4419_v12 = vpop.f32.mrb[117].mxu1 }
 0x3e9   : > { %v2545_v23 = vadd.f32 %v6546_v45, %v2381_v17 }
 0x3ea   : > { %v2362_v4 = vpop.f32.mrb[118].mxu1 }
 0x3eb   : > { %v2382_v14 = vadd.f32 %v2362_v4, %v2218_v1  ;;  %v4422_v20 = vpop.f32.mrb[119].mxu1 }
 0x3ed   : > { %v2546_v29 = vadd.f32 %v6548_v50, %v2382_v14 }
 0x3ee   : > { %v2367_v16 = vpop.f32.mrb[120].mxu1 }
 0x3ef   : > { %v2383_v43 = vadd.f32 %v2367_v16, %v2219_v28  ;;  %v4425_v2 = vpop.f32.mrb[121].mxu1 }
 0x3f1   : > { %v2547_v47 = vadd.f32 %v6550_v59, %v2383_v43 }
 0x3f2   : > { %v2372_v32 = vpop.f32.mrb[122].mxu1 }
 0x3f3   : > { %v2384_v56 = vadd.f32 %v2372_v32, %v2220_v39  ;;  %v4428_v24 = vpop.f32.mrb[123].mxu1 }
 0x3f5   : > { %v2548_v40 = vadd.f32 %v6552_v5, %v2384_v56 }
 0x3f6   : > { %v2660_v33 = vpop.f32.mrb[124].mxu1 }
 0x3f7   : > { %v2704_v0 = vadd.f32 %v2660_v33, %v2540_v61  ;;  %v4490_v41 = vpop.f32.mrb[125].mxu1 }
 0x3f9   : > { %v2868_v45 = vadd.f32 %v6554_v63, %v2704_v0 }
 0x3fa   : > { %v2665_v9 = vpop.f32.mrb[126].mxu1 }
 0x3fb   : > { %v2705_v1 = vadd.f32 %v2665_v9, %v2541_v11  ;;  %v4493_v48 = vpop.f32.mrb[127].mxu1 }
 0x3fd   : > { %v2869_v50 = vadd.f32 %v6556_v3, %v2705_v1 }
 0x3fe   : > { %v2670_v8 = vpop.f32.mrb[128].mxu1 }
 0x3ff   : > { %v2706_v28 = vadd.f32 %v2670_v8, %v2542_v25  ;;  %v4496_v44 = vpop.f32.mrb[129].mxu1 }
 0x401   : > { %v2870_v59 = vadd.f32 %v6558_v60, %v2706_v28 }
 0x402   : > { %v2675_v19 = vpop.f32.mrb[130].mxu1 }
 0x403   : > { %v2707_v39 = vadd.f32 %v2675_v19, %v2543_v6  ;;  %v4499_v49 = vpop.f32.mrb[131].mxu1 }
 0x405   : > { %v2871_v5 = vadd.f32 %v6560_v13, %v2707_v39 }
 0x406   : > { %v2680_v54 = vpop.f32.mrb[132].mxu1 }
 0x407   : > { %v2708_v61 = vadd.f32 %v2680_v54, %v2544_v18  ;;  %v4502_v58 = vpop.f32.mrb[133].mxu1 }
 0x409   : > { %v2872_v63 = vadd.f32 %v6562_v57, %v2708_v61 }
 0x40a   : > { %v2685_v27 = vpop.f32.mrb[134].mxu1 }
 0x40b   : > { %v2709_v11 = vadd.f32 %v2685_v27, %v2545_v23  ;;  %v4505_v22 = vpop.f32.mrb[135].mxu1 }
 0x40d   : > { %v2873_v3 = vadd.f32 %v6564_v26, %v2709_v11 }
 0x40e   : > { %v2690_v25 = vpop.f32.mrb[136].mxu1 }
 0x40f   : > { %v2710_v7 = vadd.f32 %v2690_v25, %v2546_v29  ;;  %v4508_v31 = vpop.f32.mrb[137].mxu1 }
 0x411   : > { %v2874_v60 = vadd.f32 %v6566_v62, %v2710_v7  ;;  %v6614_v62 = vld [vmem:[%s6671_s6] ss:$0 sm:$0xff] }
 0x412   : > { %v2695_v36 = vpop.f32.mrb[138].mxu1 }
 0x413   : > { %v2711_v6 = vadd.f32 %v2695_v36, %v2547_v47  ;;  %v4511_v10 = vpop.f32.mrb[139].mxu1 }
 0x415   : > { %v6605_v13 = vadd.f32 %v6568_v35, %v2711_v6 }
 0x416   : > { %v2700_v46 = vpop.f32.mrb[140].mxu1 }
 0x417   : > { %v2712_v15 = vadd.f32 %v2700_v46, %v2548_v40  ;;  %v4514_v57 = vpop.f32.mrb[141].mxu1 }
 0x419   : > { %v6608_v18 = vadd.f32 %v6570_v38, %v2712_v15 }
 0x41a   : > { %v2988_v34 = vpop.f32.mrb[142].mxu1 }
 0x41b   : > { %v3032_v26 = vadd.f32 %v2988_v34, %v2868_v45  ;;  %v4576_v17 = vpop.f32.mrb[143].mxu1 }
 0x41d   : > { %v3196_v12 = vadd.f32 %v6572_v55, %v3032_v26 }
 0x41e   : > { %v2993_v23 = vpop.f32.mrb[144].mxu1 }
 0x41f   : > { %v3212_v35 = vadd.f32 %v6614_v62, %v3196_v12  ;;  %v3033_v4 = vadd.f32 %v2993_v23, %v2869_v50  ;;  %v4579_v14 = vpop.f32.mrb[145].mxu1 }
 0x421   : > { %v3221_v38 = vmax.f32 %v3212_v35, 0.0  ;;  %v3197_v20 = vadd.f32 %v6574_v53, %v3033_v4 }
 0x422   : > { %v2998_v29 = vpop.f32.mrb[146].mxu1 }
 0x423   : > { %3231 = vst.msk [vmem:[%s6621_s17] sm:$0x7f] %vm3230_vm3, %v3221_v38  ;;  %v3213_v55 = vadd.f32 %v6614_v62, %v3197_v20  ;;  %v3034_v16 = vadd.f32 %v2998_v29, %v2870_v59  ;;  %v4582_v43 = vpop.f32.mrb[147].mxu1 }
 0x425   : > { %v3222_v2 = vmax.f32 %v3213_v55, 0.0  ;;  %v3198_v47 = vadd.f32 %v6576_v30, %v3034_v16 }
 0x426   : > { %v3003_v32 = vpop.f32.mrb[148].mxu1 }
 0x427   : > { %3233 = vst.msk [vmem:[%s6621_s17 + $0x5] sm:$0xfc] %vm3232_vm4, %v3222_v2  ;;  %v3214_v56 = vadd.f32 %v6614_v62, %v3198_v47  ;;  %v3035_v24 = vadd.f32 %v3003_v32, %v2871_v5  ;;  %v4585_v53 = vpop.f32.mrb[149].mxu1 }
 0x429   : > { %v3223_v40 = vmax.f32 %v3214_v56, 0.0  ;;  %v3199_v33 = vadd.f32 %v6578_v42, %v3035_v24 }
 0x42a   : > { %v3008_v0 = vpop.f32.mrb[150].mxu1 }
 0x42b   : > { %3234 = vst.msk [vmem:[%s6621_s17 + $0xd] sm:$0x1] %vm1746_vm2, %v3223_v40  ;;  %v3215_v30 = vadd.f32 %v6614_v62, %v3199_v33  ;;  %v3036_v41 = vadd.f32 %v3008_v0, %v2872_v63  ;;  %v4588_v45 = vpop.f32.mrb[151].mxu1 }
 0x42c   : > { %3236 = vst.msk [vmem:[%s6621_s17 + $0xa] sm:$0xf0] %vm3235_vm5, %v3223_v40 }
 0x42d   : > { %v3224_v9 = vmax.f32 %v3215_v30, 0.0  ;;  %v3200_v1 = vadd.f32 %v6580_v52, %v3036_v41 }
 0x42e   : > { %v3013_v48 = vpop.f32.mrb[152].mxu1 }
 0x42f   : > { %3238 = vst.msk [vmem:[%s6621_s17 + $0x12] sm:$0x7] %vm3237_vm6, %v3224_v9  ;;  %v3216_v42 = vadd.f32 %v6614_v62, %v3200_v1  ;;  %v3037_v50 = vadd.f32 %v3013_v48, %v2873_v3  ;;  %v4591_v8 = vpop.f32.mrb[153].mxu1 }
 0x430   : > { %3240 = vst.msk [vmem:[%s6621_s17 + $0xf] sm:$0xc0] %vm3239_vm7, %v3224_v9 }
 0x431   : > { %v3225_v28 = vmax.f32 %v3216_v42, 0.0  ;;  %v3201_v44 = vadd.f32 %v6582_v51, %v3037_v50 }
 0x432   : > { %v3018_v59 = vpop.f32.mrb[154].mxu1 }
 0x433   : > { %3242 = vst.msk [vmem:[%s6621_s17 + $0x17] sm:$0x1f] %vm3241_vm8, %v3225_v28  ;;  %v3217_v19 = vadd.f32 %v6614_v62, %v3201_v44  ;;  %v3038_v39 = vadd.f32 %v3018_v59, %v2874_v60  ;;  %v4594_v52 = vpop.f32.mrb[155].mxu1 }
 0x435   : > { %v3226_v49 = vmax.f32 %v3217_v19, 0.0  ;;  %v3202_v5 = vadd.f32 %v6584_v21, %v3038_v39 }
 0x436   : > { %v3023_v54 = vpop.f32.mrb[156].mxu1 }
 0x437   : > { %3243 = vst.msk [vmem:[%s6621_s17 + $0x1c] sm:$0x7f] %vm3230_vm3, %v3226_v49  ;;  %v3218_v61 = vadd.f32 %v6614_v62, %v3202_v5  ;;  %v3039_v58 = vadd.f32 %v3023_v54, %v6605_v13  ;;  %v4597_v51 = vpop.f32.mrb[157].mxu1 }
 0x439   : > { %v3227_v63 = vmax.f32 %v3218_v61, 0.0  ;;  %v3203_v27 = vadd.f32 %v6586_v37, %v3039_v58 }
 0x43a   : > { %v3028_v11 = vpop.f32.mrb[158].mxu1 }
 0x43b   : > { %3244 = vst.msk [vmem:[%s6621_s17 + $0x21] sm:$0xfc] %vm3232_vm4, %v3227_v63  ;;  %v3219_v22 = vadd.f32 %v6614_v62, %v3203_v27  ;;  %v3040_v21 = vadd.f32 %v3028_v11, %v6608_v18  ;;  %v4600_v3 = vpop.f32.mrb[159].mxu1 }
 0x43d   : > { %v3228_v25 = vmax.f32 %v3219_v22, 0.0 }
 0x43e   : > { %v3192_v7 = vpop.f32.mrb[160].mxu1 }
 0x43f   : > { %3245 = vst.msk [vmem:[%s6621_s17 + $0x29] sm:$0x1] %vm1746_vm2, %v3228_v25  ;;  %v3204_v31 = vadd.f32 %v3192_v7, %v3040_v21  ;;  %v4643_v60 = vpop.f32.mrb[161].mxu1 }
 0x440   : > { %3246 = vst.msk [vmem:[%s6621_s17 + $0x26] sm:$0xf0] %vm3235_vm5, %v3228_v25 }
 0x441   : > { %v3220_v36 = vadd.f32 %v6614_v62, %v3204_v31 }
 0x443   : > { %v3229_v6 = vmax.f32 %v3220_v36, 0.0 }
 0x445   : > { %3247 = vst.msk [vmem:[%s6621_s17 + $0x2e] sm:$0x7] %vm3237_vm6, %v3229_v6 }
 0x446 PF: > { %s17_s24 = sadd.s32 1, %s5071_s24  }
 0x447   : > { %p14_p4 = scmp.ge.s32.totalorder %s17_s24, 4  }
 0x449   :  { %16 = sbr.rel (!%p14_p4) target bundleno = 1 (0x1), region = 89 }

</bundles_post_ra>
